<compile_context>
chip_gen: v5e
topology: v5e:2x2
jax: 0.10.0
libtpu: 0.0.40
codegen_flags: <defaults>
</compile_context>

<pallas_src>
import functools

import jax
import jax.numpy as jnp
from jax.experimental import pallas as pl
from jax.experimental.pallas import tpu as pltpu

EPS = 1e-5                     # nn.BatchNorm2d default
LANE = 128                     # TPU lane width
MATMUL_DTYPE = jnp.bfloat16    # MXU operand dtype; accumulation / BN stay f32


def _round_up(x, m):
    return (x + m - 1) // m * m


def _vmem_budget_bytes():
    """Generation-aware VMEM budget (v5e/v6e: 128 MiB, v7x: 64 MiB physical)."""
    try:
        cap = int(pltpu.get_tpu_info().vmem_capacity_bytes)
    except Exception:
        cap = 64 * 1024 * 1024
    return min(int(cap * 3 // 4), 96 * 1024 * 1024)


def _pick_hb(H, W, CP, K1, budget):
    """Largest H-block (divisor of H) whose pass-2 working set fits `budget`."""
    fixed = 9 * CP * CP * 2 * 2 + K1 * CP * 2 * 2 + 8 * CP * 4   # weights + vecs
    per_row = CP * 38 + K1 * 8   # y/slab/patch/z2 temps + double-buffered I/O
    max_rows = max(W, (budget - fixed) // per_row)
    for hb in range(H, 0, -1):
        if H % hb == 0 and hb * W <= max_rows:
            return hb
    return 1   # TODO(synk): also tile W for extremely wide images


# --------------------------------------------------------------------------- #
# Kernels
# --------------------------------------------------------------------------- #
def _stats1_kernel(x1_ref, w1_ref, b1_ref, st_ref, *, rows):
    """conv1 on one row block -> per-block BN1 partials [sum, centered M2]."""
    z = jnp.dot(x1_ref[...], w1_ref[...], preferred_element_type=jnp.float32)
    z = z + b1_ref[...]
    s = jnp.sum(z, axis=0, keepdims=True)
    mu = s * (1.0 / rows)
    m2 = jnp.sum((z - mu) * (z - mu), axis=0, keepdims=True)
    st_ref[...] = jnp.concatenate([s, m2], axis=0)[None]


def _conv2_kernel(x1t_ref, x1c_ref, x1b_ref, w1_ref, b1_ref, sc1_ref, sh1_ref,
                  w2_ref, b2_ref, z2_ref, st_ref, *, W, RB, CP, nHB):
    """Recompute conv1 (+1-row halo), BN1+ReLU, conv2 as one K=9*CP matmul."""
    hb = pl.program_id(1)
    f32 = jnp.float32

    # ---- stage 1 recompute on [top halo | center | bottom halo] rows -------
    x_all = jnp.concatenate([x1t_ref[...], x1c_ref[...], x1b_ref[...]], axis=0)
    z1 = jnp.dot(x_all, w1_ref[...], preferred_element_type=f32) + b1_ref[...]
    y = jnp.maximum(z1 * sc1_ref[...] + sh1_ref[...], 0.0)
    y = y.astype(MATMUL_DTYPE)                                  # (RB + 2W, CP)

    # Halo rows at image boundaries are conv2's zero padding (zero in y-space).
    r_all = jax.lax.broadcasted_iota(jnp.int32, (RB + 2 * W, 1), 0)
    pad_row = ((r_all < W) & (hb == 0)) | ((r_all >= RB + W) & (hb == nHB - 1))
    y = jnp.where(pad_row, jnp.zeros_like(y), y)

    # ---- stage 2: build (RB, 9*CP) im2col patch from contiguous windows ----
    guard = jnp.zeros((W, CP), MATMUL_DTYPE)
    slab = jnp.concatenate([guard, y, guard], axis=0)           # (RB + 4W, CP)

    r = jax.lax.broadcasted_iota(jnp.int32, (RB, 1), 0)
    wcol = r % W
    left_edge = wcol == 0
    right_edge = wcol == (W - 1)

    cols = []
    for dy in range(3):
        for dx in range(3):
            off = (dy + 1) * W + (dx - 1)                       # static offset
            v = jax.lax.slice_in_dim(slab, off, off + RB, axis=0)
            if dx == 0:                 # mask wrap-around at the left edge
                v = jnp.where(left_edge, jnp.zeros_like(v), v)
            elif dx == 2:               # mask wrap-around at the right edge
                v = jnp.where(right_edge, jnp.zeros_like(v), v)
            cols.append(v)
    patch = jnp.concatenate(cols, axis=1)                       # (RB, 9*CP)

    z2 = jnp.dot(patch, w2_ref[...], preferred_element_type=f32) + b2_ref[...]
    z2_ref[...] = z2

    # ---- per-block BN2 partial statistics (two-pass within the block) ------
    s = jnp.sum(z2, axis=0, keepdims=True)
    mu = s * (1.0 / RB)
    m2 = jnp.sum((z2 - mu) * (z2 - mu), axis=0, keepdims=True)
    st_ref[...] = jnp.concatenate([s, m2], axis=0)[None]


def _bn_relu_kernel(z_ref, sc_ref, sh_ref, o_ref, *, cout):
    """BN2 + ReLU finalize; drop the lane padding when writing out."""
    y = jnp.maximum(z_ref[...] * sc_ref[...] + sh_ref[...], 0.0)
    o_ref[...] = y[:, :cout]


# --------------------------------------------------------------------------- #
# Wrapper-side glue
# --------------------------------------------------------------------------- #
def _stage1_im2col(x_nhwc):
    """(N,H,W,Cin) -> (N*H*W, 9*Cin) bf16 im2col (tiny tensor; no K padding)."""
    N, H, W, Cin = x_nhwc.shape
    xp = jnp.pad(x_nhwc, ((0, 0), (1, 1), (1, 1), (0, 0)))
    taps = [xp[:, dy:dy + H, dx:dx + W, :]
            for dy in range(3) for dx in range(3)]
    x1 = jnp.concatenate(taps, axis=-1).reshape(N * H * W, 9 * Cin)
    return x1.astype(MATMUL_DTYPE)


def _bn_scale_shift(stats, rows_per_block, total_rows, gamma_p, beta_p):
    """Combine per-block [sum, M2] (Chan) -> fused BN scale/shift, (1, CP)."""
    sums = stats[:, 0, :]
    m2s = stats[:, 1, :]
    mean_b = sums / rows_per_block
    mean = jnp.sum(sums, axis=0, keepdims=True) / total_rows
    m2 = jnp.sum(m2s, axis=0, keepdims=True) + rows_per_block * jnp.sum(
        (mean_b - mean) ** 2, axis=0, keepdims=True)
    var = m2 / total_rows                       # biased, like BN train mode
    scale = gamma_p * jax.lax.rsqrt(var + EPS)
    shift = beta_p - mean * scale
    return scale, shift


@jax.jit
def inconv_forward(x_nchw, params):
    """inconv.forward: NCHW in, NCHW out (matches the PyTorch module)."""
    w1, b1, g1, be1, w2, b2, g2, be2 = params
    N, Cin, H, W = x_nchw.shape
    Cout = w1.shape[0]

    assert W % 8 == 0, "TODO(synk): pad W to a multiple of 8 for general widths"

    CP = _round_up(Cout, LANE)
    K1 = 9 * Cin
    R = N * H * W

    budget = _vmem_budget_bytes()
    HB = _pick_hb(H, W, CP, K1, budget // 2)
    nHB = H // HB
    RB = HB * W
    NBLK = N * nHB

    # ---- layout glue (small, one-time) --------------------------------------
    x_nhwc = jnp.transpose(x_nchw, (0, 2, 3, 1))
    x1 = _stage1_im2col(x_nhwc)                                  # (R, K1) bf16

    w1m = jnp.transpose(w1, (2, 3, 1, 0)).reshape(K1, Cout)
    w1m = jnp.pad(w1m, ((0, 0), (0, CP - Cout))).astype(MATMUL_DTYPE)
    w2m = jnp.transpose(w2, (2, 3, 1, 0))                        # (3,3,Ci,Co)
    w2m = jnp.pad(w2m, ((0, 0), (0, 0), (0, CP - Cout), (0, CP - Cout)))
    w2m = w2m.reshape(9 * CP, CP).astype(MATMUL_DTYPE)

    def cvec(v):
        return jnp.pad(v.astype(jnp.float32), (0, CP - Cout)).reshape(1, CP)

    b1p, g1p, be1p = cvec(b1), cvec(g1), cvec(be1)
    b2p, g2p, be2p = cvec(b2), cvec(g2), cvec(be2)

    const = lambda n, h: (0, 0)       # weights/vectors: resident across grid
    params2 = pltpu.CompilerParams(
        dimension_semantics=("parallel", "parallel"), vmem_limit_bytes=budget)

    # ---- pass 1: conv1 per block -> per-block BN1 partial stats -------------
    stats1 = pl.pallas_call(
        functools.partial(_stats1_kernel, rows=RB),
        grid=(N, nHB),
        in_specs=[
            pl.BlockSpec((RB, K1), lambda n, h: (n * nHB + h, 0)),
            pl.BlockSpec((K1, CP), const),
            pl.BlockSpec((1, CP), const),
        ],
        out_specs=pl.BlockSpec((1, 2, CP), lambda n, h: (n * nHB + h, 0, 0)),
        out_shape=jax.ShapeDtypeStruct((NBLK, 2, CP), jnp.float32),
        compiler_params=params2,
    )(x1, w1m, b1p)
    sc1, sh1 = _bn_scale_shift(stats1, RB, R, g1p, be1p)

    # ---- pass 2: BN1+ReLU (recomputed conv1 + halo), conv2, BN2 partials ----
    top_map = lambda n, h: (jnp.maximum(n * H + h * HB - 1, 0), 0)
    bot_map = lambda n, h: (jnp.minimum(n * H + h * HB + HB, N * H - 1), 0)
    z2, stats2 = pl.pallas_call(
        functools.partial(_conv2_kernel, W=W, RB=RB, CP=CP, nHB=nHB),
        grid=(N, nHB),
        in_specs=[
            pl.BlockSpec((W, K1), top_map),                       # top halo
            pl.BlockSpec((RB, K1), lambda n, h: (n * nHB + h, 0)),  # center
            pl.BlockSpec((W, K1), bot_map),                       # bottom halo
            pl.BlockSpec((K1, CP), const),
            pl.BlockSpec((1, CP), const),
            pl.BlockSpec((1, CP), const),
            pl.BlockSpec((1, CP), const),
            pl.BlockSpec((9 * CP, CP), const),
            pl.BlockSpec((1, CP), const),
        ],
        out_specs=(
            pl.BlockSpec((RB, CP), lambda n, h: (n * nHB + h, 0)),
            pl.BlockSpec((1, 2, CP), lambda n, h: (n * nHB + h, 0, 0)),
        ),
        out_shape=(
            jax.ShapeDtypeStruct((R, CP), jnp.float32),
            jax.ShapeDtypeStruct((NBLK, 2, CP), jnp.float32),
        ),
        compiler_params=params2,
    )(x1, x1, x1, w1m, b1p, sc1, sh1, w2m, b2p)
    # TODO(synk): for Cout << 128, storing z2 Cout-wide would halve its HBM
    # traffic at the cost of masked lane stores.
    sc2, sh2 = _bn_scale_shift(stats2, RB, R, g2p, be2p)

    # ---- pass 3: BN2 + ReLU finalize (writes only the real Cout channels) ---
    out2d = pl.pallas_call(
        functools.partial(_bn_relu_kernel, cout=Cout),
        grid=(NBLK,),
        in_specs=[
            pl.BlockSpec((RB, CP), lambda i: (i, 0)),
            pl.BlockSpec((1, CP), lambda i: (0, 0)),
            pl.BlockSpec((1, CP), lambda i: (0, 0)),
        ],
        out_specs=pl.BlockSpec((RB, Cout), lambda i: (i, 0)),
        out_shape=jax.ShapeDtypeStruct((R, Cout), jnp.float32),
        compiler_params=pltpu.CompilerParams(
            dimension_semantics=("parallel",), vmem_limit_bytes=budget),
    )(z2, sc2, sh2)

    # NCHW only at the module boundary (keep NHWC if the consumer is Pallas).
    y = out2d.reshape(N, H, W, Cout)
    return jnp.transpose(y, (0, 3, 1, 2))


# --------------------------------------------------------------------------- #
# Test harness
# --------------------------------------------------------------------------- #
def init_params(key, in_ch, out_ch):
    """Deterministic synthetic init (shapes per nn.Conv2d / nn.BatchNorm2d)."""
    k1, k2, k3, k4 = jax.random.split(key, 4)
    bound1 = 1.0 / jnp.sqrt(in_ch * 9.0)
    bound2 = 1.0 / jnp.sqrt(out_ch * 9.0)
    w1 = jax.random.uniform(k1, (out_ch, in_ch, 3, 3), jnp.float32, -bound1, bound1)
    b1 = jax.random.uniform(k2, (out_ch,), jnp.float32, -bound1, bound1)
    w2 = jax.random.uniform(k3, (out_ch, out_ch, 3, 3), jnp.float32, -bound2, bound2)
    b2 = jax.random.uniform(k4, (out_ch,), jnp.float32, -bound2, bound2)
    g1 = jnp.ones((out_ch,), jnp.float32)
    be1 = jnp.zeros((out_ch,), jnp.float32)
    g2 = jnp.ones((out_ch,), jnp.float32)
    be2 = jnp.zeros((out_ch,), jnp.float32)
    return (w1, b1, g1, be1, w2, b2, g2, be2)


def _reference(x_nchw, params, matmul_dtype=jnp.float32):
    """Pure-JAX reference (lax conv + train-mode BN + ReLU)."""
    w1, b1, g1, be1, w2, b2, g2, be2 = params

    def stage(x, w, b, g, be):
        y = jax.lax.conv_general_dilated(
            x.astype(matmul_dtype), w.astype(matmul_dtype),
            window_strides=(1, 1), padding=((1, 1), (1, 1)),
            dimension_numbers=("NCHW", "OIHW", "NCHW"),
            preferred_element_type=jnp.float32)
        y = y + b[None, :, None, None]
        mean = jnp.mean(y, axis=(0, 2, 3), keepdims=True)
        var = jnp.mean((y - mean) ** 2, axis=(0, 2, 3), keepdims=True)
        y = (y - mean) * jax.lax.rsqrt(var + EPS)
        y = y * g[None, :, None, None] + be[None, :, None, None]
        return jnp.maximum(y, 0.0)

    h = stage(x_nchw, w1, b1, g1, be1)
    return stage(h, w2, b2, g2, be2)


if __name__ == "__main__":
    key = jax.random.PRNGKey(0)
    kx, kp = jax.random.split(key)

    N, IN_CH, OUT_CH, H, W = 2, 4, 8, 16, 16
    x = jax.random.normal(kx, (N, IN_CH, H, W), jnp.float32)   # NCHW, as PyTorch
    params = init_params(kp, IN_CH, OUT_CH)

    out = jax.block_until_ready(inconv_forward(x, params))
    assert out.shape == (N, OUT_CH, H, W), out.shape

    # Precision-matched reference (same bf16 MXU operands, f32 accum / BN).
    ref_matched = jax.block_until_ready(_reference(x, params, MATMUL_DTYPE))
    assert jnp.allclose(out, ref_matched, atol=1e-2, rtol=1e-2), \
        float(jnp.max(jnp.abs(out - ref_matched)))

    # Loose sanity check against full-f32 module semantics (bf16 matmul noise).
    ref_f32 = jax.block_until_ready(_reference(x, params, jnp.float32))
    assert jnp.allclose(out, ref_f32, atol=1e-1, rtol=1e-1), \
        float(jnp.max(jnp.abs(out - ref_f32)))

    print("KERNEL_OK")
</pallas_src>

<mosaic_0001>
module attributes {stable_mosaic.version = 11 : i64} {
  func.func @_stats1_kernel(%arg0: i32, %arg1: i32, %arg2: memref<256x36xbf16, #tpu.memory_space<vmem>>, %arg3: memref<36x128xbf16, #tpu.memory_space<vmem>>, %arg4: memref<1x128xf32, #tpu.memory_space<vmem>>, %arg5: memref<1x2x128xf32, #tpu.memory_space<vmem>>) attributes {dimension_semantics = [#tpu.dimension_semantics<parallel>, #tpu.dimension_semantics<parallel>], iteration_bounds = array<i64: 2, 1>, scalar_prefetch = 0 : i64, scratch_operands = 0 : i64, tpu.core_type = #tpu.core_type<tc>, window_params = [{transform_indices = @transform_0, window_bounds = array<i64: 256, 36>}, {pipeline_mode = #tpu.pipeline_mode<synchronous>, transform_indices = @transform_1, window_bounds = array<i64: 36, 128>}, {pipeline_mode = #tpu.pipeline_mode<synchronous>, transform_indices = @transform_2, window_bounds = array<i64: 1, 128>}, {transform_indices = @transform_3, window_bounds = array<i64: 1, 2, 128>}]} {
    %c0 = arith.constant 0 : index
    %c0_0 = arith.constant 0 : index
    %0 = vector.load %arg2[%c0, %c0_0] : memref<256x36xbf16, #tpu.memory_space<vmem>>, vector<256x36xbf16>
    %c0_1 = arith.constant 0 : index
    %c0_2 = arith.constant 0 : index
    %1 = vector.load %arg3[%c0_1, %c0_2] : memref<36x128xbf16, #tpu.memory_space<vmem>>, vector<36x128xbf16>
    %cst = arith.constant dense<0.000000e+00> : vector<256x128xf32>
    %2 = tpu.matmul %0, %1, %cst {dimension_numbers = #tpu.dot_dimension_numbers<[1], [0], [0], [1], [0, 0, 1, 1], [], []>} : vector<256x36xbf16>, vector<36x128xbf16>, vector<256x128xf32> -> vector<256x128xf32>
    %c0_3 = arith.constant 0 : index
    %c0_4 = arith.constant 0 : index
    %3 = vector.load %arg4[%c0_3, %c0_4] : memref<1x128xf32, #tpu.memory_space<vmem>>, vector<1x128xf32>
    %4 = vector.broadcast %3 : vector<1x128xf32> to vector<256x128xf32>
    %5 = arith.addf %2, %4 : vector<256x128xf32>
    %cst_5 = arith.constant dense<0.000000e+00> : vector<128xf32>
    %6 = vector.multi_reduction <add>, %5, %cst_5 [0] : vector<256x128xf32> to vector<128xf32>
    %7 = vector.shape_cast %6 : vector<128xf32> to vector<1x128xf32>
    %cst_6 = arith.constant 3.906250e-03 : f32
    %8 = vector.broadcast %cst_6 : f32 to vector<1x128xf32>
    %9 = arith.mulf %7, %8 : vector<1x128xf32>
    %10 = vector.broadcast %9 : vector<1x128xf32> to vector<256x128xf32>
    %11 = arith.subf %5, %10 : vector<256x128xf32>
    %12 = vector.broadcast %9 : vector<1x128xf32> to vector<256x128xf32>
    %13 = arith.subf %5, %12 : vector<256x128xf32>
    %14 = arith.mulf %11, %13 : vector<256x128xf32>
    %cst_7 = arith.constant dense<0.000000e+00> : vector<128xf32>
    %15 = vector.multi_reduction <add>, %14, %cst_7 [0] : vector<256x128xf32> to vector<128xf32>
    %16 = vector.shape_cast %15 : vector<128xf32> to vector<1x128xf32>
    %17 = tpu.concatenate %7, %16 in 0 : vector<1x128xf32>, vector<1x128xf32> -> vector<2x128xf32>
    %18 = vector.shape_cast %17 : vector<2x128xf32> to vector<1x2x128xf32>
    %c0_8 = arith.constant 0 : index
    %c0_9 = arith.constant 0 : index
    %c0_10 = arith.constant 0 : index
    %19 = vector.load %arg5[%c0_8, %c0_9, %c0_10] : memref<1x2x128xf32, #tpu.memory_space<vmem>>, vector<1x2x128xf32>
    tpu.vector_store %arg5[%c0_8, %c0_9, %c0_10], %18 {strides = array<i32>} : memref<1x2x128xf32, #tpu.memory_space<vmem>>, vector<1x2x128xf32>,
    return
  }
  func.func @transform_0(%arg0: i32, %arg1: i32) -> (i32, i32) {
    %c1_i32 = arith.constant 1 : i32
    %0 = arith.muli %arg0, %c1_i32 : i32
    %1 = arith.addi %0, %arg1 : i32
    %c0_i32 = arith.constant 0 : i32
    %c0_i32_0 = arith.constant 0 : i32
    return %1, %c0_i32 : i32, i32
  }
  func.func @transform_1(%arg0: i32, %arg1: i32) -> (i32, i32) {
    %c0_i32 = arith.constant 0 : i32
    %c0_i32_0 = arith.constant 0 : i32
    %c0_i32_1 = arith.constant 0 : i32
    return %c0_i32, %c0_i32_0 : i32, i32
  }
  func.func @transform_2(%arg0: i32, %arg1: i32) -> (i32, i32) {
    %c0_i32 = arith.constant 0 : i32
    %c0_i32_0 = arith.constant 0 : i32
    %c0_i32_1 = arith.constant 0 : i32
    return %c0_i32, %c0_i32_0 : i32, i32
  }
  func.func @transform_3(%arg0: i32, %arg1: i32) -> (i32, i32, i32) {
    %c1_i32 = arith.constant 1 : i32
    %0 = arith.muli %arg0, %c1_i32 : i32
    %1 = arith.addi %0, %arg1 : i32
    %c0_i32 = arith.constant 0 : i32
    %c0_i32_0 = arith.constant 0 : i32
    %c0_i32_1 = arith.constant 0 : i32
    return %1, %c0_i32, %c0_i32_0 : i32, i32, i32
  }
}

module attributes {stable_mosaic.version = 11 : i64} {
  func.func @_bn_relu_kernel(%arg0: i32, %arg1: memref<256x128xf32, #tpu.memory_space<vmem>>, %arg2: memref<1x128xf32, #tpu.memory_space<vmem>>, %arg3: memref<1x128xf32, #tpu.memory_space<vmem>>, %arg4: memref<256x8xf32, #tpu.memory_space<vmem>>) attributes {dimension_semantics = [#tpu.dimension_semantics<parallel>], iteration_bounds = array<i64: 2>, scalar_prefetch = 0 : i64, scratch_operands = 0 : i64, tpu.core_type = #tpu.core_type<tc>, window_params = [{transform_indices = @transform_0, window_bounds = array<i64: 256, 128>}, {pipeline_mode = #tpu.pipeline_mode<synchronous>, transform_indices = @transform_1, window_bounds = array<i64: 1, 128>}, {pipeline_mode = #tpu.pipeline_mode<synchronous>, transform_indices = @transform_2, window_bounds = array<i64: 1, 128>}, {transform_indices = @transform_3, window_bounds = array<i64: 256, 8>}]} {
    %c0 = arith.constant 0 : index
    %c0_0 = arith.constant 0 : index
    %0 = vector.load %arg1[%c0, %c0_0] : memref<256x128xf32, #tpu.memory_space<vmem>>, vector<256x128xf32>
    %c0_1 = arith.constant 0 : index
    %c0_2 = arith.constant 0 : index
    %1 = vector.load %arg2[%c0_1, %c0_2] : memref<1x128xf32, #tpu.memory_space<vmem>>, vector<1x128xf32>
    %2 = vector.broadcast %1 : vector<1x128xf32> to vector<256x128xf32>
    %3 = arith.mulf %0, %2 : vector<256x128xf32>
    %c0_3 = arith.constant 0 : index
    %c0_4 = arith.constant 0 : index
    %4 = vector.load %arg3[%c0_3, %c0_4] : memref<1x128xf32, #tpu.memory_space<vmem>>, vector<1x128xf32>
    %5 = vector.broadcast %4 : vector<1x128xf32> to vector<256x128xf32>
    %6 = arith.addf %3, %5 : vector<256x128xf32>
    %cst = arith.constant 0.000000e+00 : f32
    %7 = vector.broadcast %cst : f32 to vector<256x128xf32>
    %8 = arith.maximumf %6, %7 : vector<256x128xf32>
    %9 = vector.extract_strided_slice %8 {offsets = [0, 0], sizes = [256, 8], strides = [1, 1]} : vector<256x128xf32> to vector<256x8xf32>
    %c0_5 = arith.constant 0 : index
    %c0_6 = arith.constant 0 : index
    %10 = vector.load %arg4[%c0_5, %c0_6] : memref<256x8xf32, #tpu.memory_space<vmem>>, vector<256x8xf32>
    tpu.vector_store %arg4[%c0_5, %c0_6], %9 {strides = array<i32>} : memref<256x8xf32, #tpu.memory_space<vmem>>, vector<256x8xf32>,
    return
  }
  func.func @transform_0(%arg0: i32) -> (i32, i32) {
    %c0_i32 = arith.constant 0 : i32
    %c0_i32_0 = arith.constant 0 : i32
    return %arg0, %c0_i32 : i32, i32
  }
  func.func @transform_1(%arg0: i32) -> (i32, i32) {
    %c0_i32 = arith.constant 0 : i32
    %c0_i32_0 = arith.constant 0 : i32
    %c0_i32_1 = arith.constant 0 : i32
    return %c0_i32, %c0_i32_0 : i32, i32
  }
  func.func @transform_2(%arg0: i32) -> (i32, i32) {
    %c0_i32 = arith.constant 0 : i32
    %c0_i32_0 = arith.constant 0 : i32
    %c0_i32_1 = arith.constant 0 : i32
    return %c0_i32, %c0_i32_0 : i32, i32
  }
  func.func @transform_3(%arg0: i32) -> (i32, i32) {
    %c0_i32 = arith.constant 0 : i32
    %c0_i32_0 = arith.constant 0 : i32
    return %arg0, %c0_i32 : i32, i32
  }
}

module attributes {stable_mosaic.version = 11 : i64} {
  func.func @_conv2_kernel(%arg0: i32, %arg1: i32, %arg2: memref<16x36xbf16, #tpu.memory_space<vmem>>, %arg3: memref<256x36xbf16, #tpu.memory_space<vmem>>, %arg4: memref<16x36xbf16, #tpu.memory_space<vmem>>, %arg5: memref<36x128xbf16, #tpu.memory_space<vmem>>, %arg6: memref<1x128xf32, #tpu.memory_space<vmem>>, %arg7: memref<1x128xf32, #tpu.memory_space<vmem>>, %arg8: memref<1x128xf32, #tpu.memory_space<vmem>>, %arg9: memref<1152x128xbf16, #tpu.memory_space<vmem>>, %arg10: memref<1x128xf32, #tpu.memory_space<vmem>>, %arg11: memref<256x128xf32, #tpu.memory_space<vmem>>, %arg12: memref<1x2x128xf32, #tpu.memory_space<vmem>>) attributes {dimension_semantics = [#tpu.dimension_semantics<parallel>, #tpu.dimension_semantics<parallel>], iteration_bounds = array<i64: 2, 1>, scalar_prefetch = 0 : i64, scratch_operands = 0 : i64, tpu.core_type = #tpu.core_type<tc>, window_params = [{transform_indices = @transform_0, window_bounds = array<i64: 16, 36>}, {transform_indices = @transform_1, window_bounds = array<i64: 256, 36>}, {transform_indices = @transform_2, window_bounds = array<i64: 16, 36>}, {pipeline_mode = #tpu.pipeline_mode<synchronous>, transform_indices = @transform_3, window_bounds = array<i64: 36, 128>}, {pipeline_mode = #tpu.pipeline_mode<synchronous>, transform_indices = @transform_4, window_bounds = array<i64: 1, 128>}, {pipeline_mode = #tpu.pipeline_mode<synchronous>, transform_indices = @transform_5, window_bounds = array<i64: 1, 128>}, {pipeline_mode = #tpu.pipeline_mode<synchronous>, transform_indices = @transform_6, window_bounds = array<i64: 1, 128>}, {pipeline_mode = #tpu.pipeline_mode<synchronous>, transform_indices = @transform_7, window_bounds = array<i64: 1152, 128>}, {pipeline_mode = #tpu.pipeline_mode<synchronous>, transform_indices = @transform_8, window_bounds = array<i64: 1, 128>}, {transform_indices = @transform_9, window_bounds = array<i64: 256, 128>}, {transform_indices = @transform_10, window_bounds = array<i64: 1, 2, 128>}]} {
    %c0 = arith.constant 0 : index
    %c0_0 = arith.constant 0 : index
    %0 = vector.load %arg2[%c0, %c0_0] : memref<16x36xbf16, #tpu.memory_space<vmem>>, vector<16x36xbf16>
    %c0_1 = arith.constant 0 : index
    %c0_2 = arith.constant 0 : index
    %1 = vector.load %arg3[%c0_1, %c0_2] : memref<256x36xbf16, #tpu.memory_space<vmem>>, vector<256x36xbf16>
    %c0_3 = arith.constant 0 : index
    %c0_4 = arith.constant 0 : index
    %2 = vector.load %arg4[%c0_3, %c0_4] : memref<16x36xbf16, #tpu.memory_space<vmem>>, vector<16x36xbf16>
    %3 = tpu.concatenate %0, %1, %2 in 0 : vector<16x36xbf16>, vector<256x36xbf16>, vector<16x36xbf16> -> vector<288x36xbf16>
    %c0_5 = arith.constant 0 : index
    %c0_6 = arith.constant 0 : index
    %4 = vector.load %arg5[%c0_5, %c0_6] : memref<36x128xbf16, #tpu.memory_space<vmem>>, vector<36x128xbf16>
    %cst = arith.constant dense<0.000000e+00> : vector<288x128xf32>
    %5 = tpu.matmul %3, %4, %cst {dimension_numbers = #tpu.dot_dimension_numbers<[1], [0], [0], [1], [0, 0, 1, 1], [], []>} : vector<288x36xbf16>, vector<36x128xbf16>, vector<288x128xf32> -> vector<288x128xf32>
    %c0_7 = arith.constant 0 : index
    %c0_8 = arith.constant 0 : index
    %6 = vector.load %arg6[%c0_7, %c0_8] : memref<1x128xf32, #tpu.memory_space<vmem>>, vector<1x128xf32>
    %7 = vector.broadcast %6 : vector<1x128xf32> to vector<288x128xf32>
    %8 = arith.addf %5, %7 : vector<288x128xf32>
    %c0_9 = arith.constant 0 : index
    %c0_10 = arith.constant 0 : index
    %9 = vector.load %arg7[%c0_9, %c0_10] : memref<1x128xf32, #tpu.memory_space<vmem>>, vector<1x128xf32>
    %10 = vector.broadcast %9 : vector<1x128xf32> to vector<288x128xf32>
    %11 = arith.mulf %8, %10 : vector<288x128xf32>
    %c0_11 = arith.constant 0 : index
    %c0_12 = arith.constant 0 : index
    %12 = vector.load %arg8[%c0_11, %c0_12] : memref<1x128xf32, #tpu.memory_space<vmem>>, vector<1x128xf32>
    %13 = vector.broadcast %12 : vector<1x128xf32> to vector<288x128xf32>
    %14 = arith.addf %11, %13 : vector<288x128xf32>
    %cst_13 = arith.constant 0.000000e+00 : f32
    %15 = vector.broadcast %cst_13 : f32 to vector<288x128xf32>
    %16 = arith.maximumf %14, %15 : vector<288x128xf32>
    %17 = arith.truncf %16 : vector<288x128xf32> to vector<288x128xbf16>
    %18 = tpu.iota {dimensions = array<i32: 0>} : vector<288x1xi32>
    %c16_i32 = arith.constant 16 : i32
    %19 = vector.broadcast %c16_i32 : i32 to vector<288x1xi32>
    %20 = arith.cmpi slt, %18, %19 : vector<288x1xi32>
    %c0_i32 = arith.constant 0 : i32
    %21 = arith.cmpi eq, %arg1, %c0_i32 : i32
    %22 = vector.broadcast %21 : i1 to vector<288x1xi1>
    %23 = arith.andi %20, %22 : vector<288x1xi1>
    %c272_i32 = arith.constant 272 : i32
    %24 = vector.broadcast %c272_i32 : i32 to vector<288x1xi32>
    %25 = arith.cmpi sge, %18, %24 : vector<288x1xi32>
    %c0_i32_14 = arith.constant 0 : i32
    %26 = arith.cmpi eq, %arg1, %c0_i32_14 : i32
    %27 = vector.broadcast %26 : i1 to vector<288x1xi1>
    %28 = arith.andi %25, %27 : vector<288x1xi1>
    %29 = arith.ori %23, %28 : vector<288x1xi1>
    %cst_15 = arith.constant 0.000000e+00 : bf16
    %30 = vector.broadcast %cst_15 : bf16 to vector<288x128xbf16>
    %31 = vector.shape_cast %29 : vector<288x1xi1> to vector<288x1xi1>
    %32 = vector.broadcast %31 : vector<288x1xi1> to vector<288x128xi1>
    %33 = arith.select %32, %30, %17 : vector<288x128xi1>, vector<288x128xbf16>
    %cst_16 = arith.constant 0.000000e+00 : bf16
    %34 = vector.broadcast %cst_16 : bf16 to vector<16x128xbf16>
    %35 = tpu.concatenate %34, %33, %34 in 0 : vector<16x128xbf16>, vector<288x128xbf16>, vector<16x128xbf16> -> vector<320x128xbf16>
    %36 = tpu.iota {dimensions = array<i32: 0>} : vector<256x1xi32>
    %c16_i32_17 = arith.constant 16 : i32
    %c0_i32_18 = arith.constant 0 : i32
    %37 = arith.cmpi eq, %c16_i32_17, %c0_i32_18 : i32
    %c1_i32 = arith.constant 1 : i32
    %38 = arith.select %37, %c1_i32, %c16_i32_17 : i32
    %39 = vector.broadcast %38 : i32 to vector<256x1xi32>
    %40 = arith.remsi %36, %39 : vector<256x1xi32>
    %c0_i32_19 = arith.constant 0 : i32
    %41 = vector.broadcast %c0_i32_19 : i32 to vector<256x1xi32>
    %42 = arith.cmpi ne, %40, %41 : vector<256x1xi32>
    %c0_i32_20 = arith.constant 0 : i32
    %43 = vector.broadcast %c0_i32_20 : i32 to vector<256x1xi32>
    %44 = arith.cmpi slt, %40, %43 : vector<256x1xi32>
    %c0_i32_21 = arith.constant 0 : i32
    %45 = arith.cmpi slt, %38, %c0_i32_21 : i32
    %46 = vector.broadcast %45 : i1 to vector<256x1xi1>
    %47 = vector.broadcast %46 : vector<256x1xi1> to vector<256x1xi1>
    %48 = arith.xori %44, %47 : vector<256x1xi1>
    %49 = arith.andi %48, %42 : vector<256x1xi1>
    %50 = vector.broadcast %38 : i32 to vector<256x1xi32>
    %51 = arith.addi %40, %50 : vector<256x1xi32>
    %52 = arith.select %49, %51, %40 : vector<256x1xi1>, vector<256x1xi32>
    %c0_i32_22 = arith.constant 0 : i32
    %53 = vector.broadcast %c0_i32_22 : i32 to vector<256x1xi32>
    %54 = arith.cmpi eq, %52, %53 : vector<256x1xi32>
    %c15_i32 = arith.constant 15 : i32
    %55 = vector.broadcast %c15_i32 : i32 to vector<256x1xi32>
    %56 = arith.cmpi eq, %52, %55 : vector<256x1xi32>
    %57 = vector.extract_strided_slice %35 {offsets = [15, 0], sizes = [256, 128], strides = [1, 1]} : vector<320x128xbf16> to vector<256x128xbf16>
    %cst_23 = arith.constant 0.000000e+00 : bf16
    %58 = vector.broadcast %cst_23 : bf16 to vector<256x128xbf16>
    %59 = vector.shape_cast %54 : vector<256x1xi1> to vector<256x1xi1>
    %60 = vector.broadcast %59 : vector<256x1xi1> to vector<256x128xi1>
    %61 = arith.select %60, %58, %57 : vector<256x128xi1>, vector<256x128xbf16>
    %62 = vector.extract_strided_slice %35 {offsets = [16, 0], sizes = [256, 128], strides = [1, 1]} : vector<320x128xbf16> to vector<256x128xbf16>
    %63 = vector.extract_strided_slice %35 {offsets = [17, 0], sizes = [256, 128], strides = [1, 1]} : vector<320x128xbf16> to vector<256x128xbf16>
    %cst_24 = arith.constant 0.000000e+00 : bf16
    %64 = vector.broadcast %cst_24 : bf16 to vector<256x128xbf16>
    %65 = vector.shape_cast %56 : vector<256x1xi1> to vector<256x1xi1>
    %66 = vector.broadcast %65 : vector<256x1xi1> to vector<256x128xi1>
    %67 = arith.select %66, %64, %63 : vector<256x128xi1>, vector<256x128xbf16>
    %68 = vector.extract_strided_slice %35 {offsets = [31, 0], sizes = [256, 128], strides = [1, 1]} : vector<320x128xbf16> to vector<256x128xbf16>
    %cst_25 = arith.constant 0.000000e+00 : bf16
    %69 = vector.broadcast %cst_25 : bf16 to vector<256x128xbf16>
    %70 = vector.shape_cast %54 : vector<256x1xi1> to vector<256x1xi1>
    %71 = vector.broadcast %70 : vector<256x1xi1> to vector<256x128xi1>
    %72 = arith.select %71, %69, %68 : vector<256x128xi1>, vector<256x128xbf16>
    %73 = vector.extract_strided_slice %35 {offsets = [32, 0], sizes = [256, 128], strides = [1, 1]} : vector<320x128xbf16> to vector<256x128xbf16>
    %74 = vector.extract_strided_slice %35 {offsets = [33, 0], sizes = [256, 128], strides = [1, 1]} : vector<320x128xbf16> to vector<256x128xbf16>
    %cst_26 = arith.constant 0.000000e+00 : bf16
    %75 = vector.broadcast %cst_26 : bf16 to vector<256x128xbf16>
    %76 = vector.shape_cast %56 : vector<256x1xi1> to vector<256x1xi1>
    %77 = vector.broadcast %76 : vector<256x1xi1> to vector<256x128xi1>
    %78 = arith.select %77, %75, %74 : vector<256x128xi1>, vector<256x128xbf16>
    %79 = vector.extract_strided_slice %35 {offsets = [47, 0], sizes = [256, 128], strides = [1, 1]} : vector<320x128xbf16> to vector<256x128xbf16>
    %cst_27 = arith.constant 0.000000e+00 : bf16
    %80 = vector.broadcast %cst_27 : bf16 to vector<256x128xbf16>
    %81 = vector.shape_cast %54 : vector<256x1xi1> to vector<256x1xi1>
    %82 = vector.broadcast %81 : vector<256x1xi1> to vector<256x128xi1>
    %83 = arith.select %82, %80, %79 : vector<256x128xi1>, vector<256x128xbf16>
    %84 = vector.extract_strided_slice %35 {offsets = [48, 0], sizes = [256, 128], strides = [1, 1]} : vector<320x128xbf16> to vector<256x128xbf16>
    %85 = vector.extract_strided_slice %35 {offsets = [49, 0], sizes = [256, 128], strides = [1, 1]} : vector<320x128xbf16> to vector<256x128xbf16>
    %cst_28 = arith.constant 0.000000e+00 : bf16
    %86 = vector.broadcast %cst_28 : bf16 to vector<256x128xbf16>
    %87 = vector.shape_cast %56 : vector<256x1xi1> to vector<256x1xi1>
    %88 = vector.broadcast %87 : vector<256x1xi1> to vector<256x128xi1>
    %89 = arith.select %88, %86, %85 : vector<256x128xi1>, vector<256x128xbf16>
    %90 = tpu.concatenate %61, %62, %67, %72, %73, %78, %83, %84, %89 in 1 : vector<256x128xbf16>, vector<256x128xbf16>, vector<256x128xbf16>, vector<256x128xbf16>, vector<256x128xbf16>, vector<256x128xbf16>, vector<256x128xbf16>, vector<256x128xbf16>, vector<256x128xbf16> -> vector<256x1152xbf16>
    %c0_29 = arith.constant 0 : index
    %c0_30 = arith.constant 0 : index
    %91 = vector.load %arg9[%c0_29, %c0_30] : memref<1152x128xbf16, #tpu.memory_space<vmem>>, vector<1152x128xbf16>
    %cst_31 = arith.constant dense<0.000000e+00> : vector<256x128xf32>
    %92 = tpu.matmul %90, %91, %cst_31 {dimension_numbers = #tpu.dot_dimension_numbers<[1], [0], [0], [1], [0, 0, 1, 1], [], []>} : vector<256x1152xbf16>, vector<1152x128xbf16>, vector<256x128xf32> -> vector<256x128xf32>
    %c0_32 = arith.constant 0 : index
    %c0_33 = arith.constant 0 : index
    %93 = vector.load %arg10[%c0_32, %c0_33] : memref<1x128xf32, #tpu.memory_space<vmem>>, vector<1x128xf32>
    %94 = vector.broadcast %93 : vector<1x128xf32> to vector<256x128xf32>
    %95 = arith.addf %92, %94 : vector<256x128xf32>
    %c0_34 = arith.constant 0 : index
    %c0_35 = arith.constant 0 : index
    %96 = vector.load %arg11[%c0_34, %c0_35] : memref<256x128xf32, #tpu.memory_space<vmem>>, vector<256x128xf32>
    tpu.vector_store %arg11[%c0_34, %c0_35], %95 {strides = array<i32>} : memref<256x128xf32, #tpu.memory_space<vmem>>, vector<256x128xf32>,
    %cst_36 = arith.constant dense<0.000000e+00> : vector<128xf32>
    %97 = vector.multi_reduction <add>, %95, %cst_36 [0] : vector<256x128xf32> to vector<128xf32>
    %98 = vector.shape_cast %97 : vector<128xf32> to vector<1x128xf32>
    %cst_37 = arith.constant 3.906250e-03 : f32
    %99 = vector.broadcast %cst_37 : f32 to vector<1x128xf32>
    %100 = arith.mulf %98, %99 : vector<1x128xf32>
    %101 = vector.broadcast %100 : vector<1x128xf32> to vector<256x128xf32>
    %102 = arith.subf %95, %101 : vector<256x128xf32>
    %103 = vector.broadcast %100 : vector<1x128xf32> to vector<256x128xf32>
    %104 = arith.subf %95, %103 : vector<256x128xf32>
    %105 = arith.mulf %102, %104 : vector<256x128xf32>
    %cst_38 = arith.constant dense<0.000000e+00> : vector<128xf32>
    %106 = vector.multi_reduction <add>, %105, %cst_38 [0] : vector<256x128xf32> to vector<128xf32>
    %107 = vector.shape_cast %106 : vector<128xf32> to vector<1x128xf32>
    %108 = tpu.concatenate %98, %107 in 0 : vector<1x128xf32>, vector<1x128xf32> -> vector<2x128xf32>
    %109 = vector.shape_cast %108 : vector<2x128xf32> to vector<1x2x128xf32>
    %c0_39 = arith.constant 0 : index
    %c0_40 = arith.constant 0 : index
    %c0_41 = arith.constant 0 : index
    %110 = vector.load %arg12[%c0_39, %c0_40, %c0_41] : memref<1x2x128xf32, #tpu.memory_space<vmem>>, vector<1x2x128xf32>
    tpu.vector_store %arg12[%c0_39, %c0_40, %c0_41], %109 {strides = array<i32>} : memref<1x2x128xf32, #tpu.memory_space<vmem>>, vector<1x2x128xf32>,
    return
  }
  func.func @transform_0(%arg0: i32, %arg1: i32) -> (i32, i32) {
    %c16_i32 = arith.constant 16 : i32
    %0 = arith.muli %arg0, %c16_i32 : i32
    %c16_i32_0 = arith.constant 16 : i32
    %1 = arith.muli %arg1, %c16_i32_0 : i32
    %2 = arith.addi %0, %1 : i32
    %c1_i32 = arith.constant 1 : i32
    %3 = arith.subi %2, %c1_i32 : i32
    %c0_i32 = arith.constant 0 : i32
    %4 = arith.maxsi %3, %c0_i32 : i32
    %c0_i32_1 = arith.constant 0 : i32
    %c0_i32_2 = arith.constant 0 : i32
    return %4, %c0_i32_1 : i32, i32
  }
  func.func @transform_1(%arg0: i32, %arg1: i32) -> (i32, i32) {
    %c1_i32 = arith.constant 1 : i32
    %0 = arith.muli %arg0, %c1_i32 : i32
    %1 = arith.addi %0, %arg1 : i32
    %c0_i32 = arith.constant 0 : i32
    %c0_i32_0 = arith.constant 0 : i32
    return %1, %c0_i32 : i32, i32
  }
  func.func @transform_2(%arg0: i32, %arg1: i32) -> (i32, i32) {
    %c16_i32 = arith.constant 16 : i32
    %0 = arith.muli %arg0, %c16_i32 : i32
    %c16_i32_0 = arith.constant 16 : i32
    %1 = arith.muli %arg1, %c16_i32_0 : i32
    %2 = arith.addi %0, %1 : i32
    %c16_i32_1 = arith.constant 16 : i32
    %3 = arith.addi %2, %c16_i32_1 : i32
    %c31_i32 = arith.constant 31 : i32
    %4 = arith.minsi %3, %c31_i32 : i32
    %c0_i32 = arith.constant 0 : i32
    %c0_i32_2 = arith.constant 0 : i32
    return %4, %c0_i32 : i32, i32
  }
  func.func @transform_3(%arg0: i32, %arg1: i32) -> (i32, i32) {
    %c0_i32 = arith.constant 0 : i32
    %c0_i32_0 = arith.constant 0 : i32
    %c0_i32_1 = arith.constant 0 : i32
    return %c0_i32, %c0_i32_0 : i32, i32
  }
  func.func @transform_4(%arg0: i32, %arg1: i32) -> (i32, i32) {
    %c0_i32 = arith.constant 0 : i32
    %c0_i32_0 = arith.constant 0 : i32
    %c0_i32_1 = arith.constant 0 : i32
    return %c0_i32, %c0_i32_0 : i32, i32
  }
  func.func @transform_5(%arg0: i32, %arg1: i32) -> (i32, i32) {
    %c0_i32 = arith.constant 0 : i32
    %c0_i32_0 = arith.constant 0 : i32
    %c0_i32_1 = arith.constant 0 : i32
    return %c0_i32, %c0_i32_0 : i32, i32
  }
  func.func @transform_6(%arg0: i32, %arg1: i32) -> (i32, i32) {
    %c0_i32 = arith.constant 0 : i32
    %c0_i32_0 = arith.constant 0 : i32
    %c0_i32_1 = arith.constant 0 : i32
    return %c0_i32, %c0_i32_0 : i32, i32
  }
  func.func @transform_7(%arg0: i32, %arg1: i32) -> (i32, i32) {
    %c0_i32 = arith.constant 0 : i32
    %c0_i32_0 = arith.constant 0 : i32
    %c0_i32_1 = arith.constant 0 : i32
    return %c0_i32, %c0_i32_0 : i32, i32
  }
  func.func @transform_8(%arg0: i32, %arg1: i32) -> (i32, i32) {
    %c0_i32 = arith.constant 0 : i32
    %c0_i32_0 = arith.constant 0 : i32
    %c0_i32_1 = arith.constant 0 : i32
    return %c0_i32, %c0_i32_0 : i32, i32
  }
  func.func @transform_9(%arg0: i32, %arg1: i32) -> (i32, i32) {
    %c1_i32 = arith.constant 1 : i32
    %0 = arith.muli %arg0, %c1_i32 : i32
    %1 = arith.addi %0, %arg1 : i32
    %c0_i32 = arith.constant 0 : i32
    %c0_i32_0 = arith.constant 0 : i32
    return %1, %c0_i32 : i32, i32
  }
  func.func @transform_10(%arg0: i32, %arg1: i32) -> (i32, i32, i32) {
    %c1_i32 = arith.constant 1 : i32
    %0 = arith.muli %arg0, %c1_i32 : i32
    %1 = arith.addi %0, %arg1 : i32
    %c0_i32 = arith.constant 0 : i32
    %c0_i32_0 = arith.constant 0 : i32
    %c0_i32_1 = arith.constant 0 : i32
    return %1, %c0_i32, %c0_i32_0 : i32, i32, i32
  }
}

</mosaic_0001>

<bundles_post_ra>
// kernel: inconv_forward.5
= control target key start
LH: loop header
LB: loop body
LE: loop exit
PB: predicated region body
PF: predicated region fallthrough
CT: control target
= control target key end

     0   :  { %s448_s12 = smov 0   ;;  %s639_s0 = inlined_call_operand.vmem [shape: f32[512,128], index: 0, kind: input, shape index: {}]   ;;  %s640_s1 = inlined_call_operand.vmem [shape: f32[1,128], index: 1, kind: input, shape index: {}]   ;;  %s641_s2 = inlined_call_operand.vmem [shape: f32[1,128], index: 2, kind: input, shape index: {}]   ;;  %s642_s3 = inlined_call_operand.vmem [shape: f32[512,8], index: 3, kind: output, shape index: {}]  }
   0x1 LB: > { %s399_s13 = sadd.s32 4294967295, %s426_s12   ;;  %p403_p0 = scmp.ge.s32.totalorder %s426_s12, 1  ;;  %s426_s12 = sphi %s448_s12, %s13_s12  }
   0x2   : > { %p138_p1 = scmp.lt.s32.totalorder %s426_s12, 3 }
   0x4   : > { %p139_p2 = pnand %p403_p0, %p138_p1 }
   0x5   : > { %s404_s14 = sshll.u32 (!%p139_p2), %s399_s13, 5 }
   0x6   : > { %142 = sbr.rel (%p139_p2) target bundleno = 53 (0x35), region = 32  ;;  %p163_p3 = scmp.lt.s32.totalorder (!%p139_p2), %s404_s14, 63 }
   0xb   : > { %s644_s14 = smov (!%p163_p3, %s404_s14), 63  ;;  %v459_v0 = vld [vmem:[%s640_s1] ss:$0 sm:$0xff]  ;;  %vm310_vm0 = vcmask 64512  }
   0xc   : > { %s405_s17 = sshll.u32 %s644_s14, 3  ;;  %v469_v1 = vld [vmem:[%s641_s2] ss:$0 sm:$0xff] }
   0xd   : > { %s464_s20 = scalar_lea.vmem %s639_s0, %s405_s17  ;;  %s492_s25 = scalar_lea.vmem %s642_s3, %s405_s17 }
   0xe   : > { %v174_v2 = vld [vmem:[%s464_s20] sm:$0xff]  ;;  %v175_v3 = vld [vmem:[%s464_s20 + $0x8] sm:$0xff]  ;;  %v176_v4 = vld [vmem:[%s464_s20 + $0x10] sm:$0xff] }
   0xf   : > { %v210_v5 = vmul.f32 %v459_v0, %v174_v2  ;;  %v211_v6 = vmul.f32 %v459_v0, %v175_v3  ;;  %v212_v7 = vmul.f32 %v459_v0, %v176_v4  ;;  %v177_v8 = vld [vmem:[%s464_s20 + $0x18] sm:$0xff]  ;;  %v178_v9 = vld [vmem:[%s464_s20 + $0x20] sm:$0xff]  ;;  %v179_v10 = vld [vmem:[%s464_s20 + $0x28] sm:$0xff] }
  0x10   : > { %v213_v11 = vmul.f32 %v459_v0, %v177_v8  ;;  %v214_v12 = vmul.f32 %v459_v0, %v178_v9  ;;  %v215_v13 = vmul.f32 %v459_v0, %v179_v10  ;;  %v180_v14 = vld [vmem:[%s464_s20 + $0x30] sm:$0xff]  ;;  %v181_v15 = vld [vmem:[%s464_s20 + $0x38] sm:$0xff]  ;;  %v182_v24 = vld [vmem:[%s464_s20 + $0x40] sm:$0xff] }
  0x11   : > { %v246_v16 = vadd.f32 %v469_v1, %v210_v5  ;;  %v247_v17 = vadd.f32 %v469_v1, %v211_v6  ;;  %v248_v18 = vadd.f32 %v469_v1, %v212_v7  ;;  %v216_v19 = vmul.f32 %v459_v0, %v180_v14  ;;  %v183_v25 = vld [vmem:[%s464_s20 + $0x48] sm:$0xff]  ;;  %v184_v26 = vld [vmem:[%s464_s20 + $0x50] sm:$0xff]  ;;  %v185_v31 = vld [vmem:[%s464_s20 + $0x58] sm:$0xff] }
  0x12   : > { %v249_v20 = vadd.f32 %v469_v1, %v213_v11  ;;  %v250_v21 = vadd.f32 %v469_v1, %v214_v12  ;;  %v251_v22 = vadd.f32 %v469_v1, %v215_v13  ;;  %v217_v23 = vmul.f32 %v459_v0, %v181_v15  ;;  %v186_v32 = vld [vmem:[%s464_s20 + $0x60] sm:$0xff]  ;;  %v187_v33 = vld [vmem:[%s464_s20 + $0x68] sm:$0xff]  ;;  %v188_v37 = vld [vmem:[%s464_s20 + $0x70] sm:$0xff] }
  0x13   : > { %v278_v27 = vmax.f32 %v246_v16, 0.0  ;;  %v279_v28 = vmax.f32 %v247_v17, 0.0  ;;  %v280_v29 = vmax.f32 %v248_v18, 0.0  ;;  %v252_v30 = vadd.f32 %v469_v1, %v216_v19  ;;  %v189_v42 = vld [vmem:[%s464_s20 + $0x78] sm:$0xff]  ;;  %v190_v54 = vld [vmem:[%s464_s20 + $0x80] sm:$0xff]  ;;  %v191_v55 = vld [vmem:[%s464_s20 + $0x88] sm:$0xff] }
  0x14   : > { %v281_v34 = vmax.f32 %v249_v20, 0.0  ;;  %v282_v35 = vmax.f32 %v250_v21, 0.0  ;;  %v253_v36 = vadd.f32 %v469_v1, %v217_v23  ;;  %v283_v38 = vmax.f32 %v251_v22, 0.0  ;;  %v192_v56 = vld [vmem:[%s464_s20 + $0x90] sm:$0xff]  ;;  %v193_v59 = vld [vmem:[%s464_s20 + $0x98] sm:$0xff]  ;;  %v194_v63 = vld [vmem:[%s464_s20 + $0xa0] sm:$0xff] }
  0x15   : > { %311 = vst.msk [vmem:[%s492_s25] sm:$0xff] %vm310_vm0, %v278_v27  ;;  %v218_v39 = vmul.f32 %v459_v0, %v182_v24  ;;  %v219_v40 = vmul.f32 %v459_v0, %v183_v25  ;;  %v220_v41 = vmul.f32 %v459_v0, %v184_v26  ;;  %v284_v43 = vmax.f32 %v252_v30, 0.0  ;;  %v195_v6 = vld [vmem:[%s464_s20 + $0xa8] sm:$0xff]  ;;  %v196_v10 = vld [vmem:[%s464_s20 + $0xb0] sm:$0xff]  ;;  %v197_v14 = vld [vmem:[%s464_s20 + $0xb8] sm:$0xff] }
  0x16   : > { %312 = vst.msk [vmem:[%s492_s25 + $0x8] sm:$0xff] %vm310_vm0, %v279_v28  ;;  %v221_v44 = vmul.f32 %v459_v0, %v185_v31  ;;  %v222_v45 = vmul.f32 %v459_v0, %v186_v32  ;;  %v223_v46 = vmul.f32 %v459_v0, %v187_v33  ;;  %v224_v50 = vmul.f32 %v459_v0, %v188_v37  ;;  %v198_v18 = vld [vmem:[%s464_s20 + $0xc0] sm:$0xff]  ;;  %v199_v22 = vld [vmem:[%s464_s20 + $0xc8] sm:$0xff]  ;;  %v200_v26 = vld [vmem:[%s464_s20 + $0xd0] sm:$0xff] }
  0x17   : > { %313 = vst.msk [vmem:[%s492_s25 + $0x10] sm:$0xff] %vm310_vm0, %v280_v29  ;;  %v254_v47 = vadd.f32 %v469_v1, %v218_v39  ;;  %v255_v48 = vadd.f32 %v469_v1, %v219_v40  ;;  %v256_v49 = vadd.f32 %v469_v1, %v220_v41  ;;  %v285_v51 = vmax.f32 %v253_v36, 0.0  ;;  %v201_v30 = vld [vmem:[%s464_s20 + $0xd8] sm:$0xff] }
  0x18   : > { %314 = vst.msk [vmem:[%s492_s25 + $0x18] sm:$0xff] %vm310_vm0, %v281_v34  ;;  %v257_v52 = vadd.f32 %v469_v1, %v221_v44  ;;  %v225_v53 = vmul.f32 %v459_v0, %v189_v42  ;;  %v258_v58 = vadd.f32 %v469_v1, %v222_v45  ;;  %v259_v62 = vadd.f32 %v469_v1, %v223_v46  ;;  %v202_v34 = vld [vmem:[%s464_s20 + $0xe0] sm:$0xff]  ;;  %v204_v42 = vld [vmem:[%s464_s20 + $0xf0] sm:$0xff]  ;;  %v205_v46 = vld [vmem:[%s464_s20 + $0xf8] sm:$0xff] }
  0x19   : > { %315 = vst.msk [vmem:[%s492_s25 + $0x20] sm:$0xff] %vm310_vm0, %v282_v35  ;;  %v286_v57 = vmax.f32 %v254_v47, 0.0  ;;  %v287_v60 = vmax.f32 %v255_v48, 0.0  ;;  %v288_v61 = vmax.f32 %v256_v49, 0.0  ;;  %v260_v2 = vadd.f32 %v469_v1, %v224_v50 }
  0x1a   : > { %316 = vst.msk [vmem:[%s492_s25 + $0x28] sm:$0xff] %vm310_vm0, %v283_v38  ;;  %v226_v3 = vmul.f32 %v459_v0, %v190_v54  ;;  %v227_v4 = vmul.f32 %v459_v0, %v191_v55  ;;  %v228_v5 = vmul.f32 %v459_v0, %v192_v56  ;;  %v289_v7 = vmax.f32 %v257_v52, 0.0  ;;  %v203_v38 = vld [vmem:[%s464_s20 + $0xe8] sm:$0xff] }
  0x1b   : > { %317 = vst.msk [vmem:[%s492_s25 + $0x30] sm:$0xff] %vm310_vm0, %v284_v43  ;;  %v261_v8 = vadd.f32 %v469_v1, %v225_v53  ;;  %v229_v9 = vmul.f32 %v459_v0, %v193_v59  ;;  %v290_v11 = vmax.f32 %v258_v58, 0.0  ;;  %v230_v13 = vmul.f32 %v459_v0, %v194_v63 }
  0x1c   : > { %318 = vst.msk [vmem:[%s492_s25 + $0x38] sm:$0xff] %vm310_vm0, %v285_v51  ;;  %v262_v12 = vadd.f32 %v469_v1, %v226_v3  ;;  %v291_v15 = vmax.f32 %v259_v62, 0.0  ;;  %v263_v16 = vadd.f32 %v469_v1, %v227_v4  ;;  %v231_v17 = vmul.f32 %v459_v0, %v195_v6 }
  0x1d   : > { %319 = vst.msk [vmem:[%s492_s25 + $0x40] sm:$0xff] %vm310_vm0, %v286_v57  ;;  %v292_v19 = vmax.f32 %v260_v2, 0.0  ;;  %v264_v20 = vadd.f32 %v469_v1, %v228_v5  ;;  %v232_v21 = vmul.f32 %v459_v0, %v196_v10  ;;  %v293_v23 = vmax.f32 %v261_v8, 0.0 }
  0x1e   : > { %320 = vst.msk [vmem:[%s492_s25 + $0x48] sm:$0xff] %vm310_vm0, %v287_v60  ;;  %v265_v24 = vadd.f32 %v469_v1, %v229_v9  ;;  %v233_v25 = vmul.f32 %v459_v0, %v197_v14  ;;  %v294_v27 = vmax.f32 %v262_v12, 0.0  ;;  %v266_v28 = vadd.f32 %v469_v1, %v230_v13 }
  0x1f   : > { %321 = vst.msk [vmem:[%s492_s25 + $0x50] sm:$0xff] %vm310_vm0, %v288_v61  ;;  %v234_v29 = vmul.f32 %v459_v0, %v198_v18  ;;  %v295_v31 = vmax.f32 %v263_v16, 0.0  ;;  %v267_v32 = vadd.f32 %v469_v1, %v231_v17  ;;  %v235_v33 = vmul.f32 %v459_v0, %v199_v22 }
  0x20   : > { %322 = vst.msk [vmem:[%s492_s25 + $0x58] sm:$0xff] %vm310_vm0, %v289_v7  ;;  %v296_v35 = vmax.f32 %v264_v20, 0.0  ;;  %v268_v36 = vadd.f32 %v469_v1, %v232_v21  ;;  %v236_v37 = vmul.f32 %v459_v0, %v200_v26  ;;  %v297_v39 = vmax.f32 %v265_v24, 0.0 }
  0x21   : > { %323 = vst.msk [vmem:[%s492_s25 + $0x60] sm:$0xff] %vm310_vm0, %v290_v11  ;;  %v269_v40 = vadd.f32 %v469_v1, %v233_v25  ;;  %v237_v41 = vmul.f32 %v459_v0, %v201_v30  ;;  %v298_v43 = vmax.f32 %v266_v28, 0.0  ;;  %v270_v44 = vadd.f32 %v469_v1, %v234_v29 }
  0x22   : > { %324 = vst.msk [vmem:[%s492_s25 + $0x68] sm:$0xff] %vm310_vm0, %v291_v15  ;;  %v238_v45 = vmul.f32 %v459_v0, %v202_v34  ;;  %v299_v47 = vmax.f32 %v267_v32, 0.0  ;;  %v271_v48 = vadd.f32 %v469_v1, %v235_v33  ;;  %v239_v49 = vmul.f32 %v459_v0, %v203_v38 }
  0x23   : > { %325 = vst.msk [vmem:[%s492_s25 + $0x70] sm:$0xff] %vm310_vm0, %v292_v19  ;;  %v300_v50 = vmax.f32 %v268_v36, 0.0  ;;  %v272_v51 = vadd.f32 %v469_v1, %v236_v37  ;;  %v240_v52 = vmul.f32 %v459_v0, %v204_v42  ;;  %v301_v53 = vmax.f32 %v269_v40, 0.0 }
  0x24   : > { %326 = vst.msk [vmem:[%s492_s25 + $0x78] sm:$0xff] %vm310_vm0, %v293_v23  ;;  %v273_v54 = vadd.f32 %v469_v1, %v237_v41  ;;  %v241_v55 = vmul.f32 %v459_v0, %v205_v46  ;;  %v302_v56 = vmax.f32 %v270_v44, 0.0  ;;  %v274_v57 = vadd.f32 %v469_v1, %v238_v45 }
  0x25   : > { %327 = vst.msk [vmem:[%s492_s25 + $0x80] sm:$0xff] %vm310_vm0, %v294_v27  ;;  %v303_v58 = vmax.f32 %v271_v48, 0.0  ;;  %v275_v59 = vadd.f32 %v469_v1, %v239_v49  ;;  %v304_v60 = vmax.f32 %v272_v51, 0.0  ;;  %v276_v0 = vadd.f32 %v469_v1, %v240_v52 }
  0x26   : > { %328 = vst.msk [vmem:[%s492_s25 + $0x88] sm:$0xff] %vm310_vm0, %v295_v31  ;;  %v305_v61 = vmax.f32 %v273_v54, 0.0  ;;  %v277_v62 = vadd.f32 %v469_v1, %v241_v55  ;;  %v306_v63 = vmax.f32 %v274_v57, 0.0 }
  0x27   : > { %329 = vst.msk [vmem:[%s492_s25 + $0x90] sm:$0xff] %vm310_vm0, %v296_v35  ;;  %v307_v2 = vmax.f32 %v275_v59, 0.0  ;;  %v308_v3 = vmax.f32 %v276_v0, 0.0 }
  0x28   : > { %330 = vst.msk [vmem:[%s492_s25 + $0x98] sm:$0xff] %vm310_vm0, %v297_v39  ;;  %v309_v4 = vmax.f32 %v277_v62, 0.0 }
  0x29   : > { %331 = vst.msk [vmem:[%s492_s25 + $0xa0] sm:$0xff] %vm310_vm0, %v298_v43 }
  0x2a   : > { %332 = vst.msk [vmem:[%s492_s25 + $0xa8] sm:$0xff] %vm310_vm0, %v299_v47 }
  0x2b   : > { %333 = vst.msk [vmem:[%s492_s25 + $0xb0] sm:$0xff] %vm310_vm0, %v300_v50 }
  0x2c   : > { %334 = vst.msk [vmem:[%s492_s25 + $0xb8] sm:$0xff] %vm310_vm0, %v301_v53 }
  0x2d   : > { %335 = vst.msk [vmem:[%s492_s25 + $0xc0] sm:$0xff] %vm310_vm0, %v302_v56 }
  0x2e   : > { %336 = vst.msk [vmem:[%s492_s25 + $0xc8] sm:$0xff] %vm310_vm0, %v303_v58 }
  0x2f   : > { %337 = vst.msk [vmem:[%s492_s25 + $0xd0] sm:$0xff] %vm310_vm0, %v304_v60 }
  0x30   : > { %338 = vst.msk [vmem:[%s492_s25 + $0xd8] sm:$0xff] %vm310_vm0, %v305_v61 }
  0x31   : > { %339 = vst.msk [vmem:[%s492_s25 + $0xe0] sm:$0xff] %vm310_vm0, %v306_v63 }
  0x32   : > { %340 = vst.msk [vmem:[%s492_s25 + $0xe8] sm:$0xff] %vm310_vm0, %v307_v2 }
  0x33   : > { %341 = vst.msk [vmem:[%s492_s25 + $0xf0] sm:$0xff] %vm310_vm0, %v308_v3 }
  0x34   : > { %342 = vst.msk [vmem:[%s492_s25 + $0xf8] sm:$0xff] %vm310_vm0, %v309_v4 }
  0x35 PF: > { %s13_s12 = sadd.s32 1, %s426_s12  }
  0x36   : > { %p10_p4 = scmp.ge.s32.totalorder %s13_s12, 4  }
  0x38   :  { %12 = sbr.rel (!%p10_p4) target bundleno = 1 (0x1), region = 62 }

// kernel: inconv_forward.3
= control target key start
LH: loop header
LB: loop body
LE: loop exit
PB: predicated region body
PF: predicated region fallthrough
CT: control target
= control target key end

     0   :  { %s875_s12 = smov 0   ;;  %s877_s13 = smov 0   ;;  %s1165_s0 = inlined_call_operand.vmem [shape: bf16[512,36], index: 0, kind: input, shape index: {}]   ;;  %s1166_s1 = inlined_call_operand.vmem [shape: bf16[36,128], index: 1, kind: input, shape index: {}]   ;;  %s1167_s2 = inlined_call_operand.vmem [shape: f32[1,128], index: 2, kind: input, shape index: {}]   ;;  %s1168_s3 = inlined_call_operand.vmem [shape: f32[2,2,128], index: 3, kind: output, shape index: {}]  }
   0x1   :  { %s879_s14 = smov 0  }
   0x2 LB: > { %s25_s15 = sadd.s32 1, %s849_s13  ;;  %p685_p0 = scmp.ge.s32.totalorder %s853_s14, 1  ;;  %s853_s14 = sphi %s879_s14, %s13_s14   ;;  %s849_s13 = sphi %s877_s13, %s1170_s13   ;;  %s845_s12 = sphi %s875_s12, %s1169_s12  }
   0x3   : > { %p27_p1 = scmp.ge.s32.totalorder %s25_s15, 2  ;;  %p156_p2 = scmp.lt.s32.totalorder %s853_s14, 3 }
   0x5   : > { %s1172_s15 = smov (%p27_p1, %s25_s15), 0  ;;  %p157_p3 = pnand %p685_p0, %p156_p2 }
   0x6   : > { %s686_s18 = sshll.u32 (!%p157_p3), %s845_s12, 5  ;;  %p190_p5 = scmp.lt.s32.totalorder (!%p157_p3), %s845_s12, 1 }
   0x7   : > { %160 = sbr.rel (%p157_p3) target bundleno = 357 (0x165), region = 32  ;;  %p183_p4 = scmp.lt.s32.totalorder (!%p157_p3), %s686_s18, 63 }
   0xc   : > { %v232_v0 = vld [vmem:[%s1166_s1 + $0x10] sm:$0x3]  ;;  %vm381_vm0 = vcmask 1041408   ;;  %s1174_s18 = smov (!%p183_p4, %s686_s18), 63  ;;  %v796_v4 = vld [vmem:[%s1166_s1 + $0x8] sm:$0xff]  ;;  %v795_v5 = vld [vmem:[%s1166_s1] sm:$0xff] }
   0xd   : > { %v326_v1 = vunpack.c.l.b16 %v232_v0  ;;  %s687_s21 = sshll.u32 %s1174_s18, 2  ;;  %vm332_vm1 = vcmask 293888   ;;  %v947_v37 = vld [vmem:[%s1167_s2] ss:$0 sm:$0xff]  ;;  %s1176_s12 = smov (!%p190_p5, %s845_s12), 1  ;;  %vm613_vm2 = vcmask 1040384  }
   0xe   : > { %s908_s26 = scalar_lea.vmem %s1165_s0, %s687_s21  ;;  %s688_s29 = sshll.u32 %s1176_s12, 1 }
   0xf   : > { %v329_v2 = vpack.c.b16 %v326_v1, %v326_v1  ;;  %v779_v6 = vld [vmem:[%s908_s26] sm:$0xff]  ;;  %v780_v10 = vld [vmem:[%s908_s26 + $0x8] sm:$0xff]  ;;  %v781_v14 = vld [vmem:[%s908_s26 + $0x10] sm:$0xff]  ;;  %s193_s5 = scalar_lea.vmem %s1168_s3, %s688_s29 }
  0x10   : > { %v783_v7 = vld [vmem:[%s908_s26 + $0x20] sm:$0xff]  ;;  %v784_v11 = vld [vmem:[%s908_s26 + $0x28] sm:$0xff]  ;;  %v785_v15 = vld [vmem:[%s908_s26 + $0x30] sm:$0xff] }
  0x11   : > { %v383_v3 = vsel %vm381_vm0, %v329_v2, 0  ;;  %v787_v8 = vld [vmem:[%s908_s26 + $0x40] sm:$0xff]  ;;  %v788_v12 = vld [vmem:[%s908_s26 + $0x48] sm:$0xff]  ;;  %v789_v16 = vld [vmem:[%s908_s26 + $0x50] sm:$0xff] }
  0x12   : > { %390 = vmatpush.bf16.msra.mxu0 %v383_v3  ;;  %797 = vmatpush.bf16.msra.mxu1 %v383_v3  ;;  %v791_v9 = vld [vmem:[%s908_s26 + $0x60] sm:$0xff]  ;;  %v792_v13 = vld [vmem:[%s908_s26 + $0x68] sm:$0xff]  ;;  %v793_v17 = vld [vmem:[%s908_s26 + $0x70] sm:$0xff] }
  0x13   : > { %798 = vmatpush.bf16.msra.mxu2 %v383_v3  ;;  %799 = vmatpush.bf16.msra.mxu3 %v383_v3  ;;  %v782_v18 = vld [vmem:[%s908_s26 + $0x18] sm:$0xff] }
  0x14   : > { %v786_v19 = vld [vmem:[%s908_s26 + $0x38] sm:$0xff] }
  0x15   : > { %v790_v20 = vld [vmem:[%s908_s26 + $0x58] sm:$0xff] }
  0x16   : > { %391 = vmatpush.bf16.msra.mxu0 %v796_v4  ;;  %800 = vmatpush.bf16.msra.mxu1 %v796_v4  ;;  %v794_v21 = vld [vmem:[%s908_s26 + $0x78] sm:$0xff] }
  0x17   : > { %801 = vmatpush.bf16.msra.mxu2 %v796_v4  ;;  %802 = vmatpush.bf16.msra.mxu3 %v796_v4 }
  0x1a   : > { %392 = vmatpush.bf16.msra.mxu0 %v795_v5  ;;  %803 = vmatpush.bf16.msra.mxu1 %v795_v5 }
  0x1b   : > { %804 = vmatpush.bf16.msra.mxu2 %v795_v5  ;;  %805 = vmatpush.bf16.msra.mxu3 %v795_v5 }
  0x1d   : > { %761 = vmatmul.msk.bf16.vlgmr.msra.gmra.mxu0 %vm332_vm1, %v779_v6  ;;  %765 = vmatmul.msk.bf16.vlgmr.msra.gmra.mxu1 %vm332_vm1, %v783_v7 }
  0x1e   : > { %769 = vmatmul.msk.bf16.vlgmr.msra.gmra.mxu2 %vm332_vm1, %v787_v8  ;;  %773 = vmatmul.msk.bf16.vlgmr.msra.gmra.mxu3 %vm332_vm1, %v791_v9 }
  0x2d   : > { %762 = vmatmul.msk.bf16.gmra.mxu0 %vm332_vm1, %v780_v10  ;;  %766 = vmatmul.msk.bf16.gmra.mxu1 %vm332_vm1, %v784_v11 }
  0x2e   : > { %770 = vmatmul.msk.bf16.gmra.mxu2 %vm332_vm1, %v788_v12  ;;  %774 = vmatmul.msk.bf16.gmra.mxu3 %vm332_vm1, %v792_v13 }
  0x3d   : > { %763 = vmatmul.msk.bf16.gmra.mxu0 %vm332_vm1, %v781_v14  ;;  %767 = vmatmul.msk.bf16.gmra.mxu1 %vm332_vm1, %v785_v15 }
  0x3e   : > { %771 = vmatmul.msk.bf16.gmra.mxu2 %vm332_vm1, %v789_v16  ;;  %775 = vmatmul.msk.bf16.gmra.mxu3 %vm332_vm1, %v793_v17 }
  0x4d   : > { %764 = vmatmul.msk.bf16.gmra.mxu0 %vm332_vm1, %v782_v18  ;;  %768 = vmatmul.msk.bf16.gmra.mxu1 %vm332_vm1, %v786_v19 }
  0x4e   : > { %772 = vmatmul.msk.bf16.gmra.mxu2 %vm332_vm1, %v790_v20  ;;  %776 = vmatmul.msk.bf16.gmra.mxu3 %vm332_vm1, %v794_v21 }
  0x9a   : > { %v394_v22 = vpop.f32.mrf.mxu0  ;;  %v414_v23 = vpop.f32.mrf.mxu1 }
  0x9b   : > { %v955_v40 = vadd.f32 %v947_v37, %v394_v22  ;;  %v983_v59 = vadd.f32 %v947_v37, %v414_v23 }
  0xa1   : > { %v434_v27 = vpop.f32.mrf.mxu2  ;;  %v942_v33 = vpop.f32.mrf.mxu3 }
  0xa2   : > { %v396_v24 = vpop.f32.mrf.mxu0  ;;  %v416_v25 = vpop.f32.mrf.mxu1  ;;  %v1015_v16 = vadd.f32 %v947_v37, %v434_v27 }
  0xa3   : > { %v952_v39 = vadd.f32 %v947_v37, %v396_v24  ;;  %v987_v62 = vadd.f32 %v947_v37, %v416_v25 }
  0xa5   : > { %v474_v43 = vadd.f32 %v952_v39, %v955_v40 }
  0xa9   : > { %v436_v30 = vpop.f32.mrf.mxu2  ;;  %v949_v38 = vpop.f32.mrf.mxu3 }
  0xaa   : > { %v399_v26 = vpop.f32.mrf.mxu0  ;;  %v419_v28 = vpop.f32.mrf.mxu1  ;;  %v1019_v19 = vadd.f32 %v947_v37, %v436_v30 }
  0xab   : > { %v958_v41 = vadd.f32 %v947_v37, %v399_v26  ;;  %v991_v1 = vadd.f32 %v947_v37, %v419_v28 }
  0xad   : > { %v475_v46 = vadd.f32 %v474_v43, %v958_v41 }
  0xb1   : > { %v439_v34 = vpop.f32.mrf.mxu2  ;;  %v459_v51 = vpop.f32.mrf.mxu3 }
  0xb2   : > { %v401_v29 = vpop.f32.mrf.mxu0  ;;  %v421_v31 = vpop.f32.mrf.mxu1  ;;  %v1023_v21 = vadd.f32 %v947_v37, %v439_v34 }
  0xb3   : > { %v963_v44 = vadd.f32 %v947_v37, %v401_v29  ;;  %v995_v3 = vadd.f32 %v947_v37, %v421_v31 }
  0xb5   : > { %v476_v49 = vadd.f32 %v475_v46, %v963_v44 }
  0xb9   : > { %v441_v42 = vpop.f32.mrf.mxu2  ;;  %v461_v0 = vpop.f32.mrf.mxu3 }
  0xba   : > { %v404_v32 = vpop.f32.mrf.mxu0  ;;  %v424_v36 = vpop.f32.mrf.mxu1  ;;  %v1027_v23 = vadd.f32 %v947_v37, %v441_v42 }
  0xbb   : > { %v967_v47 = vadd.f32 %v947_v37, %v404_v32  ;;  %v999_v6 = vadd.f32 %v947_v37, %v424_v36  ;;  %v1048_v36 = vadd.f32 %v947_v37, %v942_v33 }
  0xbd   : > { %v477_v52 = vadd.f32 %v476_v49, %v967_v47 }
  0xc1   : > { %v444_v56 = vpop.f32.mrf.mxu2  ;;  %v464_v13 = vpop.f32.mrf.mxu3 }
  0xc2   : > { %v406_v35 = vpop.f32.mrf.mxu0  ;;  %v426_v48 = vpop.f32.mrf.mxu1  ;;  %v1031_v26 = vadd.f32 %v947_v37, %v444_v56 }
  0xc3   : > { %v971_v50 = vadd.f32 %v947_v37, %v406_v35  ;;  %v1003_v8 = vadd.f32 %v947_v37, %v426_v48  ;;  %v1057_v48 = vadd.f32 %v947_v37, %v459_v51 }
  0xc5   : > { %v478_v54 = vadd.f32 %v477_v52, %v971_v50  ;;  %v1061_v52 = vadd.f32 %v947_v37, %v461_v0 }
  0xc9   : > { %v446_v5 = vpop.f32.mrf.mxu2  ;;  %v466_v25 = vpop.f32.mrf.mxu3 }
  0xca   : > { %v409_v45 = vpop.f32.mrf.mxu0  ;;  %v429_v61 = vpop.f32.mrf.mxu1  ;;  %v1035_v28 = vadd.f32 %v947_v37, %v446_v5 }
  0xcb   : > { %v975_v53 = vadd.f32 %v947_v37, %v409_v45  ;;  %v1007_v11 = vadd.f32 %v947_v37, %v429_v61  ;;  %v1053_v45 = vadd.f32 %v947_v37, %v949_v38  ;;  %v1069_v38 = vadd.f32 %v947_v37, %v466_v25 }
  0xcd   : > { %v479_v57 = vadd.f32 %v478_v54, %v975_v53  ;;  %v1065_v54 = vadd.f32 %v947_v37, %v464_v13 }
  0xd1   : > { %v449_v18 = vpop.f32.mrf.mxu2  ;;  %v469_v43 = vpop.f32.mrf.mxu3 }
  0xd2   : > { %v411_v55 = vpop.f32.mrf.mxu0  ;;  %v431_v10 = vpop.f32.mrf.mxu1  ;;  %v1040_v32 = vadd.f32 %v947_v37, %v449_v18 }
  0xd3   : > { %v980_v58 = vadd.f32 %v947_v37, %v411_v55  ;;  %v1012_v15 = vadd.f32 %v947_v37, %v431_v10 }
  0xd5   : > { %v480_v60 = vadd.f32 %v479_v57, %v980_v58 }
  0xd7   : > { %v481_v63 = vadd.f32 %v480_v60, %v983_v59  ;;  %v1074_v60 = vadd.f32 %v947_v37, %v469_v43 }
  0xd9   : > { %v482_v2 = vadd.f32 %v481_v63, %v987_v62  ;;  %v451_v30 = vpop.f32.mrf.mxu2  ;;  %v471_v57 = vpop.f32.mrf.mxu3 }
  0xda   : > { %v1044_v35 = vadd.f32 %v947_v37, %v451_v30  ;;  %v1078_v63 = vadd.f32 %v947_v37, %v471_v57 }
  0xdb   : > { %v483_v4 = vadd.f32 %v482_v2, %v991_v1 }
  0xdd   : > { %v484_v7 = vadd.f32 %v483_v4, %v995_v3 }
  0xdf   : > { %v485_v9 = vadd.f32 %v484_v7, %v999_v6 }
  0xe1   : > { %v486_v12 = vadd.f32 %v485_v9, %v1003_v8 }
  0xe3   : > { %v487_v14 = vadd.f32 %v486_v12, %v1007_v11 }
  0xe5   : > { %v488_v17 = vadd.f32 %v487_v14, %v1012_v15 }
  0xe7   : > { %v489_v20 = vadd.f32 %v488_v17, %v1015_v16 }
  0xe9   : > { %v490_v22 = vadd.f32 %v489_v20, %v1019_v19 }
  0xeb   : > { %v491_v24 = vadd.f32 %v490_v22, %v1023_v21 }
  0xed   : > { %v492_v27 = vadd.f32 %v491_v24, %v1027_v23 }
  0xef   : > { %v493_v29 = vadd.f32 %v492_v27, %v1031_v26 }
  0xf1   : > { %v494_v31 = vadd.f32 %v493_v29, %v1035_v28 }
  0xf3   : > { %v495_v34 = vadd.f32 %v494_v31, %v1040_v32 }
  0xf5   : > { %v496_v42 = vadd.f32 %v495_v34, %v1044_v35 }
  0xf7   : > { %v497_v46 = vadd.f32 %v496_v42, %v1048_v36 }
  0xf9   : > { %v498_v49 = vadd.f32 %v497_v46, %v1053_v45 }
  0xfb   : > { %v499_v33 = vadd.f32 %v498_v49, %v1057_v48 }
  0xfd   : > { %v500_v55 = vadd.f32 %v499_v33, %v1061_v52 }
  0xff   : > { %v501_v56 = vadd.f32 %v500_v55, %v1065_v54 }
 0x101   : > { %v502_v51 = vadd.f32 %v501_v56, %v1069_v38 }
 0x103   : > { %v503_v61 = vadd.f32 %v502_v51, %v1074_v60 }
 0x105   : > { %v504_v0 = vadd.f32 %v503_v61, %v1078_v63 }
 0x107   : > { %v505_v2 = vrot.slane %v504_v0, 4 }
 0x109   : > { %v506_v4 = vadd.f32 %v505_v2, %v504_v0 }
 0x10b   : > { %v507_v5 = vrot.slane %v506_v4, 2 }
 0x10d   : > { %v508_v7 = vadd.f32 %v507_v5, %v506_v4 }
 0x10f   : > { %v509_v9 = vrot.slane %v508_v7, 1 }
 0x111   : > { %v1081_v10 = vadd.f32 %v509_v9, %v508_v7 }
 0x113   : > { %v1084_v12 = vmul.f32 0.00390625, %v1081_v10 }
 0x115   : > { %v512_v13 = vsub.f32 %v955_v40, %v1084_v12  ;;  %v513_v14 = vsub.f32 %v952_v39, %v1084_v12  ;;  %v514_v37 = vsub.f32 %v958_v41, %v1084_v12  ;;  %v515_v20 = vsub.f32 %v963_v44, %v1084_v12 }
 0x116   : > { %v516_v22 = vsub.f32 %v967_v47, %v1084_v12  ;;  %v517_v27 = vsub.f32 %v971_v50, %v1084_v12  ;;  %v518_v39 = vsub.f32 %v975_v53, %v1084_v12  ;;  %v519_v31 = vsub.f32 %v980_v58, %v1084_v12 }
 0x117   : > { %v544_v17 = vmul.f32 %v512_v13, %v512_v13  ;;  %v545_v18 = vmul.f32 %v513_v14, %v513_v14  ;;  %v546_v24 = vmul.f32 %v514_v37, %v514_v37  ;;  %v547_v40 = vmul.f32 %v515_v20, %v515_v20 }
 0x118   : > { %v548_v30 = vmul.f32 %v516_v22, %v516_v22  ;;  %v549_v34 = vmul.f32 %v517_v27, %v517_v27  ;;  %v520_v47 = vsub.f32 %v983_v59, %v1084_v12  ;;  %v550_v42 = vmul.f32 %v518_v39, %v518_v39 }
 0x119   : > { %v576_v25 = vadd.f32 %v545_v18, %v544_v17  ;;  %v521_v50 = vsub.f32 %v987_v62, %v1084_v12  ;;  %v551_v46 = vmul.f32 %v519_v31, %v519_v31  ;;  %v522_v53 = vsub.f32 %v991_v1, %v1084_v12 }
 0x11a   : > { %v552_v33 = vmul.f32 %v520_v47, %v520_v47  ;;  %v523_v58 = vsub.f32 %v995_v3, %v1084_v12  ;;  %v524_v59 = vsub.f32 %v999_v6, %v1084_v12  ;;  %v525_v62 = vsub.f32 %v1003_v8, %v1084_v12 }
 0x11b   : > { %v577_v29 = vadd.f32 %v576_v25, %v546_v24  ;;  %v553_v56 = vmul.f32 %v521_v50, %v521_v50  ;;  %v554_v51 = vmul.f32 %v522_v53, %v522_v53  ;;  %v526_v1 = vsub.f32 %v1007_v11, %v1084_v12 }
 0x11c   : > { %v555_v0 = vmul.f32 %v523_v58, %v523_v58  ;;  %v556_v4 = vmul.f32 %v524_v59, %v524_v59  ;;  %v527_v3 = vsub.f32 %v1012_v15, %v1084_v12  ;;  %v557_v7 = vmul.f32 %v525_v62, %v525_v62 }
 0x11d   : > { %v578_v41 = vadd.f32 %v577_v29, %v547_v40  ;;  %v528_v6 = vsub.f32 %v1015_v16, %v1084_v12  ;;  %v558_v13 = vmul.f32 %v526_v1, %v526_v1  ;;  %v529_v8 = vsub.f32 %v1019_v19, %v1084_v12 }
 0x11e   : > { %v559_v37 = vmul.f32 %v527_v3, %v527_v3  ;;  %v530_v11 = vsub.f32 %v1023_v21, %v1084_v12  ;;  %v531_v15 = vsub.f32 %v1027_v23, %v1084_v12  ;;  %v532_v16 = vsub.f32 %v1031_v26, %v1084_v12 }
 0x11f   : > { %v579_v44 = vadd.f32 %v578_v41, %v548_v30  ;;  %v560_v18 = vmul.f32 %v528_v6, %v528_v6  ;;  %v561_v22 = vmul.f32 %v529_v8, %v529_v8  ;;  %v533_v19 = vsub.f32 %v1035_v28, %v1084_v12 }
 0x120   : > { %v562_v25 = vmul.f32 %v530_v11, %v530_v11  ;;  %v563_v40 = vmul.f32 %v531_v15, %v531_v15  ;;  %v534_v21 = vsub.f32 %v1040_v32, %v1084_v12  ;;  %v564_v39 = vmul.f32 %v532_v16, %v532_v16 }
 0x121   : > { %v580_v43 = vadd.f32 %v579_v44, %v549_v34  ;;  %v535_v23 = vsub.f32 %v1044_v35, %v1084_v12  ;;  %v565_v41 = vmul.f32 %v533_v19, %v533_v19  ;;  %v536_v26 = vsub.f32 %v1048_v36, %v1084_v12 }
 0x122   : > { %v566_v34 = vmul.f32 %v534_v21, %v534_v21  ;;  %v537_v28 = vsub.f32 %v1053_v45, %v1084_v12  ;;  %v538_v32 = vsub.f32 %v1057_v48, %v1084_v12  ;;  %v539_v35 = vsub.f32 %v1061_v52, %v1084_v12 }
 0x123   : > { %v581_v49 = vadd.f32 %v580_v43, %v550_v42  ;;  %v567_v47 = vmul.f32 %v535_v23, %v535_v23  ;;  %v568_v43 = vmul.f32 %v536_v26, %v536_v26  ;;  %v540_v36 = vsub.f32 %v1065_v54, %v1084_v12 }
 0x124   : > { %v570_v53 = vmul.f32 %v538_v32, %v538_v32  ;;  %v541_v45 = vsub.f32 %v1069_v38, %v1084_v12  ;;  %v542_v48 = vsub.f32 %v1074_v60, %v1084_v12  ;;  %v543_v52 = vsub.f32 %v1078_v63, %v1084_v12 }
 0x125   : > { %v582_v55 = vadd.f32 %v581_v49, %v551_v46  ;;  %v569_v46 = vmul.f32 %v537_v28, %v537_v28 }
 0x126   : > { %v573_v59 = vmul.f32 %v541_v45, %v541_v45  ;;  %v574_v54 = vmul.f32 %v542_v48, %v542_v48  ;;  %v575_v62 = vmul.f32 %v543_v52, %v543_v52 }
 0x127   : > { %v583_v57 = vadd.f32 %v582_v55, %v552_v33  ;;  %v571_v55 = vmul.f32 %v539_v35, %v539_v35 }
 0x129   : > { %v584_v61 = vadd.f32 %v583_v57, %v553_v56  ;;  %v572_v56 = vmul.f32 %v540_v36, %v540_v36 }
 0x12b   : > { %v585_v2 = vadd.f32 %v584_v61, %v554_v51 }
 0x12d   : > { %v586_v5 = vadd.f32 %v585_v2, %v555_v0 }
 0x12f   : > { %v587_v9 = vadd.f32 %v586_v5, %v556_v4 }
 0x131   : > { %v588_v14 = vadd.f32 %v587_v9, %v557_v7 }
 0x133   : > { %v589_v17 = vadd.f32 %v588_v14, %v558_v13 }
 0x135   : > { %v590_v20 = vadd.f32 %v589_v17, %v559_v37 }
 0x137   : > { %v591_v24 = vadd.f32 %v590_v20, %v560_v18 }
 0x139   : > { %v592_v27 = vadd.f32 %v591_v24, %v561_v22 }
 0x13b   : > { %v593_v29 = vadd.f32 %v592_v27, %v562_v25 }
 0x13d   : > { %v594_v30 = vadd.f32 %v593_v29, %v563_v40 }
 0x13f   : > { %v595_v31 = vadd.f32 %v594_v30, %v564_v39 }
 0x141   : > { %v596_v44 = vadd.f32 %v595_v31, %v565_v41 }
 0x143   : > { %v597_v42 = vadd.f32 %v596_v44, %v566_v34 }
 0x145   : > { %v598_v50 = vadd.f32 %v597_v42, %v567_v47 }
 0x147   : > { %v599_v49 = vadd.f32 %v598_v50, %v568_v43 }
 0x149   : > { %v600_v33 = vadd.f32 %v599_v49, %v569_v46 }
 0x14b   : > { %v601_v58 = vadd.f32 %v600_v33, %v570_v53 }
 0x14d   : > { %v602_v57 = vadd.f32 %v601_v58, %v571_v55 }
 0x14f   : > { %v603_v51 = vadd.f32 %v602_v57, %v572_v56 }
 0x151   : > { %v604_v61 = vadd.f32 %v603_v51, %v573_v59 }
 0x153   : > { %v605_v0 = vadd.f32 %v604_v61, %v574_v54 }
 0x155   : > { %v606_v2 = vadd.f32 %v605_v0, %v575_v62 }
 0x157   : > { %v607_v38 = vrot.slane %v606_v2, 4 }
 0x159   : > { %v608_v1 = vadd.f32 %v607_v38, %v606_v2 }
 0x15b   : > { %v609_v4 = vrot.slane %v608_v1, 2 }
 0x15d   : > { %v610_v5 = vadd.f32 %v609_v4, %v608_v1 }
 0x15f   : > { %v611_v60 = vrot.slane %v610_v5, 1 }
 0x161   : > { %v612_v63 = vadd.f32 %v611_v60, %v610_v5 }
 0x163   : > { %v614_v12 = vsel %vm613_vm2, %v1081_v10, %v612_v63 }
 0x164   : > { %615 = vst [vmem:[%s193_s5] sm:$0x3] %v614_v12 }
 0x165 PF: > { %s13_s14 = sadd.s32 1, %s853_s14   ;;  %s1169_s12 = smov %s849_s13 }
 0x166   : > { %p10_p6 = scmp.ge.s32.totalorder %s13_s14, 4   ;;  %s1170_s13 = smov %s1172_s15 }
 0x168   :  { %12 = sbr.rel (!%p10_p6) target bundleno = 2 (0x2), region = 62 }

// kernel: inconv_forward.4
= control target key start
LH: loop header
LB: loop body
LE: loop exit
PB: predicated region body
PF: predicated region fallthrough
CT: control target
= control target key end

     0   :  { %s6559_s13 = smov 0   ;;  %s6561_s14 = smov 0   ;;  %s9830_s0 = inlined_call_operand.vmem [shape: bf16[512,36], index: 0, kind: input, shape index: {}, may-alias: {0,1,2}]   ;;  %s9831_s1 = inlined_call_operand.vmem [shape: bf16[512,36], index: 1, kind: input, shape index: {}, may-alias: {0,1,2}]   ;;  %s9832_s2 = inlined_call_operand.vmem [shape: bf16[512,36], index: 2, kind: input, shape index: {}, may-alias: {0,1,2}]   ;;  %s9833_s3 = inlined_call_operand.vmem [shape: bf16[36,128], index: 3, kind: input, shape index: {}]   ;;  %s9834_s4 = inlined_call_operand.vmem [shape: f32[1,128], index: 4, kind: input, shape index: {}]   ;;  %s9835_s5 = inlined_call_operand.vmem [shape: f32[1,128], index: 5, kind: input, shape index: {}]   ;;  %s9836_s6 = inlined_call_operand.vmem [shape: f32[1,128], index: 6, kind: input, shape index: {}]   ;;  %s9837_s7 = inlined_call_operand.vmem [shape: bf16[1152,128], index: 7, kind: input, shape index: {}]   ;;  %s9838_s8 = inlined_call_operand.vmem [shape: f32[1,128], index: 8, kind: input, shape index: {}]   ;;  %s9839_s9 = inlined_call_operand.vmem [shape: f32[512,128], index: 9, kind: output, shape index: {0}]   ;;  %s9840_s10 = inlined_call_operand.vmem [shape: f32[2,2,128], index: 10, kind: output, shape index: {1}]  }
   0x1   :  { %s6563_s15 = smov 0  }
   0x2 LB: > { %s33_s16 = sadd.s32 1, %s6495_s14  ;;  %p5930_p0 = scmp.ge.s32.totalorder %s6499_s15, 1  ;;  %s6499_s15 = sphi %s6563_s15, %s21_s15   ;;  %s6495_s14 = sphi %s6561_s14, %s10575_s14   ;;  %s6491_s13 = sphi %s6559_s13, %s10574_s13  }
   0x3   : > { %p35_p1 = scmp.ge.s32.totalorder %s33_s16, 2  ;;  %p406_p2 = scmp.lt.s32.totalorder %s6499_s15, 3 }
   0x5   : > { %s10577_s16 = smov (%p35_p1, %s33_s16), 0  ;;  %p407_p3 = pnand %p5930_p0, %p406_p2 }
   0x7   : > { %410 = sbr.rel (%p407_p3) target bundleno = 1196 (0x4ac), region = 56 }
   0xc   : > { %v664_v0 = vld [vmem:[%s9833_s3 + $0x10] sm:$0x3]  ;;  %s5931_s19 = sshll.u32 %s6491_s13, 4  ;;  %vm739_vm0 = vcmask 1041408   ;;  %v6350_v4 = vld [vmem:[%s9833_s3 + $0x8] sm:$0xff]  ;;  %v6349_v5 = vld [vmem:[%s9833_s3] sm:$0xff]  ;;  %v994_v14 = vlaneseq }
   0xd   : > { %v678_v1 = vunpack.c.l.b16 %v664_v0  ;;  %s5932_s20 = sadd.s32 4294967295, %s5931_s19  ;;  %s5935_s30 = sshll.u32 %s6491_s13, 5  ;;  %vm684_vm1 = vcmask 293888   ;;  %v6358_v13 = vld [vmem:[%s9837_s7 + $0x38] sm:$0xff]  ;;  %v6357_v15 = vld [vmem:[%s9837_s7 + $0x30] sm:$0xff]  ;;  %v6356_v17 = vld [vmem:[%s9837_s7 + $0x28] sm:$0xff] }
   0xe   : > { %p477_p4 = scmp.gt.s32.totalorder %s5932_s20, 0  ;;  %p493_p6 = scmp.lt.s32.totalorder %s5935_s30, 63  ;;  %4819 = vmatpush.bf16.msra.mxu1 %v6358_v13  ;;  %6423 = vmatpush.bf16.msra.mxu3 %v6358_v13  ;;  %v6622_v16 = vshrl.u32 %v994_v14, 7  ;;  %v6355_v20 = vld [vmem:[%s9837_s7 + $0x20] sm:$0xff]  ;;  %v6354_v23 = vld [vmem:[%s9837_s7 + $0x18] sm:$0xff]  ;;  %vm6501_vm3 = vmmov 0  }
   0xf   : > { %v681_v2 = vpack.c.b16 %v678_v1, %v678_v1  ;;  %vm6636_vm4 = vmpackc.low %vm6501_vm3, %vm6501_vm3  ;;  %v6353_v25 = vld [vmem:[%s9837_s7 + $0x10] sm:$0xff]  ;;  %v9841_v26 = vmov 0   ;;  %v6352_v29 = vld [vmem:[%s9837_s7 + $0x8] sm:$0xff]  ;;  %vm9859_vm10 = vsmask.f32 7424  ;;  %vm6503_vm11 = vmmov 1  }
  0x10   : > { %s10579_s20 = smov (!%p477_p4, %s5932_s20), 0  ;;  %s10583_s30 = smov (!%p493_p6, %s5935_s30), 63  ;;  %v997_v18 = vadd.s32 16, %v6622_v16  ;;  %v1471_v19 = vand.u32 15, %v6622_v16  ;;  %v2012_v28 = vsel %vm6636_vm4, 65537, %v9841_v26  ;;  %v999_v33 = vadd.s32 32, %v6622_v16  ;;  %vm6689_vm12 = vmpackc.low %vm6503_vm11, %vm6503_vm11 }
  0x11   : > { %v741_v3 = vsel %vm739_vm0, %v681_v2, 0  ;;  %s5933_s23 = sshll.u32 %s10579_s20, 1  ;;  %s5936_s11 = sshll.u32 %s10583_s30, 2  ;;  %v6651_v31 = vunpack.c.l.b16 %v2012_v28  ;;  %v6351_v34 = vld [vmem:[%s9837_s7] sm:$0xff]  ;;  %v1001_v57 = vadd.s32 48, %v6622_v16  ;;  %v6687_v63 = vunpack.c.l.b16 %v9841_v26 }
  0x12   : > { %748 = vmatpush.bf16.msra.mxu0 %v741_v3  ;;  %p480_p5 = scmp.lt.s32.totalorder %s5933_s23, 63  ;;  %s6602_s18 = scalar_lea.vmem %s9831_s1, %s5936_s11  ;;  %4820 = vmatpush.bf16.msra.mxu1 %v6357_v15  ;;  %v1485_v21 = vand.u32 15, %v997_v18  ;;  %vm1851_vm2 = vcmp.eq.s32.totalorder %v1471_v19, 0  ;;  %v6662_v37 = vld [vmem:[%s9834_s4] ss:$0 sm:$0xff]  ;;  %v1499_v38 = vand.u32 15, %v999_v33 }
  0x13   : > { %v6332_v7 = vld [vmem:[%s6602_s18] sm:$0xff]  ;;  %v6333_v8 = vld [vmem:[%s6602_s18 + $0x8] sm:$0xff]  ;;  %v6334_v9 = vld [vmem:[%s6602_s18 + $0x10] sm:$0xff]  ;;  %6424 = vmatpush.bf16.msra.mxu3 %v6357_v15  ;;  %v1513_v0 = vand.u32 15, %v1001_v57  ;;  %v9978_v1 = vmov 0  ;;  %v1003_v33 = vadd.s32 64, %v6622_v16 }
  0x14   : > { %s10581_s23 = smov (!%p480_p5, %s5933_s23), 63  ;;  %v6335_v10 = vld [vmem:[%s6602_s18 + $0x18] sm:$0xff]  ;;  %v6336_v11 = vld [vmem:[%s6602_s18 + $0x20] sm:$0xff]  ;;  %v6337_v12 = vld [vmem:[%s6602_s18 + $0x28] sm:$0xff]  ;;  %vm1853_vm6 = vcmp.eq.s32.totalorder %v1485_v21, 0  ;;  %vm1855_vm8 = vcmp.eq.s32.totalorder %v1499_v38, 0 }
  0x15   : > { %s5934_s26 = sshll.u32 %s10581_s23, 2  ;;  %v6338_v22 = vld [vmem:[%s6602_s18 + $0x30] sm:$0xff]  ;;  %vm1979_vm5 = vmpackc.low %vm1851_vm2, %vm1851_vm2  ;;  %v6667_v39 = vld [vmem:[%s9835_s5] ss:$0 sm:$0xff]  ;;  %v9979_v1 = vsel %vm6689_vm12, 4294967295, %v9978_v1  ;;  %vm6703_vm13 = vcmp.eq.s32.totalorder %v1513_v0, 0 }
  0x16   : > { %749 = vmatpush.bf16.msra.mxu0 %v6350_v4  ;;  %s483_s29 = scalar_lea.vmem %s9830_s0, %s5934_s26  ;;  %4821 = vmatpush.bf16.msra.mxu1 %v6356_v17  ;;  %v2011_v27 = vsel %vm1979_vm5, 65537, %v9841_v26  ;;  %vm1981_vm7 = vmpackc.low %vm1853_vm6, %vm1853_vm6  ;;  %v6339_v40 = vld [vmem:[%s6602_s18 + $0x38] sm:$0xff]  ;;  %v6675_v45 = vld [vmem:[%s9836_s6] ss:$0 sm:$0xff]  ;;  %9980 = vst [vmem:[#allocation2_spill] sm:$0xff] %v9979_v1  ;;  %v6694_v4 = vunpack.c.h.b16 %v9841_v26  ;;  %s7115_s28 = sadd.s32 16, %s5931_s19 }
  0x17   : > { %v6331_v6 = vld [vmem:[%s483_s29] sm:$0xff]  ;;  %6425 = vmatpush.bf16.msra.mxu3 %v6356_v17  ;;  %v2043_v30 = vunpack.c.l.b16 %v2011_v27  ;;  %v2013_v32 = vsel %vm1981_vm7, 65537, %v9841_v26  ;;  %vm1983_vm9 = vmpackc.low %vm1855_vm8, %vm1855_vm8  ;;  %vm9862_vm7 = vsmask.f32 256  ;;  %p503_p7 = scmp.lt.s32.totalorder %s7115_s28, 31  ;;  %p526_p9 = scmp.lt.s32.totalorder %s6491_s13, 1 }
  0x18   : > { %v2045_v35 = vunpack.c.l.b16 %v2013_v32  ;;  %v2015_v53 = vsel %vm1983_vm9, 65537, %v9841_v26  ;;  %vm1985_vm0 = vmpackc.low %vm6703_vm13, %vm6703_vm13 }
  0x19   : > { %v2075_v36 = vpack.c.b16 %v6651_v31, %v2043_v30  ;;  %v2047_v58 = vunpack.c.l.b16 %v2015_v53  ;;  %v2017_v32 = vsel %vm1985_vm0, 65537, %v9841_v26  ;;  %s10585_s28 = smov (!%p503_p7, %s7115_s28), 31  ;;  %s10589_s13 = smov (!%p526_p9, %s6491_s13), 1 }
  0x1a   : > { %750 = vmatpush.bf16.msra.mxu0 %v6349_v5  ;;  %4822 = vmatpush.bf16.msra.mxu1 %v6355_v20  ;;  %v2076_v41 = vpack.c.b16 %v6651_v31, %v2045_v35  ;;  %s5938_s25 = sshll.u32 %s10585_s28, 1 }
  0x1b   : > { %6426 = vmatpush.bf16.msra.mxu3 %v6355_v20  ;;  %v2095_v42 = vshll.u32 %v2075_v36, 16  ;;  %v2093_v47 = vshrl.u32 %v2075_v36, 16  ;;  %v6697_v5 = vpack.c.b16 %v6651_v31, %v2047_v58  ;;  %v6341_v58 = vld [vmem:[%s6602_s18 + $0x48] sm:$0xff]  ;;  %p7190_p8 = scmp.lt.s32.totalorder %s5938_s25, 63 }
  0x1c   : > { %v2100_v49 = vshll.u32 %v2076_v41, 16  ;;  %v2104_v15 = vshrl.u32 %v2076_v41, 16  ;;  %v3306_v41 = vrot.slane %v9841_v26, 7 }
  0x1d   : > { %6023 = vmatmul.msk.bf16.vlgmr.msra.gmra.mxu0 %vm684_vm1, %v6331_v6  ;;  %v2097_v48 = vrot.slane %v2095_v42, 1  ;;  %v2108_v17 = vshll.u32 %v6697_v5, 16  ;;  %s10587_s25 = smov (!%p7190_p8, %s5938_s25), 63 }
  0x1e   : > { %4823 = vmatpush.bf16.msra.mxu1 %v6354_v23  ;;  %v2102_v52 = vrot.slane %v2100_v49, 1  ;;  %v1527_v49 = vand.u32 15, %v1003_v33  ;;  %s5939_s28 = sshll.u32 %s10587_s25, 2 }
  0x1f   : > { %6427 = vmatpush.bf16.msra.mxu3 %v6354_v23  ;;  %v2098_v51 = vor.u32 %v2097_v48, %v2093_v47  ;;  %v2110_v30 = vrot.slane %v2108_v17, 1  ;;  %s509_s23 = scalar_lea.vmem %s9832_s2, %s5939_s28  ;;  %s5941_s28 = sshll.u32 %s10583_s30, 3 }
  0x20   : > { %vm6759_vm8 = vcmp.eq.s32.totalorder %v1527_v49, 0  ;;  %s9443_s21 = scalar_lea.vmem %s9839_s9, %s5941_s28  ;;  %s5942_s30 = sshll.u32 %s10589_s13, 1 }
  0x21   : > { %v2103_v60 = vsel %vm9859_vm10, %v2098_v51, %v2102_v52  ;;  %vm1987_vm13 = vmpackc.low %vm6759_vm8, %vm6759_vm8  ;;  %s529_s24 = scalar_lea.vmem %s9840_s10, %s5942_s30 }
  0x22   : > { %4824 = vmatpush.bf16.msra.mxu1 %v6353_v25  ;;  %v2219_v2 = vunpack.c.l.b16 %v2103_v60  ;;  %v2220_v3 = vunpack.c.h.b16 %v2103_v60 }
  0x23   : > { %6428 = vmatpush.bf16.msra.mxu3 %v6353_v25 }
  0x24   : > { %vm2223_vm14 = vcmp.ne.s32.totalorder %v2219_v2, %v6687_v63  ;;  %vm2224_vm15 = vcmp.ne.s32.totalorder %v2220_v3, %v6694_v4  ;;  %v2112_v2 = vshrl.u32 %v6697_v5, 16  ;;  %v2019_v5 = vsel %vm1987_vm13, 65537, %v9841_v26 }
  0x25   : > { %vm6728_vm5 = vmpackc.low %vm2224_vm15, %vm2223_vm14 }
  0x26   : > { %4825 = vmatpush.bf16.msra.mxu1 %v6352_v29 }
  0x27   : > { %6429 = vmatpush.bf16.msra.mxu3 %v6352_v29  ;;  %v2106_v29 = vor.u32 %v2104_v15, %v2102_v52  ;;  %v1005_v15 = vadd.s32 80, %v6622_v16 }
  0x29   : > { %v2111_v42 = vsel %vm9859_vm10, %v2106_v29, %v2110_v30 }
  0x2a   : > { %4826 = vmatpush.bf16.msra.mxu1 %v6351_v34  ;;  %v2226_v53 = vunpack.c.l.b16 %v2111_v42 }
  0x2b   : > { %6430 = vmatpush.bf16.msra.mxu3 %v6351_v34 }
  0x2c   : > { %vm2230_vm9 = vcmp.ne.s32.totalorder %v2226_v53, %v6687_v63 }
  0x2d   : > { %6024 = vmatmul.msk.bf16.gmra.mxu0 %vm684_vm1, %v6332_v7  ;;  %v6340_v7 = vld [vmem:[%s6602_s18 + $0x40] sm:$0xff] }
  0x3d   : > { %6025 = vmatmul.msk.bf16.gmra.mxu0 %vm684_vm1, %v6333_v8 }
  0x4d   : > { %6026 = vmatmul.msk.bf16.gmra.mxu0 %vm684_vm1, %v6334_v9  ;;  %v2787_v9 = vunpack.c.l.b16 %v2097_v48 }
  0x4f   : > { %vm6718_vm2 = vcmp.ne.s32.totalorder %v2787_v9, %v6687_v63 }
  0x5d   : > { %6027 = vmatmul.msk.bf16.gmra.mxu0 %vm684_vm1, %v6335_v10  ;;  %v2788_v10 = vunpack.c.h.b16 %v2097_v48 }
  0x5f   : > { %vm6723_vm3 = vcmp.ne.s32.totalorder %v2788_v10, %v6694_v4 }
  0x60   : > { %vm2793_vm6 = vmpackc.low %vm6723_vm3, %vm6718_vm2 }
  0x6d   : > { %6028 = vmatmul.msk.bf16.gmra.mxu0 %vm684_vm1, %v6336_v11 }
  0x7d   : > { %6029 = vmatmul.msk.bf16.gmra.mxu0 %vm684_vm1, %v6337_v12 }
  0x8d   : > { %6030 = vmatmul.msk.bf16.gmra.mxu0 %vm684_vm1, %v6338_v22 }
  0x9a   : > { %v752_v43 = vpop.f32.mrf.mxu0 }
  0x9b   : > { %v753_v44 = vadd.f32 %v6662_v37, %v752_v43  ;;  %v2049_v43 = vunpack.c.l.b16 %v2017_v32 }
  0x9d   : > { %v846_v46 = vmul.f32 %v6667_v39, %v753_v44  ;;  %6031 = vmatmul.msk.bf16.gmra.mxu0 %vm684_vm1, %v6339_v40 }
  0x9f   : > { %v886_v50 = vadd.f32 %v6675_v45, %v846_v46 }
  0xa1   : > { %v922_v55 = vmax.f32 %v886_v50, 0.0 }
  0xa2   : > { %v754_v54 = vpop.f32.mrf.mxu0 }
  0xa3   : > { %v755_v56 = vadd.f32 %v6662_v37, %v754_v54  ;;  %v958_v61 = vpack.c.bf16 %v922_v55, %v922_v55  ;;  %v2227_v54 = vunpack.c.h.b16 %v2111_v42  ;;  %v6755_v55 = vpack.c.b16 %v6651_v31, %v2049_v43 }
  0xa5   : > { %v847_v59 = vmul.f32 %v6667_v39, %v755_v56  ;;  %v1323_v11 = vsel %vm6689_vm12, 0, %v958_v61  ;;  %vm2231_vm11 = vcmp.ne.s32.totalorder %v2227_v54, %v6694_v4  ;;  %v2116_v3 = vshll.u32 %v6755_v55, 16  ;;  %v6342_v54 = vld [vmem:[%s6602_s18 + $0x50] sm:$0xff] }
  0xa6   : > { %v1395_v20 = vunpack.c.l.b16 %v1323_v11  ;;  %vm6778_vm14 = vmpackc.low %vm2231_vm11, %vm2230_vm9 }
  0xa7   : > { %v887_v62 = vadd.f32 %v6675_v45, %v847_v59  ;;  %v2118_v14 = vrot.slane %v2116_v3, 1 }
  0xa9   : > { %v923_v6 = vmax.f32 %v887_v62, 0.0 }
  0xaa   : > { %v757_v8 = vpop.f32.mrf.mxu0 }
  0xab   : > { %v959_v12 = vpack.c.bf16 %v923_v6, %v923_v6  ;;  %v758_v13 = vadd.f32 %v6662_v37, %v757_v8 }
  0xad   : > { %v1324_v18 = vsel %vm6689_vm12, 0, %v959_v12  ;;  %v848_v19 = vmul.f32 %v6667_v39, %v758_v13  ;;  %6032 = vmatmul.msk.bf16.gmra.mxu0 %vm684_vm1, %v6340_v7  ;;  %v2114_v13 = vor.u32 %v2112_v2, %v2110_v30 }
  0xae   : > { %v1396_v21 = vunpack.c.l.b16 %v1324_v18 }
  0xaf   : > { %v888_v25 = vadd.f32 %v6675_v45, %v848_v19  ;;  %v2051_v19 = vunpack.c.l.b16 %v2019_v5  ;;  %v2119_v32 = vsel %vm9859_vm10, %v2114_v13, %v2118_v14 }
  0xb0   : > { %v6732_v28 = vpack.c.b16 %v1396_v21, %v1395_v20  ;;  %v2234_v49 = vunpack.c.h.b16 %v2119_v32 }
  0xb1   : > { %v924_v36 = vmax.f32 %v888_v25, 0.0 }
  0xb2   : > { %v759_v34 = vpop.f32.mrf.mxu0  ;;  %v2331_v35 = vsel %vm6728_vm5, 0, %v6732_v28  ;;  %v2794_v44 = vsel %vm2793_vm6, 0, %v6732_v28  ;;  %vm2238_vm8 = vcmp.ne.s32.totalorder %v2234_v49, %v6694_v4 }
  0xb3   : > { %v760_v38 = vadd.f32 %v6662_v37, %v759_v34  ;;  %v3308_v40 = vshrl.u32 %v2331_v35, 16  ;;  %v3311_v48 = vshll.u32 %v2331_v35, 16  ;;  %v960_v50 = vpack.c.bf16 %v924_v36, %v924_v36 }
  0xb4   : > { %v3340_v30 = vshrl.u32 %v2794_v44, 16  ;;  %v2233_v44 = vunpack.c.l.b16 %v2119_v32 }
  0xb5   : > { %v849_v46 = vmul.f32 %v6667_v39, %v760_v38  ;;  %v3310_v47 = vrot.slane %v3308_v40, 7  ;;  %v1325_v61 = vsel %vm6636_vm4, 0, %v960_v50  ;;  %v1541_v38 = vand.u32 15, %v1005_v15 }
  0xb6   : > { %v1397_v8 = vunpack.c.l.b16 %v1325_v61  ;;  %v6798_v40 = vpack.c.b16 %v6651_v31, %v2051_v19  ;;  %v3342_v50 = vrot.slane %v3340_v30, 7  ;;  %vm2237_vm0 = vcmp.ne.s32.totalorder %v2233_v44, %v6687_v63 }
  0xb7   : > { %v889_v51 = vadd.f32 %v6675_v45, %v849_v46  ;;  %v3313_v52 = vor.u32 %v3311_v48, %v3310_v47  ;;  %vm6807_vm15 = vcmp.eq.s32.totalorder %v1541_v38, 0  ;;  %vm6831_vm11 = vmpackc.low %vm2238_vm8, %vm2237_vm0 }
  0xb8   : > { %v2124_v59 = vshll.u32 %v6798_v40, 16  ;;  %vm1989_vm9 = vmpackc.low %vm6807_vm15, %vm6807_vm15 }
  0xb9   : > { %v925_v56 = vmax.f32 %v889_v51, 0.0  ;;  %v3314_v57 = vsel %vm9862_vm7, %v3306_v41, %v3313_v52 }
  0xba   : > { %v762_v60 = vpop.f32.mrf.mxu0  ;;  %4827 = vmatmul.bf16.vlgmr.msra.gmra.mxu1 %v3314_v57 }
  0xbb   : > { %v961_v62 = vpack.c.bf16 %v925_v56, %v925_v56  ;;  %v763_v0 = vadd.f32 %v6662_v37, %v762_v60  ;;  %v6343_v56 = vld [vmem:[%s6602_s18 + $0x58] sm:$0xff] }
  0xbd   : > { %v1326_v6 = vsel %vm6636_vm4, 0, %v961_v62  ;;  %v850_v7 = vmul.f32 %v6667_v39, %v763_v0  ;;  %6033 = vmatmul.msk.bf16.gmra.mxu0 %vm684_vm1, %v6341_v58  ;;  %v2120_v58 = vshrl.u32 %v6755_v55, 16 }
  0xbe   : > { %v1398_v9 = vunpack.c.l.b16 %v1326_v6 }
  0xbf   : > { %v890_v10 = vadd.f32 %v6675_v45, %v850_v7  ;;  %v2122_v6 = vor.u32 %v2120_v58, %v2118_v14  ;;  %v6828_v7 = vrot.slane %v2124_v59, 1 }
  0xc0   : > { %v6783_v12 = vpack.c.b16 %v1398_v9, %v1397_v8  ;;  %v6365_v9 = vld [vmem:[%s9837_s7 + $0x70] sm:$0xff] }
  0xc1   : > { %v926_v21 = vmax.f32 %v890_v10, 0.0  ;;  %v2021_v10 = vsel %vm1989_vm9, 65537, %v9841_v26  ;;  %v2127_v14 = vsel %vm9859_vm10, %v2122_v6, %v6828_v7 }
  0xc2   : > { %9993 = vst [vmem:[#allocation3_spill] sm:$0xff] %v6783_v12  ;;  %v764_v17 = vpop.f32.mrf.mxu0  ;;  %v2332_v18 = vsel %vm6778_vm14, 0, %v6783_v12  ;;  %v2795_v20 = vsel %vm6728_vm5, 0, %v6783_v12 }
  0xc3   : > { %v765_v25 = vadd.f32 %v6662_v37, %v764_v17  ;;  %v3412_v29 = vshrl.u32 %v2332_v18, 16  ;;  %v3344_v33 = vshrl.u32 %v2795_v20, 16  ;;  %v3415_v36 = vshll.u32 %v2332_v18, 16 }
  0xc4   : > { %v3347_v42 = vshll.u32 %v2795_v20, 16  ;;  %v962_v43 = vpack.c.bf16 %v926_v21, %v926_v21  ;;  %v2053_v17 = vunpack.c.l.b16 %v2021_v10 }
  0xc5   : > { %v851_v34 = vmul.f32 %v6667_v39, %v765_v25  ;;  %v6795_v35 = vrot.slane %v3412_v29, 7  ;;  %v6800_v41 = vrot.slane %v3344_v33, 7  ;;  %v1007_v25 = vadd.s32 96, %v6622_v16 }
  0xc6   : > { %v1327_v61 = vsel %vm6636_vm4, 0, %v962_v43  ;;  %v2869_v29 = vshll.u32 %v6783_v12, 16  ;;  %v6853_v38 = vpack.c.b16 %v6651_v31, %v2053_v17 }
  0xc7   : > { %v891_v46 = vadd.f32 %v6675_v45, %v851_v34  ;;  %v3417_v48 = vor.u32 %v3415_v36, %v6795_v35  ;;  %v3349_v51 = vor.u32 %v3347_v42, %v6800_v41  ;;  %v1399_v2 = vunpack.c.l.b16 %v1327_v61 }
  0xc8   : > { %v2240_v36 = vunpack.c.l.b16 %v2127_v14  ;;  %v2828_v42 = vsel %vm2793_vm6, 0, %v6783_v12  ;;  %v2128_v61 = vshrl.u32 %v6798_v40, 16 }
  0xc9   : > { %v927_v52 = vmax.f32 %v891_v46, 0.0  ;;  %v3418_v53 = vsel %vm9862_vm7, %v3310_v47, %v3417_v48  ;;  %v6814_v60 = vsel %vm9862_vm7, %v3342_v50, %v3349_v51  ;;  %v1555_v50 = vand.u32 15, %v1007_v25 }
  0xca   : > { %v767_v57 = vpop.f32.mrf.mxu0  ;;  %4832 = vmatmul.bf16.gmra.mxu1 %v3418_v53  ;;  %v2241_v51 = vunpack.c.h.b16 %v2127_v14  ;;  %vm6889_vm3 = vcmp.ne.s32.totalorder %v2240_v36, %v6687_v63 }
  0xcb   : > { %v963_v62 = vpack.c.bf16 %v927_v52, %v927_v52  ;;  %v768_v47 = vadd.f32 %v6662_v37, %v767_v57  ;;  %v6865_v52 = vrot.slane %v2869_v29, 1  ;;  %v3376_v57 = vshrl.u32 %v2828_v42, 16 }
  0xcc   : > { %vm6884_vm2 = vcmp.eq.s32.totalorder %v1555_v50, 0 }
  0xcd   : > { %v1328_v55 = vsel %vm6636_vm4, 0, %v963_v62  ;;  %v852_v0 = vmul.f32 %v6667_v39, %v768_v47  ;;  %6034 = vmatmul.msk.bf16.gmra.mxu0 %vm684_vm1, %v6342_v54  ;;  %v2132_v62 = vshll.u32 %v6853_v38, 16  ;;  %vm1991_vm6 = vmpackc.low %vm6884_vm2, %vm6884_vm2  ;;  %v3378_v17 = vrot.slane %v3376_v57, 7 }
  0xce   : > { %v1400_v3 = vunpack.c.l.b16 %v1328_v55 }
  0xcf   : > { %v892_v8 = vadd.f32 %v6675_v45, %v852_v0  ;;  %v6915_v25 = vrot.slane %v2132_v62, 1 }
  0xd0   : > { %v6836_v5 = vpack.c.b16 %v1400_v3, %v1399_v2 }
  0xd1   : > { %v928_v19 = vmax.f32 %v892_v8, 0.0 }
  0xd2   : > { %9998 = vst [vmem:[#allocation4_spill] sm:$0xff] %v6836_v5  ;;  %v769_v13 = vpop.f32.mrf.mxu0  ;;  %v2333_v15 = vsel %vm6831_vm11, 0, %v6836_v5  ;;  %v2796_v18 = vsel %vm6778_vm14, 0, %v6836_v5  ;;  %v2829_v22 = vsel %vm6728_vm5, 0, %v6836_v5  ;;  %v2877_v58 = vshll.u32 %v6836_v5, 16 }
  0xd3   : > { %v770_v20 = vadd.f32 %v6662_v37, %v769_v13  ;;  %v3470_v21 = vshrl.u32 %v2333_v15, 16  ;;  %v3429_v32 = vshrl.u32 %v2796_v18, 16  ;;  %v3473_v34 = vshll.u32 %v2333_v15, 16 }
  0xd4   : > { %v3432_v46 = vshll.u32 %v2796_v18, 16  ;;  %v964_v48 = vpack.c.bf16 %v928_v19, %v928_v19  ;;  %v3380_v27 = vshrl.u32 %v2829_v22, 16  ;;  %vm2245_vm5 = vcmp.ne.s32.totalorder %v2241_v51, %v6694_v4 }
  0xd5   : > { %v853_v30 = vmul.f32 %v6667_v39, %v770_v20  ;;  %v6850_v33 = vrot.slane %v3470_v21, 7  ;;  %v6861_v43 = vrot.slane %v3429_v32, 7  ;;  %v6901_v10 = vrot.slane %v2877_v58, 1  ;;  %vm6910_vm13 = vmpackc.low %vm2245_vm5, %vm6889_vm3 }
  0xd6   : > { %v1329_v55 = vsel %vm6636_vm4, 0, %v964_v48  ;;  %v6895_v3 = vrot.slane %v3380_v27, 7  ;;  %v3383_v13 = vshll.u32 %v2829_v22, 16  ;;  %v10004_v20 = vmov 0 }
  0xd7   : > { %v893_v44 = vadd.f32 %v6675_v45, %v853_v30  ;;  %v3475_v49 = vor.u32 %v3473_v34, %v6850_v33  ;;  %v3434_v53 = vor.u32 %v3432_v46, %v6861_v43  ;;  %10003 = vst [vmem:[#allocation5_spill] sm:$0xff] %v6901_v10  ;;  %v1401_v15 = vunpack.c.l.b16 %v1329_v55 }
  0xd8   : > { %v10005_v20 = vsel %vm6910_vm13, 4294967295, %v10004_v20  ;;  %v2130_v21 = vor.u32 %v2128_v61, %v6828_v7  ;;  %v3385_v29 = vor.u32 %v3383_v13, %v6895_v3  ;;  %v2023_v30 = vsel %vm1991_vm6, 65537, %v9841_v26  ;;  %v6344_v13 = vld [vmem:[%s6602_s18 + $0x60] sm:$0xff] }
  0xd9   : > { %v929_v23 = vmax.f32 %v893_v44, 0.0  ;;  %v3476_v54 = vsel %vm9862_vm7, %v6795_v35, %v3475_v49  ;;  %v6879_v47 = vsel %vm9862_vm7, %v6800_v41, %v3434_v53  ;;  %v2873_v41 = vshrl.u32 %v6783_v12, 16  ;;  %10006 = vst [vmem:[#allocation6_spill] sm:$0xff] %v10005_v20 }
  0xda   : > { %v772_v59 = vpop.f32.mrf.mxu0  ;;  %4837 = vmatmul.bf16.gmra.mxu1 %v3476_v54  ;;  %v1009_v34 = vadd.s32 112, %v6622_v16  ;;  %v6925_v42 = vsel %vm9862_vm7, %v3378_v17, %v3385_v29  ;;  %v2135_v51 = vsel %vm9859_vm10, %v2130_v21, %v6915_v25  ;;  %v2055_v53 = vunpack.c.l.b16 %v2023_v30 }
  0xdb   : > { %v965_v0 = vpack.c.bf16 %v929_v23, %v929_v23  ;;  %v773_v35 = vadd.f32 %v6662_v37, %v772_v59  ;;  %v2875_v18 = vor.u32 %v2873_v41, %v6865_v52  ;;  %v2247_v59 = vunpack.c.l.b16 %v2135_v51 }
  0xdc   : > { %v1569_v58 = vand.u32 15, %v1009_v34  ;;  %v6944_v2 = vpack.c.b16 %v6651_v31, %v2055_v53 }
  0xdd   : > { %v1330_v6 = vsel %vm6636_vm4, 0, %v965_v0  ;;  %v854_v8 = vmul.f32 %v6667_v39, %v773_v35  ;;  %6035 = vmatmul.msk.bf16.gmra.mxu0 %vm684_vm1, %v6343_v56  ;;  %v2880_v36 = vsel %vm9859_vm10, %v2875_v18, %v6901_v10  ;;  %v2248_v35 = vunpack.c.h.b16 %v2135_v51 }
  0xde   : > { %v1402_v14 = vunpack.c.l.b16 %v1330_v6  ;;  %v3356_v22 = vshrl.u32 %v2880_v36, 16  ;;  %vm6953_vm15 = vcmp.eq.s32.totalorder %v1569_v58, 0  ;;  %vm6960_vm0 = vcmp.ne.s32.totalorder %v2247_v59, %v6687_v63 }
  0xdf   : > { %v894_v19 = vadd.f32 %v6675_v45, %v854_v8  ;;  %v3359_v34 = vshll.u32 %v2880_v36, 16  ;;  %vm1993_vm8 = vmpackc.low %vm6953_vm15, %vm6953_vm15 }
  0xe0   : > { %v6918_v32 = vpack.c.b16 %v1402_v14, %v1401_v15  ;;  %v6957_v14 = vrot.slane %v3356_v22, 7  ;;  %v2025_v22 = vsel %vm1993_vm8, 65537, %v9841_v26 }
  0xe1   : > { %v930_v44 = vmax.f32 %v894_v19, 0.0 }
  0xe2   : > { %10007 = vst [vmem:[#allocation7_spill] sm:$0xff] %v6918_v32  ;;  %v774_v46 = vpop.f32.mrf.mxu0  ;;  %v2334_v7 = vsel %vm6910_vm13, 0, %v6918_v32  ;;  %v2797_v48 = vsel %vm6831_vm11, 0, %v6918_v32  ;;  %v2830_v41 = vsel %vm6778_vm14, 0, %v6918_v32  ;;  %vm2252_vm14 = vcmp.ne.s32.totalorder %v2248_v35, %v6694_v4 }
  0xe3   : > { %v775_v49 = vadd.f32 %v6662_v37, %v774_v46  ;;  %v3526_v50 = vshrl.u32 %v2334_v7, 16  ;;  %v3486_v23 = vshrl.u32 %v2797_v48, 16  ;;  %v3529_v57 = vshll.u32 %v2334_v7, 16  ;;  %vm6990_vm9 = vmpackc.low %vm2252_vm14, %vm6960_vm0 }
  0xe4   : > { %v3489_v62 = vshll.u32 %v2797_v48, 16  ;;  %v966_v27 = vpack.c.bf16 %v930_v44, %v930_v44  ;;  %v3446_v19 = vshrl.u32 %v2830_v41, 16  ;;  %v2136_v46 = vshrl.u32 %v6853_v38, 16 }
  0xe5   : > { %v855_v54 = vmul.f32 %v6667_v39, %v775_v49  ;;  %v6937_v56 = vrot.slane %v3526_v50, 7  ;;  %v6939_v61 = vrot.slane %v3486_v23, 7  ;;  %v2140_v7 = vshll.u32 %v6944_v2, 16 }
  0xe6   : > { %v1331_v21 = vsel %vm6636_vm4, 0, %v966_v27  ;;  %v6985_v36 = vor.u32 %v3359_v34, %v6957_v14  ;;  %v3449_v49 = vshll.u32 %v2830_v41, 16  ;;  %v2138_v58 = vor.u32 %v2136_v46, %v6915_v25 }
  0xe7   : > { %v895_v55 = vadd.f32 %v6675_v45, %v855_v54  ;;  %v3531_v0 = vor.u32 %v3529_v57, %v6937_v56  ;;  %v3491_v40 = vor.u32 %v3489_v62, %v6939_v61  ;;  %v1403_v38 = vunpack.c.l.b16 %v1331_v21 }
  0xe8   : > { %v2142_v59 = vrot.slane %v2140_v7, 1  ;;  %v2057_v35 = vunpack.c.l.b16 %v2025_v22  ;;  %v6345_v7 = vld [vmem:[%s6602_s18 + $0x68] sm:$0xff] }
  0xe9   : > { %v931_v6 = vmax.f32 %v895_v55, 0.0  ;;  %v3532_v8 = vsel %vm9862_vm7, %v6850_v33, %v3531_v0  ;;  %v6966_v11 = vsel %vm9862_vm7, %v6861_v43, %v3491_v40  ;;  %v3352_v33 = vshrl.u32 %v6865_v52, 16 }
  0xea   : > { %v777_v17 = vpop.f32.mrf.mxu0  ;;  %4842 = vmatmul.bf16.gmra.mxu1 %v3532_v8  ;;  %v6978_v43 = vrot.slane %v3446_v19, 7  ;;  %v2143_v15 = vsel %vm9859_vm10, %v2138_v58, %v2142_v59 }
  0xeb   : > { %v967_v29 = vpack.c.bf16 %v931_v6, %v931_v6  ;;  %v778_v30 = vadd.f32 %v6662_v37, %v777_v17  ;;  %v3354_v54 = vrot.slane %v3352_v33, 7  ;;  %v1011_v6 = vadd.s32 128, %v6622_v16 }
  0xec   : > { %v3451_v23 = vor.u32 %v3449_v49, %v6978_v43  ;;  %v7017_v17 = vpack.c.b16 %v6651_v31, %v2057_v35 }
  0xed   : > { %v1332_v48 = vsel %vm6636_vm4, 0, %v967_v29  ;;  %v856_v44 = vmul.f32 %v6667_v39, %v778_v30  ;;  %6036 = vmatmul.msk.bf16.gmra.mxu0 %vm684_vm1, %v6344_v13  ;;  %v7005_v27 = vsel %vm9862_vm7, %v3354_v54, %v6985_v36  ;;  %v1583_v21 = vand.u32 15, %v1011_v6 }
  0xee   : > { %v1404_v50 = vunpack.c.l.b16 %v1332_v48  ;;  %v7001_v62 = vsel %vm9862_vm7, %v6895_v3, %v3451_v23  ;;  %10016 = vst [vmem:[#allocation10_spill] sm:$0xff] %v7005_v27  ;;  %v2254_v29 = vunpack.c.l.b16 %v2143_v15  ;;  %v2255_v30 = vunpack.c.h.b16 %v2143_v15 }
  0xef   : > { %v896_v51 = vadd.f32 %v6675_v45, %v856_v44  ;;  %10015 = vst [vmem:[#allocation9_spill] sm:$0xff] %v7001_v62  ;;  %v2144_v44 = vshrl.u32 %v6944_v2, 16  ;;  %v2148_v49 = vshll.u32 %v7017_v17, 16  ;;  %vm7029_vm2 = vcmp.eq.s32.totalorder %v1583_v21, 0  ;;  %v6364_v21 = vld [vmem:[%s9837_s7 + $0x68] sm:$0xff] }
  0xf0   : > { %v6996_v57 = vpack.c.b16 %v1404_v50, %v1403_v38  ;;  %vm2258_vm3 = vcmp.ne.s32.totalorder %v2254_v29, %v6687_v63  ;;  %vm2259_vm5 = vcmp.ne.s32.totalorder %v2255_v30, %v6694_v4  ;;  %vm1995_vm6 = vmpackc.low %vm7029_vm2, %vm7029_vm2  ;;  %v1013_v30 = vadd.s32 144, %v6622_v16 }
  0xf1   : > { %v932_v40 = vmax.f32 %v896_v51, 0.0  ;;  %vm7049_vm15 = vmpackc.low %vm2259_vm5, %vm2258_vm3 }
  0xf2   : > { %10014 = vst [vmem:[#allocation8_spill] sm:$0xff] %v6996_v57  ;;  %v779_v55 = vpop.f32.mrf.mxu0  ;;  %v2335_v0 = vsel %vm6990_vm9, 0, %v6996_v57  ;;  %v2831_v54 = vsel %vm6831_vm11, 0, %v6996_v57 }
  0xf3   : > { %v780_v41 = vadd.f32 %v6662_v37, %v779_v55  ;;  %v3582_v25 = vshrl.u32 %v2335_v0, 16  ;;  %v3585_v13 = vshll.u32 %v2335_v0, 16  ;;  %v968_v18 = vpack.c.bf16 %v932_v40, %v932_v40 }
  0xf4   : > { %v2146_v40 = vor.u32 %v2144_v44, %v2142_v59  ;;  %v3502_v6 = vshrl.u32 %v2831_v54, 16 }
  0xf5   : > { %v857_v3 = vmul.f32 %v6667_v39, %v780_v41  ;;  %v7013_v8 = vrot.slane %v3582_v25, 7  ;;  %v1333_v38 = vsel %vm6636_vm4, 0, %v968_v18  ;;  %v7053_v41 = vrot.slane %v2148_v49, 1 }
  0xf6   : > { %v1405_v58 = vunpack.c.l.b16 %v1333_v38  ;;  %v3505_v49 = vshll.u32 %v2831_v54, 16 }
  0xf7   : > { %v897_v19 = vadd.f32 %v6675_v45, %v857_v3  ;;  %v3587_v33 = vor.u32 %v3585_v13, %v7013_v8  ;;  %v2027_v3 = vsel %vm1995_vm6, 65537, %v9841_v26 }
  0xf8   : > { %v2059_v29 = vunpack.c.l.b16 %v2027_v3 }
  0xf9   : > { %v933_v34 = vmax.f32 %v897_v19, 0.0  ;;  %v3588_v46 = vsel %vm9862_vm7, %v6937_v56, %v3587_v33  ;;  %v6366_v56 = vld [vmem:[%s9837_s7 + $0x78] sm:$0xff]  ;;  %v2151_v33 = vsel %vm9859_vm10, %v2146_v40, %v7053_v41 }
  0xfa   : > { %v782_v48 = vpop.f32.mrf.mxu0  ;;  %4847 = vmatmul.bf16.gmra.mxu1 %v3588_v46  ;;  %4908 = vmatpush.bf16.msrb.mxu0 %v6366_v56  ;;  %v2261_v44 = vunpack.c.l.b16 %v2151_v33  ;;  %v2262_v22 = vunpack.c.h.b16 %v2151_v33  ;;  %v6382_v40 = vld [vmem:[%s9837_s7 + $0xf8] sm:$0xff] }
  0xfb   : > { %v969_v50 = vpack.c.bf16 %v933_v34, %v933_v34  ;;  %v783_v51 = vadd.f32 %v6662_v37, %v782_v48  ;;  %6431 = vmatpush.bf16.msra.mxu2 %v6366_v56  ;;  %v7071_v34 = vrot.slane %v3502_v6, 7  ;;  %v7079_v56 = vpack.c.b16 %v6651_v31, %v2059_v29  ;;  %5086 = vmatpush.bf16.msrb.mxu1 %v6382_v40  ;;  %v6360_v40 = vld [vmem:[%s9837_s7 + $0x48] sm:$0xff] }
  0xfc   : > { %vm7092_vm11 = vcmp.ne.s32.totalorder %v2261_v44, %v6687_v63  ;;  %vm2266_vm0 = vcmp.ne.s32.totalorder %v2262_v22, %v6694_v4 }
  0xfd   : > { %v1334_v2 = vsel %vm6636_vm4, 0, %v969_v50  ;;  %v858_v23 = vmul.f32 %v6667_v39, %v783_v51  ;;  %6037 = vmatmul.msk.bf16.gmra.mxu0 %vm684_vm1, %v6345_v7  ;;  %10022 = vst [vmem:[#allocation12_spill] sm:$0xff] %v7071_v34  ;;  %vm7126_vm8 = vmpackc.low %vm2266_vm0, %vm7092_vm11 }
  0xfe   : > { %v1406_v55 = vunpack.c.l.b16 %v1334_v2  ;;  %4909 = vmatpush.bf16.msrb.mxu0 %v6365_v9  ;;  %v6363_v2 = vld [vmem:[%s9837_s7 + $0x60] sm:$0xff] }
  0xff   : > { %v898_v0 = vadd.f32 %v6675_v45, %v858_v23  ;;  %6432 = vmatpush.bf16.msra.mxu2 %v6365_v9  ;;  %v1597_v23 = vand.u32 15, %v1013_v30 }
 0x100   : > { %v7055_v25 = vpack.c.b16 %v1406_v55, %v1405_v58  ;;  %v3507_v58 = vor.u32 %v3505_v49, %v7071_v34 }
 0x101   : > { %v934_v18 = vmax.f32 %v898_v0, 0.0  ;;  %v6346_v0 = vld [vmem:[%s6602_s18 + $0x70] sm:$0xff]  ;;  %vm7109_vm14 = vcmp.eq.s32.totalorder %v1597_v23, 0 }
 0x102   : > { %10021 = vst [vmem:[#allocation11_spill] sm:$0xff] %v7055_v25  ;;  %v784_v13 = vpop.f32.mrf.mxu0  ;;  %v2336_v15 = vsel %vm7049_vm15, 0, %v7055_v25  ;;  %4910 = vmatpush.bf16.msrb.mxu0 %v6364_v21  ;;  %v7098_v3 = vsel %vm9862_vm7, %v6978_v43, %v3507_v58  ;;  %vm1997_vm2 = vmpackc.low %vm7109_vm14, %vm7109_vm14 }
 0x103   : > { %v785_v59 = vadd.f32 %v6662_v37, %v784_v13  ;;  %v3638_v19 = vshrl.u32 %v2336_v15, 16  ;;  %v3641_v48 = vshll.u32 %v2336_v15, 16  ;;  %6433 = vmatpush.bf16.msra.mxu2 %v6364_v21  ;;  %v970_v38 = vpack.c.bf16 %v934_v18, %v934_v18  ;;  %10025 = vst [vmem:[#allocation13_spill] sm:$0xff] %v7098_v3 }
 0x104   : > { %v2152_v18 = vshrl.u32 %v7017_v17, 16  ;;  %v6381_v17 = vld [vmem:[%s9837_s7 + $0xf0] sm:$0xff]  ;;  %v2029_v23 = vsel %vm1997_vm2, 65537, %v9841_v26 }
 0x105   : > { %v859_v46 = vmul.f32 %v6667_v39, %v785_v59  ;;  %v7074_v7 = vrot.slane %v3638_v19, 7  ;;  %v2156_v59 = vshll.u32 %v7079_v56, 16  ;;  %v6362_v19 = vld [vmem:[%s9837_s7 + $0x58] sm:$0xff]  ;;  %5087 = vmatpush.bf16.msrb.mxu1 %v6381_v17  ;;  %v6359_v17 = vld [vmem:[%s9837_s7 + $0x40] sm:$0xff] }
 0x106   : > { %4911 = vmatpush.bf16.msrb.mxu0 %v6363_v2  ;;  %v2154_v49 = vor.u32 %v2152_v18, %v7053_v41 }
 0x107   : > { %v899_v50 = vadd.f32 %v6675_v45, %v859_v46  ;;  %v3643_v51 = vor.u32 %v3641_v48, %v7074_v7  ;;  %6434 = vmatpush.bf16.msra.mxu2 %v6363_v2  ;;  %v10028_v46 = vmov 0 }
 0x108   : > { %v10029_v46 = vsel %vm7126_vm8, 4294967295, %v10028_v46 }
 0x109   : > { %v935_v55 = vmax.f32 %v899_v50, 0.0  ;;  %v3644_v54 = vsel %vm9862_vm7, %v7013_v8, %v3643_v51  ;;  %v1335_v8 = vsel %vm6636_vm4, 0, %v970_v38  ;;  %v7138_v38 = vrot.slane %v2156_v59, 1  ;;  %v6361_v50 = vld [vmem:[%s9837_s7 + $0x50] sm:$0xff]  ;;  %v6380_v51 = vld [vmem:[%s9837_s7 + $0xe8] sm:$0xff] }
 0x10a   : > { %v787_v9 = vpop.f32.mrf.mxu0  ;;  %4852 = vmatmul.bf16.gmra.mxu1 %v3644_v54  ;;  %v1407_v29 = vunpack.c.l.b16 %v1335_v8  ;;  %4912 = vmatpush.bf16.msrb.mxu0 %v6362_v19  ;;  %v1015_v54 = vadd.s32 160, %v6622_v16 }
 0x10b   : > { %v971_v13 = vpack.c.bf16 %v935_v55, %v935_v55  ;;  %v788_v15 = vadd.f32 %v6662_v37, %v787_v9  ;;  %6435 = vmatpush.bf16.msra.mxu2 %v6362_v19  ;;  %5088 = vmatpush.bf16.msrb.mxu1 %v6380_v51  ;;  %v6378_v51 = vld [vmem:[%s9837_s7 + $0xd8] sm:$0xff] }
 0x10c   : > { %v1611_v43 = vand.u32 15, %v1015_v54 }
 0x10d   : > { %v1336_v33 = vsel %vm6636_vm4, 0, %v971_v13  ;;  %v860_v21 = vmul.f32 %v6667_v39, %v788_v15  ;;  %6038 = vmatmul.msk.bf16.gmra.mxu0 %vm684_vm1, %v6346_v0  ;;  %v2159_v0 = vsel %vm9859_vm10, %v2154_v49, %v7138_v38  ;;  %v6379_v13 = vld [vmem:[%s9837_s7 + $0xe0] sm:$0xff]  ;;  %v2061_v15 = vunpack.c.l.b16 %v2029_v23  ;;  %v6347_v49 = vld [vmem:[%s6602_s18 + $0x78] sm:$0xff] }
 0x10e   : > { %v1408_v30 = vunpack.c.l.b16 %v1336_v33  ;;  %4913 = vmatpush.bf16.msrb.mxu0 %v6361_v50  ;;  %v2268_v33 = vunpack.c.l.b16 %v2159_v0  ;;  %vm7194_vm3 = vcmp.eq.s32.totalorder %v1611_v43, 0 }
 0x10f   : > { %v900_v48 = vadd.f32 %v6675_v45, %v860_v21  ;;  %6436 = vmatpush.bf16.msra.mxu2 %v6361_v50  ;;  %5089 = vmatpush.bf16.msrb.mxu1 %v6379_v13  ;;  %v2269_v21 = vunpack.c.h.b16 %v2159_v0  ;;  %v7179_v50 = vpack.c.b16 %v6651_v31, %v2061_v15  ;;  %vm1999_vm11 = vmpackc.low %vm7194_vm3, %vm7194_vm3 }
 0x110   : > { %v7135_v44 = vpack.c.b16 %v1408_v30, %v1407_v29  ;;  %v2901_v29 = vshll.u32 %v7055_v25, 16  ;;  %vm2272_vm5 = vcmp.ne.s32.totalorder %v2268_v33, %v6687_v63  ;;  %v2862_v33 = vshll.u32 %v6732_v28, 16 }
 0x111   : > { %v936_v58 = vmax.f32 %v900_v48, 0.0  ;;  %vm2273_vm6 = vcmp.ne.s32.totalorder %v2269_v21, %v6694_v4 }
 0x112   : > { %10030 = vst [vmem:[#allocation14_spill] sm:$0xff] %v7135_v44  ;;  %v789_v22 = vpop.f32.mrf.mxu0  ;;  %v2337_v2 = vsel %vm7126_vm8, 0, %v7135_v44  ;;  %4914 = vmatpush.bf16.msrb.mxu0 %v6360_v40  ;;  %vm7212_vm0 = vmpackc.low %vm2273_vm6, %vm2272_vm5 }
 0x113   : > { %v790_v41 = vadd.f32 %v6662_v37, %v789_v22  ;;  %v3694_v55 = vshrl.u32 %v2337_v2, 16  ;;  %v3697_v8 = vshll.u32 %v2337_v2, 16  ;;  %v972_v18 = vpack.c.bf16 %v936_v58, %v936_v58  ;;  %6437 = vmatpush.bf16.msra.mxu2 %v6360_v40  ;;  %5090 = vmatpush.bf16.msrb.mxu1 %v6378_v51 }
 0x114   : > { %v2909_v2 = vshll.u32 %v7135_v44, 16  ;;  %v2160_v40 = vshrl.u32 %v7079_v56, 16  ;;  %v6377_v56 = vld [vmem:[%s9837_s7 + $0xd0] sm:$0xff] }
 0x115   : > { %v861_v9 = vmul.f32 %v6667_v39, %v790_v41  ;;  %v7163_v6 = vrot.slane %v3694_v55, 7  ;;  %v1337_v23 = vsel %vm6636_vm4, 0, %v972_v18  ;;  %v7200_v55 = vrot.slane %v2901_v29, 1 }
 0x116   : > { %4915 = vmatpush.bf16.msrb.mxu0 %v6359_v17  ;;  %v2162_v21 = vor.u32 %v2160_v40, %v7138_v38  ;;  %v2031_v29 = vsel %vm1999_vm11, 65537, %v9841_v26  ;;  %v1017_v40 = vadd.s32 176, %v6622_v16 }
 0x117   : > { %v901_v59 = vadd.f32 %v6675_v45, %v861_v9  ;;  %v3699_v19 = vor.u32 %v3697_v8, %v7163_v6  ;;  %6438 = vmatpush.bf16.msra.mxu2 %v6359_v17  ;;  %v2164_v9 = vshll.u32 %v7179_v50, 16  ;;  %v1409_v8 = vunpack.c.l.b16 %v1337_v23  ;;  %5091 = vmatpush.bf16.msrb.mxu1 %v6377_v56 }
 0x119   : > { %v937_v30 = vmax.f32 %v901_v59, 0.0  ;;  %v3700_v48 = vsel %vm9862_vm7, %v7074_v7, %v3699_v19  ;;  %v2911_v59 = vrot.slane %v2909_v2, 1  ;;  %v2905_v19 = vshrl.u32 %v7055_v25, 16 }
 0x11a   : > { %v792_v22 = vpop.f32.mrf.mxu0  ;;  %4857 = vmatmul.bf16.gmra.mxu1 %v3700_v48  ;;  %v7230_v17 = vrot.slane %v2164_v9, 1 }
 0x11b   : > { %v973_v58 = vpack.c.bf16 %v937_v30, %v937_v30  ;;  %v793_v41 = vadd.f32 %v6662_v37, %v792_v22  ;;  %v2907_v30 = vor.u32 %v2905_v19, %v7200_v55  ;;  %v2913_v22 = vshrl.u32 %v7135_v44, 16 }
 0x11d   : > { %v1338_v54 = vsel %vm6636_vm4, 0, %v973_v58  ;;  %v862_v0 = vmul.f32 %v6667_v39, %v793_v41  ;;  %6039 = vmatmul.msk.bf16.gmra.mxu0 %vm684_vm1, %v6347_v49  ;;  %v6376_v58 = vld [vmem:[%s9837_s7 + $0xc8] sm:$0xff]  ;;  %v7245_v41 = vsel %vm9859_vm10, %v2907_v30, %v2911_v59  ;;  %v2915_v7 = vor.u32 %v2913_v22, %v2911_v59 }
 0x11e   : > { %v1410_v13 = vunpack.c.l.b16 %v1338_v54  ;;  %5092 = vmatpush.bf16.msrb.mxu1 %v6376_v58  ;;  %v7258_v59 = vrot.slane %v2862_v33, 1  ;;  %v3566_v19 = vshrl.u32 %v7245_v41, 16  ;;  %v1625_v33 = vand.u32 15, %v1017_v40 }
 0x11f   : > { %v902_v15 = vadd.f32 %v6675_v45, %v862_v0  ;;  %v2063_v0 = vunpack.c.l.b16 %v2031_v29  ;;  %v2865_v22 = vshrl.u32 %v6732_v28, 16 }
 0x120   : > { %v7226_v43 = vpack.c.b16 %v1410_v13, %v1409_v8  ;;  %v2167_v13 = vsel %vm9859_vm10, %v2162_v21, %v7230_v17  ;;  %vm7290_vm14 = vcmp.eq.s32.totalorder %v1625_v33, 0 }
 0x121   : > { %v938_v48 = vmax.f32 %v902_v15, 0.0  ;;  %vm2001_vm5 = vmpackc.low %vm7290_vm14, %vm7290_vm14 }
 0x122   : > { %10036 = vst [vmem:[#allocation15_spill] sm:$0xff] %v7226_v43  ;;  %v794_v49 = vpop.f32.mrf.mxu0  ;;  %v2338_v51 = vsel %vm7212_vm0, 0, %v7226_v43  ;;  %v2917_v2 = vshll.u32 %v7226_v43, 16 }
 0x123   : > { %v795_v23 = vadd.f32 %v6662_v37, %v794_v49  ;;  %v3750_v38 = vshrl.u32 %v2338_v51, 16  ;;  %v3753_v37 = vshll.u32 %v2338_v51, 16  ;;  %v974_v15 = vpack.c.bf16 %v938_v48, %v938_v48  ;;  %v6375_v48 = vld [vmem:[%s9837_s7 + $0xc0] sm:$0xff] }
 0x124   : > { %v7247_v54 = vrot.slane %v2917_v2, 1  ;;  %v2275_v49 = vunpack.c.l.b16 %v2167_v13  ;;  %v2276_v51 = vunpack.c.h.b16 %v2167_v13  ;;  %v7273_v2 = vpack.c.b16 %v6651_v31, %v2063_v0  ;;  %5093 = vmatpush.bf16.msrb.mxu1 %v6375_v48  ;;  %v7309_v48 = vld [vmem:[%s9835_s5] ss:$0 sm:$0xff] }
 0x125   : > { %v863_v9 = vmul.f32 %v6667_v39, %v795_v23  ;;  %v7251_v8 = vrot.slane %v3750_v38, 7  ;;  %v6390_v39 = vld [vmem:[%s9837_s7 + $0x138] sm:$0xff]  ;;  %v6348_v38 = vld [vmem:[%s509_s23] sm:$0xff]  ;;  %v1339_v40 = vsel %vm6636_vm4, 0, %v974_v15  ;;  %v7282_v13 = vrot.slane %v3566_v19, 7 }
 0x126   : > { %v2920_v56 = vsel %vm9859_vm10, %v2915_v7, %v7247_v54  ;;  %5175 = vmatpush.bf16.msrb.mxu2 %v6390_v39  ;;  %v7287_v39 = vld [vmem:[%s9834_s4] ss:$0 sm:$0xff]  ;;  %vm7296_vm2 = vcmp.ne.s32.totalorder %v2275_v49, %v6687_v63  ;;  %vm2280_vm3 = vcmp.ne.s32.totalorder %v2276_v51, %v6694_v4  ;;  %v2172_v49 = vshll.u32 %v7273_v2, 16 }
 0x127   : > { %v903_v29 = vadd.f32 %v6675_v45, %v863_v9  ;;  %v3755_v21 = vor.u32 %v3753_v37, %v7251_v8  ;;  %v3622_v30 = vshrl.u32 %v2920_v56, 16  ;;  %v3625_v7 = vshll.u32 %v2920_v56, 16 }
 0x128   : > { %v2867_v37 = vor.u32 %v2865_v22, %v7258_v59  ;;  %v7324_v22 = vld [vmem:[%s9836_s6] ss:$0 sm:$0xff] }
 0x129   : > { %v939_v23 = vmax.f32 %v903_v29, 0.0  ;;  %v3756_v45 = vsel %vm9862_vm7, %v7163_v6, %v3755_v21  ;;  %v7277_v58 = vrot.slane %v3622_v30, 7  ;;  %v2168_v21 = vshrl.u32 %v7179_v50, 16 }
 0x12a   : > { %v797_v9 = vpop.f32.mrf.mxu0  ;;  %4862 = vmatmul.bf16.gmra.mxu1 %v3756_v45  ;;  %v2872_v19 = vsel %vm9859_vm10, %v2867_v37, %v6865_v52  ;;  %v1411_v52 = vunpack.c.l.b16 %v1339_v40  ;;  %v10042_v45 = vmov 0  ;;  %v2033_v37 = vsel %vm2001_vm5, 65537, %v9841_v26 }
 0x12b   : > { %v975_v0 = vpack.c.bf16 %v939_v23, %v939_v23  ;;  %v798_v6 = vadd.f32 %v7287_v39, %v797_v9  ;;  %v3627_v15 = vor.u32 %v3625_v7, %v7277_v58  ;;  %v2170_v40 = vor.u32 %v2168_v21, %v7230_v17 }
 0x12c   : > { %v7336_v9 = vrot.slane %v2172_v49, 1  ;;  %v3323_v17 = vshll.u32 %v2872_v19, 16 }
 0x12d   : > { %v1340_v30 = vsel %vm6636_vm4, 0, %v975_v0  ;;  %v864_v33 = vmul.f32 %v7309_v48, %v798_v6  ;;  %6040 = vmatmul.msk.bf16.gmra.mxu0 %vm684_vm1, %v6348_v38  ;;  %v7316_v51 = vsel %vm9862_vm7, %v7282_v13, %v3627_v15  ;;  %vm7329_vm1 = vmpackc.low %vm2280_vm3, %vm7296_vm2  ;;  %v3320_v38 = vshrl.u32 %v2872_v19, 16 }
 0x12e   : > { %10041 = vst [vmem:[#allocation16_spill] sm:$0xff] %v7316_v51  ;;  %v1412_v50 = vunpack.c.l.b16 %v1340_v30  ;;  %v10043_v45 = vsel %vm7329_vm1, 4294967295, %v10042_v45  ;;  %v2921_v15 = vshrl.u32 %v7226_v43, 16  ;;  %v2175_v3 = vsel %vm9859_vm10, %v2170_v40, %v7336_v9 }
 0x12f   : > { %v904_v23 = vadd.f32 %v7324_v22, %v864_v33  ;;  %10044 = vst [vmem:[#allocation17_spill] sm:$0xff] %v10043_v45  ;;  %v2282_v40 = vunpack.c.l.b16 %v2175_v3 }
 0x130   : > { %v7333_v7 = vpack.c.b16 %v1412_v50, %v1411_v52  ;;  %v7345_v52 = vrot.slane %v3320_v38, 7  ;;  %v2923_v21 = vor.u32 %v2921_v15, %v7247_v54  ;;  %v2065_v50 = vunpack.c.l.b16 %v2033_v37  ;;  %v6389_v54 = vld [vmem:[%s9837_s7 + $0x130] sm:$0xff] }
 0x131   : > { %v940_v0 = vmax.f32 %v904_v23, 0.0  ;;  %v1019_v23 = vadd.s32 192, %v6622_v16  ;;  %v3316_v38 = vshrl.u32 %v7258_v59, 16  ;;  %5176 = vmatpush.bf16.msrb.mxu2 %v6389_v54  ;;  %vm2286_vm11 = vcmp.ne.s32.totalorder %v2282_v40, %v6687_v63 }
 0x132   : > { %10045 = vst [vmem:[#allocation18_spill] sm:$0xff] %v7333_v7  ;;  %v799_v6 = vpop.f32.mrf.mxu0  ;;  %v2339_v29 = vsel %vm7329_vm1, 0, %v7333_v7  ;;  %v2925_v56 = vshll.u32 %v7333_v7, 16  ;;  %v7368_v59 = vpack.c.b16 %v6651_v31, %v2065_v50 }
 0x133   : > { %v800_v30 = vadd.f32 %v7287_v39, %v799_v6  ;;  %v3806_v33 = vshrl.u32 %v2339_v29, 16  ;;  %v3809_v27 = vshll.u32 %v2339_v29, 16  ;;  %v976_v6 = vpack.c.bf16 %v940_v0, %v940_v0 }
 0x134   : > { %v7348_v49 = vrot.slane %v2925_v56, 1  ;;  %v3325_v29 = vor.u32 %v3323_v17, %v7345_v52  ;;  %v2283_v0 = vunpack.c.h.b16 %v2175_v3  ;;  %v3318_v17 = vrot.slane %v3316_v38, 7 }
 0x135   : > { %v865_v26 = vmul.f32 %v7309_v48, %v800_v30  ;;  %v7352_v34 = vrot.slane %v3806_v33, 7  ;;  %v1639_v33 = vand.u32 15, %v1019_v23 }
 0x136   : > { %v2928_v19 = vsel %vm9859_vm10, %v2923_v21, %v7348_v49  ;;  %vm2287_vm14 = vcmp.ne.s32.totalorder %v2283_v0, %v6694_v4 }
 0x137   : > { %v905_v37 = vadd.f32 %v7324_v22, %v865_v26  ;;  %v7363_v15 = vpop.f32.mrf.mxu1  ;;  %v3811_v56 = vor.u32 %v3809_v27, %v7352_v34  ;;  %v3678_v30 = vshrl.u32 %v2928_v19, 16  ;;  %v3681_v26 = vshll.u32 %v2928_v19, 16  ;;  %vm7401_vm3 = vmpackc.low %vm2287_vm14, %vm2286_vm11 }
 0x138   : > { %10046 = vst [vmem:[#allocation19_spill] sm:$0xff] %v7363_v15  ;;  %v1341_v27 = vsel %vm6636_vm4, 0, %v976_v6  ;;  %vm7378_vm6 = vcmp.eq.s32.totalorder %v1639_v33, 0  ;;  %v2176_v6 = vshrl.u32 %v7273_v2, 16  ;;  %v2180_v19 = vshll.u32 %v7368_v59, 16 }
 0x139   : > { %v941_v21 = vmax.f32 %v905_v37, 0.0  ;;  %v3812_v62 = vsel %vm9862_vm7, %v7251_v8, %v3811_v56  ;;  %v7372_v45 = vrot.slane %v3678_v30, 7  ;;  %v3326_v8 = vsel %vm9862_vm7, %v3318_v17, %v3325_v29  ;;  %vm2003_vm2 = vmpackc.low %vm7378_vm6, %vm7378_vm6  ;;  %v6374_v30 = vld [vmem:[%s9837_s7 + $0xb8] sm:$0xff] }
 0x13a   : > { %v802_v1 = vpop.f32.mrf.mxu0  ;;  %4867 = vmatmul.bf16.gmra.mxu1 %v3812_v62  ;;  %v1413_v54 = vunpack.c.l.b16 %v1341_v27  ;;  %v10050_v56 = vmov 0  ;;  %v2178_v40 = vor.u32 %v2176_v6, %v7336_v9  ;;  %v7412_v0 = vrot.slane %v2180_v19, 1  ;;  %4997 = vmatpush.bf16.msrb.mxu3 %v6374_v30 }
 0x13b   : > { %v977_v15 = vpack.c.bf16 %v941_v21, %v941_v21  ;;  %v803_v3 = vadd.f32 %v7287_v39, %v802_v1  ;;  %v3683_v50 = vor.u32 %v3681_v26, %v7372_v45  ;;  %v10051_v56 = vsel %vm7401_vm3, 4294967295, %v10050_v56 }
 0x13c   : > { %10052 = vst [vmem:[#allocation21_spill] sm:$0xff] %v10051_v56  ;;  %v2881_v33 = vshrl.u32 %v6836_v5, 16  ;;  %v10054_v21 = vmov 0   ;;  %v2183_v30 = vsel %vm9859_vm10, %v2178_v40, %v7412_v0 }
 0x13d   : > { %v1342_v62 = vsel %vm6636_vm4, 0, %v977_v15  ;;  %v866_v38 = vmul.f32 %v7309_v48, %v803_v3  ;;  %4916 = vmatmul.bf16.vlgmr.msrb.gmra.mxu0 %v3326_v8  ;;  %v7391_v1 = vsel %vm9862_vm7, %v7277_v58, %v3683_v50  ;;  %v2885_v58 = vshll.u32 %v6918_v32, 16 }
 0x13e   : > { %10049 = vst [vmem:[#allocation20_spill] sm:$0xff] %v7391_v1  ;;  %v1414_v37 = vunpack.c.l.b16 %v1342_v62  ;;  %4951 = vmatmul.bf16.vlgmr.msra.gmra.mxu2 %v7391_v1  ;;  %v2035_v26 = vsel %vm2003_vm2, 65537, %v10054_v21  ;;  %v2929_v50 = vshrl.u32 %v7333_v7, 16  ;;  %v2883_v6 = vor.u32 %v2881_v33, %v6901_v10 }
 0x13f   : > { %v906_v2 = vadd.f32 %v7324_v22, %v866_v38  ;;  %v7399_v15 = vpop.f32.mrf.mxu1  ;;  %v7423_v62 = vrot.slane %v2885_v58, 1 }
 0x140   : > { %v7406_v29 = vpack.c.b16 %v1414_v37, %v1413_v54  ;;  %v2931_v38 = vor.u32 %v2929_v50, %v7348_v49  ;;  %v2067_v54 = vunpack.c.l.b16 %v2035_v26  ;;  %v1021_v37 = vadd.s32 208, %v6622_v16 }
 0x141   : > { %v942_v27 = vmax.f32 %v906_v2, 0.0 }
 0x142   : > { %10053 = vst [vmem:[#allocation22_spill] sm:$0xff] %v7406_v29  ;;  %v804_v17 = vpop.f32.mrf.mxu0  ;;  %v2340_v3 = vsel %vm7401_vm3, 0, %v7406_v29  ;;  %v2933_v23 = vshll.u32 %v7406_v29, 16  ;;  %v1653_v40 = vand.u32 15, %v1021_v37 }
 0x143   : > { %v805_v8 = vadd.f32 %v7287_v39, %v804_v17  ;;  %v3862_v9 = vshrl.u32 %v2340_v3, 16  ;;  %v3865_v56 = vshll.u32 %v2340_v3, 16  ;;  %v978_v17 = vpack.c.bf16 %v942_v27, %v942_v27 }
 0x144   : > { %v7426_v19 = vrot.slane %v2933_v23, 1  ;;  %v7442_v23 = vsel %vm9859_vm10, %v2883_v6, %v7423_v62  ;;  %v2290_v3 = vunpack.c.h.b16 %v2183_v30  ;;  %v3419_v6 = vsel %vm9862_vm7, %v7345_v52, %v6985_v36 }
 0x145   : > { %v867_v2 = vmul.f32 %v7309_v48, %v805_v8  ;;  %v7430_v1 = vrot.slane %v3862_v9, 7  ;;  %v2289_v8 = vunpack.c.l.b16 %v2183_v30  ;;  %v7445_v9 = vpack.c.b16 %v6651_v31, %v2067_v54 }
 0x146   : > { %v2936_v58 = vsel %vm9859_vm10, %v2931_v38, %v7426_v19  ;;  %vm7459_vm5 = vcmp.eq.s32.totalorder %v1653_v40, 0  ;;  %vm2294_vm11 = vcmp.ne.s32.totalorder %v2290_v3, %v6694_v4  ;;  %v2184_v36 = vshrl.u32 %v7368_v59, 16 }
 0x147   : > { %v907_v33 = vadd.f32 %v7324_v22, %v867_v2  ;;  %v7437_v49 = vpop.f32.mrf.mxu1  ;;  %v3867_v26 = vor.u32 %v3865_v56, %v7430_v1  ;;  %v3734_v50 = vshrl.u32 %v2936_v58, 16  ;;  %v3737_v10 = vshll.u32 %v2936_v58, 16  ;;  %vm2005_vm14 = vmpackc.low %vm7459_vm5, %vm7459_vm5 }
 0x148   : > { %10055 = vst [vmem:[#allocation23_spill] sm:$0xff] %v7437_v49  ;;  %v1343_v56 = vsel %vm6636_vm4, 0, %v978_v17  ;;  %vm7464_vm6 = vcmp.ne.s32.totalorder %v2289_v8, %v6687_v63  ;;  %v10062_v8 = vmov 0  ;;  %v3395_v40 = vshll.u32 %v7442_v23, 16 }
 0x149   : > { %v943_v27 = vmax.f32 %v907_v33, 0.0  ;;  %v3868_v38 = vsel %vm9862_vm7, %v7352_v34, %v3867_v26  ;;  %v7449_v2 = vrot.slane %v3734_v50, 7  ;;  %v2188_v33 = vshll.u32 %v7445_v9, 16  ;;  %vm7488_vm2 = vmpackc.low %vm2294_vm11, %vm7464_vm6 }
 0x14a   : > { %v807_v49 = vpop.f32.mrf.mxu0  ;;  %4872 = vmatmul.bf16.vlgmr.msra.gmra.mxu3 %v3868_v38  ;;  %5094 = vmatmul.bf16.vlgmr.msrb.gmra.mxu1 %v6814_v60  ;;  %v3392_v60 = vshrl.u32 %v7442_v23, 16  ;;  %v10063_v8 = vsel %vm7488_vm2, 4294967295, %v10062_v8  ;;  %v6373_v38 = vld [vmem:[%s9837_s7 + $0xb0] sm:$0xff]  ;;  %v2037_v23 = vsel %vm2005_vm14, 65537, %v10054_v21 }
 0x14b   : > { %v979_v54 = vpack.c.bf16 %v943_v27, %v943_v27  ;;  %v808_v37 = vadd.f32 %v7287_v39, %v807_v49  ;;  %v3739_v30 = vor.u32 %v3737_v10, %v7449_v2  ;;  %v1415_v49 = vunpack.c.l.b16 %v1343_v56  ;;  %10064 = vst [vmem:[#allocation26_spill] sm:$0xff] %v10063_v8  ;;  %v6388_v27 = vld [vmem:[%s9837_s7 + $0x128] sm:$0xff]  ;;  %4998 = vmatpush.bf16.msrb.mxu3 %v6373_v38 }
 0x14c   : > { %v2889_v56 = vshrl.u32 %v6918_v32, 16  ;;  %5177 = vmatpush.bf16.msrb.mxu2 %v6388_v27  ;;  %v1023_v8 = vadd.s32 224, %v6622_v16 }
 0x14d   : > { %v1344_v52 = vsel %vm6636_vm4, 0, %v979_v54  ;;  %v868_v10 = vmul.f32 %v7309_v48, %v808_v37  ;;  %4921 = vmatmul.bf16.gmra.mxu0 %v3419_v6  ;;  %v7476_v58 = vsel %vm9862_vm7, %v7372_v45, %v3739_v30  ;;  %v2893_v45 = vshll.u32 %v6996_v57, 16 }
 0x14e   : > { %10060 = vst [vmem:[#allocation24_spill] sm:$0xff] %v7476_v58  ;;  %v1416_v26 = vunpack.c.l.b16 %v1344_v52  ;;  %4956 = vmatmul.bf16.gmra.mxu2 %v7476_v58  ;;  %v996_v6 = vadd.s32 8, %v6622_v16  ;;  %v7504_v54 = vrot.slane %v3392_v60, 7  ;;  %v2186_v37 = vor.u32 %v2184_v36, %v7412_v0 }
 0x14f   : > { %v908_v59 = vadd.f32 %v7324_v22, %v868_v10  ;;  %v7484_v50 = vpop.f32.mrf.mxu1  ;;  %v7507_v30 = vrot.slane %v2188_v33, 1  ;;  %v2937_v10 = vshrl.u32 %v7406_v29, 16  ;;  %v2891_v0 = vor.u32 %v2889_v56, %v7423_v62 }
 0x150   : > { %10061 = vst [vmem:[#allocation25_spill] sm:$0xff] %v7484_v50  ;;  %v7493_v3 = vpack.c.b16 %v1416_v26, %v1415_v49  ;;  %v7517_v36 = vrot.slane %v2893_v45, 1  ;;  %v2069_v58 = vunpack.c.l.b16 %v2037_v23  ;;  %v7529_v62 = vor.u32 %v3395_v40, %v7504_v54 }
 0x151   : > { %v944_v34 = vmax.f32 %v908_v59, 0.0  ;;  %v2939_v33 = vor.u32 %v2937_v10, %v7426_v19  ;;  %v2191_v38 = vsel %vm9859_vm10, %v2186_v37, %v7507_v30  ;;  %v1478_v45 = vand.u32 15, %v996_v6 }
 0x152   : > { %v809_v17 = vpop.f32.mrf.mxu0  ;;  %v2341_v52 = vsel %vm7488_vm2, 0, %v7493_v3  ;;  %v2941_v49 = vshll.u32 %v7493_v3, 16  ;;  %10065 = vst [vmem:[#allocation27_spill] sm:$0xff] %v7529_v62  ;;  %v2296_v37 = vunpack.c.l.b16 %v2191_v38  ;;  %v7542_v40 = vpack.c.b16 %v6651_v31, %v2069_v58 }
 0x153   : > { %v810_v60 = vadd.f32 %v7287_v39, %v809_v17  ;;  %v3918_v26 = vshrl.u32 %v2341_v52, 16  ;;  %v3921_v27 = vshll.u32 %v2341_v52, 16  ;;  %v980_v17 = vpack.c.bf16 %v944_v34, %v944_v34 }
 0x154   : > { %v7520_v59 = vrot.slane %v2941_v49, 1  ;;  %v7539_v52 = vsel %vm9859_vm10, %v2891_v0, %v7517_v36  ;;  %v2297_v34 = vunpack.c.h.b16 %v2191_v38  ;;  %v7554_v58 = vsel %vm9862_vm7, %v6957_v14, %v7529_v62  ;;  %v6387_v0 = vld [vmem:[%s9837_s7 + $0x120] sm:$0xff] }
 0x155   : > { %v869_v50 = vmul.f32 %v7309_v48, %v810_v60  ;;  %v7524_v32 = vrot.slane %v3918_v26, 7  ;;  %v1667_v60 = vand.u32 15, %v1023_v8  ;;  %10067 = vst [vmem:[#allocation29_spill] sm:$0xff] %v7554_v58  ;;  %v998_v8 = vadd.s32 24, %v6622_v16  ;;  %5178 = vmatpush.bf16.msrb.mxu2 %v6387_v0 }
 0x156   : > { %v2944_v19 = vsel %vm9859_vm10, %v2939_v33, %v7520_v59  ;;  %vm7557_vm5 = vcmp.eq.s32.totalorder %v1478_v45, 15  ;;  %vm7568_vm11 = vcmp.ne.s32.totalorder %v2296_v37, %v6687_v63  ;;  %vm7573_vm14 = vcmp.ne.s32.totalorder %v2297_v34, %v6694_v4 }
 0x157   : > { %v909_v56 = vadd.f32 %v7324_v22, %v869_v50  ;;  %v7534_v23 = vpop.f32.mrf.mxu1  ;;  %v3923_v10 = vor.u32 %v3921_v27, %v7524_v32  ;;  %v3790_v49 = vshrl.u32 %v2944_v19, 16  ;;  %v3793_v33 = vshll.u32 %v2944_v19, 16  ;;  %vm2412_vm10 = vmpackc.low %vm7557_vm5, %vm7557_vm5 }
 0x158   : > { %10066 = vst [vmem:[#allocation28_spill] sm:$0xff] %v7534_v23  ;;  %v1345_v27 = vsel %vm6636_vm4, 0, %v980_v17  ;;  %vm7563_vm6 = vcmp.eq.s32.totalorder %v1667_v60, 0  ;;  %v3454_v45 = vshrl.u32 %v7539_v52, 16  ;;  %v2196_v37 = vshll.u32 %v7542_v40, 16 }
 0x159   : > { %v945_v26 = vmax.f32 %v909_v56, 0.0  ;;  %v3924_v6 = vsel %vm9862_vm7, %v7430_v1, %v3923_v10  ;;  %v7546_v50 = vrot.slane %v3790_v49, 7  ;;  %v2192_v56 = vshrl.u32 %v7445_v9, 16  ;;  %vm2007_vm2 = vmpackc.low %vm7563_vm6, %vm7563_vm6 }
 0x15a   : > { %v812_v23 = vpop.f32.mrf.mxu0  ;;  %4877 = vmatmul.bf16.gmra.mxu3 %v3924_v6  ;;  %5099 = vmatmul.bf16.gmra.mxu1 %v6879_v47  ;;  %v1417_v34 = vunpack.c.l.b16 %v1345_v27  ;;  %v1492_v6 = vand.u32 15, %v998_v8  ;;  %v6372_v27 = vld [vmem:[%s9837_s7 + $0xa8] sm:$0xff]  ;;  %v7620_v19 = vrot.slane %v2196_v37, 1  ;;  %v2039_v8 = vsel %vm2007_vm2, 65537, %v10054_v21 }
 0x15b   : > { %v981_v1 = vpack.c.bf16 %v945_v26, %v945_v26  ;;  %v813_v38 = vadd.f32 %v7287_v39, %v812_v23  ;;  %v3795_v17 = vor.u32 %v3793_v33, %v7546_v50  ;;  %4999 = vmatpush.bf16.msrb.mxu3 %v6372_v27  ;;  %v1025_v62 = vadd.s32 240, %v6622_v16 }
 0x15c   : > { %vm10083_vm2 = vsmask.f32 7424  ;;  %vm10086_vm6 = vsmask.f32 256 }
 0x15d   : > { %v1346_v23 = vsel %vm6636_vm4, 0, %v981_v1  ;;  %v870_v10 = vmul.f32 %v7309_v48, %v813_v38  ;;  %4926 = vmatmul.bf16.gmra.mxu0 %v7554_v58  ;;  %v7585_v49 = vsel %vm9862_vm7, %v7449_v2, %v3795_v17  ;;  %vm7602_vm7 = vmpackc.low %vm7573_vm14, %vm7568_vm11  ;;  %v10078_v2 = vmov 0 }
 0x15e   : > { %10076 = vst [vmem:[#allocation30_spill] sm:$0xff] %v7585_v49  ;;  %v1418_v60 = vunpack.c.l.b16 %v1346_v23  ;;  %4961 = vmatmul.bf16.gmra.mxu2 %v7585_v49  ;;  %v10079_v2 = vsel %vm7602_vm7, 4294967295, %v10078_v2  ;;  %v7615_v1 = vsel %vm2412_vm10, 65537, %v10054_v21  ;;  %v7617_v38 = vrot.slane %v3454_v45, 7  ;;  %vm10084_vm5 = vmmov %vm10083_vm2 }
 0x15f   : > { %v910_v9 = vadd.f32 %v7324_v22, %v870_v10  ;;  %v7596_v26 = vpop.f32.mrf.mxu1  ;;  %10080 = vst [vmem:[#allocation32_spill] sm:$0xff] %v10079_v2  ;;  %v2194_v17 = vor.u32 %v2192_v56, %v7507_v30  ;;  %v2945_v10 = vshrl.u32 %v7493_v3, 16  ;;  %v3457_v30 = vshll.u32 %v7539_v52, 16  ;;  %vm10087_vm11 = vmmov %vm10086_vm6  ;;  %v6371_v56 = vld [vmem:[%s9837_s7 + $0xa0] sm:$0xff] }
 0x160   : > { %10077 = vst [vmem:[#allocation31_spill] sm:$0xff] %v7596_v26  ;;  %v7606_v33 = vpack.c.b16 %v1418_v60, %v1417_v34  ;;  %vm7630_vm10 = vcmp.eq.s32.totalorder %v1492_v6, 15  ;;  %v2071_v49 = vunpack.c.l.b16 %v2039_v8  ;;  %5000 = vmatpush.bf16.msrb.mxu3 %v6371_v56 }
 0x161   : > { %v946_v47 = vmax.f32 %v910_v9, 0.0  ;;  %v2947_v37 = vor.u32 %v2945_v10, %v7520_v59  ;;  %v3459_v6 = vor.u32 %v3457_v30, %v7617_v38  ;;  %v2798_v59 = vsel %vm6910_vm13, 0, %v6996_v57 }
 0x162   : > { %v814_v14 = vpop.f32.mrf.mxu0  ;;  %v2342_v23 = vsel %vm7602_vm7, 0, %v7606_v33  ;;  %v2949_v34 = vshll.u32 %v7606_v33, 16  ;;  %v1681_v30 = vand.u32 15, %v1025_v62  ;;  %vm10098_vm7 = vmpackc.low %vm7630_vm10, %vm7630_vm10  ;;  %vm10105_vm10 = vsmask.f32 256 }
 0x163   : > { %v815_v45 = vadd.f32 %v7287_v39, %v814_v14  ;;  %v3974_v60 = vshrl.u32 %v2342_v23, 16  ;;  %v3977_v0 = vshll.u32 %v2342_v23, 16  ;;  %v2199_v14 = vsel %vm10083_vm2, %v2194_v17, %v7620_v19 }
 0x164   : > { %v7635_v9 = vrot.slane %v2949_v34, 1  ;;  %v982_v52 = vpack.c.bf16 %v946_v47, %v946_v47  ;;  %v2303_v17 = vunpack.c.l.b16 %v2199_v14  ;;  %v2304_v47 = vunpack.c.h.b16 %v2199_v14 }
 0x165   : > { %v871_v2 = vmul.f32 %v7309_v48, %v815_v45  ;;  %v7639_v27 = vrot.slane %v3974_v60, 7  ;;  %v2897_v45 = vshrl.u32 %v6996_v57, 16  ;;  %v7655_v60 = vpack.c.b16 %v6651_v31, %v2071_v49 }
 0x166   : > { %v2952_v26 = vsel %vm10084_vm5, %v2947_v37, %v7635_v9  ;;  %v7666_v14 = vsel %vm10087_vm11, %v7504_v54, %v3459_v6  ;;  %v3542_v49 = vshrl.u32 %v2798_v59, 16  ;;  %vm7671_vm14 = vcmp.eq.s32.totalorder %v1681_v30, 0  ;;  %vm10095_vm11 = vmmov %vm10083_vm2 }
 0x167   : > { %v911_v8 = vadd.f32 %v7324_v22, %v871_v2  ;;  %v7650_v10 = vpop.f32.mrf.mxu1  ;;  %v3979_v34 = vor.u32 %v3977_v0, %v7639_v27  ;;  %v3846_v23 = vshrl.u32 %v2952_v26, 16  ;;  %v3849_v2 = vshll.u32 %v2952_v26, 16  ;;  %10088 = vst [vmem:[#allocation34_spill] sm:$0xff] %v7666_v14 }
 0x168   : > { %10085 = vst [vmem:[#allocation33_spill] sm:$0xff] %v7650_v10  ;;  %v1347_v10 = vsel %vm6636_vm4, 0, %v982_v52  ;;  %v2899_v62 = vor.u32 %v2897_v45, %v7517_v36  ;;  %vm7679_vm5 = vcmp.ne.s32.totalorder %v2303_v17, %v6687_v63  ;;  %vm10096_vm2 = vsmask.f32 256 }
 0x169   : > { %v947_v37 = vmax.f32 %v911_v8, 0.0  ;;  %v3980_v58 = vsel %vm10086_vm6, %v7524_v32, %v3979_v34  ;;  %v7659_v20 = vrot.slane %v3846_v23, 7  ;;  %vm7684_vm6 = vcmp.ne.s32.totalorder %v2304_v47, %v6694_v4 }
 0x16a   : > { %v817_v0 = vpop.f32.mrf.mxu0  ;;  %4882 = vmatmul.bf16.gmra.mxu3 %v3980_v58  ;;  %5104 = vmatmul.bf16.gmra.mxu1 %v6966_v11  ;;  %v2904_v36 = vsel %vm10095_vm11, %v2899_v62, %v7200_v55  ;;  %v2200_v58 = vshrl.u32 %v7542_v40, 16  ;;  %v2204_v45 = vshll.u32 %v7655_v60, 16  ;;  %v1419_v17 = vunpack.c.l.b16 %v1347_v10  ;;  %vm2009_vm11 = vmpackc.low %vm7671_vm14, %vm7671_vm14 }
 0x16b   : > { %v983_v8 = vpack.c.bf16 %v947_v37, %v947_v37  ;;  %v818_v32 = vadd.f32 %v7287_v39, %v817_v0  ;;  %v3851_v34 = vor.u32 %v3849_v2, %v7659_v20  ;;  %v7701_v55 = vrot.slane %v3542_v49, 7  ;;  %v6386_v49 = vld [vmem:[%s9837_s7 + $0x118] sm:$0xff] }
 0x16c   : > { %v7712_v40 = vsel %vm10098_vm7, 65537, %v10054_v21  ;;  %v10100_v30 = vmov 0  ;;  %v3545_v2 = vshll.u32 %v2798_v59, 16  ;;  %v3510_v0 = vshrl.u32 %v2904_v36, 16  ;;  %5179 = vmatpush.bf16.msrb.mxu2 %v6386_v49 }
 0x16d   : > { %v1348_v52 = vsel %vm6636_vm4, 0, %v983_v8  ;;  %v872_v6 = vmul.f32 %v7309_v48, %v818_v32  ;;  %4931 = vmatmul.bf16.gmra.mxu0 %v7666_v14  ;;  %v7697_v23 = vsel %vm10096_vm2, %v7546_v50, %v3851_v34  ;;  %vm7721_vm2 = vmpackc.low %vm7684_vm6, %vm7679_vm5  ;;  %v2476_v62 = vunpack.c.l.b16 %v7615_v1  ;;  %v6406_v1 = vld [vmem:[%s9837_s7 + $0x1b8] sm:$0xff] }
 0x16e   : > { %10097 = vst [vmem:[#allocation35_spill] sm:$0xff] %v7697_v23  ;;  %v1420_v47 = vunpack.c.l.b16 %v1348_v52  ;;  %4966 = vmatmul.bf16.gmra.mxu2 %v7697_v23  ;;  %v10101_v30 = vsel %vm7721_vm2, 4294967295, %v10100_v30  ;;  %v2202_v8 = vor.u32 %v2200_v58, %v7620_v19  ;;  %v7735_v32 = vrot.slane %v2204_v45, 1  ;;  %5353 = vmatpush.bf16.msra.mxu0 %v6406_v1  ;;  %vm10108_vm5 = vmmov %vm10105_vm10 }
 0x16f   : > { %v912_v50 = vadd.f32 %v7324_v22, %v872_v6  ;;  %v7715_v10 = vpop.f32.mrf.mxu1  ;;  %10102 = vst [vmem:[#allocation37_spill] sm:$0xff] %v10101_v30  ;;  %v2041_v34 = vsel %vm2009_vm11, 65537, %v10054_v21  ;;  %v2478_v26 = vunpack.c.l.b16 %v7712_v40  ;;  %v3547_v54 = vor.u32 %v3545_v2, %v7701_v55  ;;  %vm10109_vm6 = vmmov %vm10108_vm5 }
 0x170   : > { %10099 = vst [vmem:[#allocation36_spill] sm:$0xff] %v7715_v10  ;;  %v7725_v37 = vpack.c.b16 %v1420_v47, %v1419_v17  ;;  %v2953_v52 = vshrl.u32 %v7606_v33, 16  ;;  %v7750_v17 = vadd.s32 40, %v6622_v16  ;;  %v7752_v47 = vrot.slane %v3510_v0, 7 }
 0x171   : > { %v948_v19 = vmax.f32 %v912_v50, 0.0  ;;  %v2073_v56 = vunpack.c.l.b16 %v2041_v34  ;;  %vm10104_vm7 = vsmask.f32 7424  ;;  %v3513_v10 = vshll.u32 %v2904_v36, 16  ;;  %v6370_v34 = vld [vmem:[%s9837_s7 + $0x98] sm:$0xff] }
 0x172   : > { %10103 = vst [vmem:[#allocation38_spill] sm:$0xff] %v7725_v37  ;;  %v819_v59 = vpop.f32.mrf.mxu0  ;;  %v2343_v11 = vsel %vm7721_vm2, 0, %v7725_v37  ;;  %v2957_v6 = vshll.u32 %v7725_v37, 16  ;;  %v2955_v40 = vor.u32 %v2953_v52, %v7635_v9  ;;  %v2207_v50 = vsel %vm10104_vm7, %v2202_v8, %v7735_v32  ;;  %vm10106_vm14 = vmmov %vm10104_vm7  ;;  %5001 = vmatpush.bf16.msrb.mxu3 %v6370_v34 }
 0x173   : > { %v820_v58 = vadd.f32 %v7287_v39, %v819_v59  ;;  %v4030_v45 = vshrl.u32 %v2343_v11, 16  ;;  %v4033_v30 = vshll.u32 %v2343_v11, 16  ;;  %v3548_v59 = vsel %vm10105_vm10, %v6939_v61, %v3547_v54  ;;  %v6405_v11 = vld [vmem:[%s9837_s7 + $0x1b0] sm:$0xff]  ;;  %vm10115_vm10 = vmmov %vm10108_vm5 }
 0x174   : > { %v7755_v2 = vrot.slane %v2957_v6, 1  ;;  %v2799_v9 = vsel %vm6990_vm9, 0, %v7055_v25  ;;  %v984_v8 = vpack.c.bf16 %v948_v19, %v948_v19  ;;  %v3515_v6 = vor.u32 %v3513_v10, %v7752_v47  ;;  %5354 = vmatpush.bf16.msra.mxu0 %v6405_v11  ;;  %v6404_v10 = vld [vmem:[%s9837_s7 + $0x1a8] sm:$0xff] }
 0x175   : > { %v873_v49 = vmul.f32 %v7309_v48, %v820_v58  ;;  %v7758_v23 = vrot.slane %v4030_v45, 7  ;;  %v2310_v1 = vunpack.c.l.b16 %v2207_v50  ;;  %v2311_v58 = vunpack.c.h.b16 %v2207_v50 }
 0x176   : > { %v2960_v0 = vsel %vm10106_vm14, %v2955_v40, %v7755_v2  ;;  %v7781_v45 = vpack.c.b16 %v6651_v31, %v2073_v56  ;;  %v7791_v50 = vpack.c.b16 %v2476_v62, %v6651_v31  ;;  %v7794_v56 = vpack.c.b16 %v2478_v26, %v6651_v31 }
 0x177   : > { %v913_v52 = vadd.f32 %v7324_v22, %v873_v49  ;;  %v7776_v61 = vpop.f32.mrf.mxu1  ;;  %v4035_v36 = vor.u32 %v4033_v30, %v7758_v23  ;;  %v3902_v54 = vshrl.u32 %v2960_v0, 16  ;;  %v3905_v49 = vshll.u32 %v2960_v0, 16 }
 0x178   : > { %10107 = vst [vmem:[#allocation39_spill] sm:$0xff] %v7776_v61  ;;  %v3598_v30 = vshrl.u32 %v2799_v9, 16  ;;  %v1506_v34 = vand.u32 15, %v7750_v17  ;;  %vm7806_vm11 = vcmp.ne.s32.totalorder %v2310_v1, %v6687_v63  ;;  %vm7811_vm7 = vcmp.ne.s32.totalorder %v2311_v58, %v6694_v4  ;;  %5355 = vmatpush.bf16.msra.mxu0 %v6404_v10  ;;  %v6385_v10 = vld [vmem:[%s9837_s7 + $0x110] sm:$0xff] }
 0x179   : > { %v949_v40 = vmax.f32 %v913_v52, 0.0  ;;  %v4036_v19 = vsel %vm10108_vm5, %v7639_v27, %v4035_v36  ;;  %v7785_v14 = vrot.slane %v3902_v54, 7  ;;  %v1349_v27 = vsel %vm6636_vm4, 0, %v984_v8  ;;  %vm7838_vm14 = vmpackc.low %vm7811_vm7, %vm7806_vm11  ;;  %5180 = vmatpush.bf16.msrb.mxu2 %v6385_v10 }
 0x17a   : > { %v822_v61 = vpop.f32.mrf.mxu0  ;;  %4887 = vmatmul.bf16.gmra.mxu3 %v4036_v19  ;;  %5109 = vmatmul.bf16.gmra.mxu1 %v3548_v59  ;;  %v7803_v52 = vsel %vm10109_vm6, %v7617_v38, %v3515_v6  ;;  %v2208_v17 = vshrl.u32 %v7655_v60, 16  ;;  %v2212_v36 = vshll.u32 %v7781_v45, 16  ;;  %v1421_v54 = vunpack.c.l.b16 %v1349_v27  ;;  %v6403_v60 = vld [vmem:[%s9837_s7 + $0x1a0] sm:$0xff]  ;;  %vm10124_vm7 = vmmov %vm10115_vm10 }
 0x17b   : > { %v985_v0 = vpack.c.bf16 %v949_v40, %v949_v40  ;;  %v823_v11 = vadd.f32 %v7287_v39, %v822_v61  ;;  %v3907_v59 = vor.u32 %v3905_v49, %v7785_v14  ;;  %10110 = vst [vmem:[#allocation40_spill] sm:$0xff] %v7803_v52  ;;  %v7826_v1 = vrot.slane %v3598_v30, 7 }
 0x17c   : > { %v2525_v19 = vshrl.u32 %v7791_v50, 16  ;;  %v3601_v30 = vshll.u32 %v2799_v9, 16  ;;  %5356 = vmatpush.bf16.msra.mxu0 %v6403_v60  ;;  %v2532_v27 = vshrl.u32 %v7794_v56, 16  ;;  %vm7849_vm5 = vcmp.eq.s32.totalorder %v1506_v34, 15 }
 0x17d   : > { %v1350_v8 = vsel %vm6636_vm4, 0, %v985_v0  ;;  %v874_v61 = vmul.f32 %v7309_v48, %v823_v11  ;;  %4936 = vmatmul.bf16.gmra.mxu0 %v7803_v52  ;;  %v7822_v38 = vsel %vm10115_vm10, %v7659_v20, %v3907_v59  ;;  %v10118_v20 = vmov 0  ;;  %vm2416_vm6 = vmpackc.low %vm7849_vm5, %vm7849_vm5 }
 0x17e   : > { %10116 = vst [vmem:[#allocation41_spill] sm:$0xff] %v7822_v38  ;;  %v1422_v6 = vunpack.c.l.b16 %v1350_v8  ;;  %4971 = vmatmul.bf16.gmra.mxu2 %v7822_v38  ;;  %v10119_v20 = vsel %vm7838_vm14, 4294967295, %v10118_v20  ;;  %v2210_v11 = vor.u32 %v2208_v17, %v7735_v32  ;;  %v7854_v59 = vrot.slane %v2212_v36, 1  ;;  %v6402_v32 = vld [vmem:[%s9837_s7 + $0x198] sm:$0xff]  ;;  %vm10127_vm5 = vmmov %vm10124_vm7 }
 0x17f   : > { %v914_v58 = vadd.f32 %v7324_v22, %v874_v61  ;;  %v7832_v40 = vpop.f32.mrf.mxu1  ;;  %10120 = vst [vmem:[#allocation43_spill] sm:$0xff] %v10119_v20  ;;  %v2528_v62 = vshll.u32 %v7791_v50, 16  ;;  %v3603_v8 = vor.u32 %v3601_v30, %v7826_v1  ;;  %v2961_v61 = vshrl.u32 %v7725_v37, 16 }
 0x180   : > { %10117 = vst [vmem:[#allocation42_spill] sm:$0xff] %v7832_v40  ;;  %v7843_v49 = vpack.c.b16 %v1422_v6, %v1421_v54  ;;  %v2527_v54 = vrot.slane %v2525_v19, 7  ;;  %5357 = vmatpush.bf16.msra.mxu0 %v6402_v32  ;;  %v7873_v30 = vrot.slane %v2532_v27, 7  ;;  %v2535_v10 = vshll.u32 %v7794_v56, 16  ;;  %v6369_v56 = vld [vmem:[%s9837_s7 + $0x90] sm:$0xff] }
 0x181   : > { %v950_v17 = vmax.f32 %v914_v58, 0.0  ;;  %v2963_v6 = vor.u32 %v2961_v61, %v7755_v2  ;;  %vm10123_vm11 = vsmask.f32 7424  ;;  %v3604_v0 = vsel %vm10124_vm7, %v7701_v55, %v3603_v8  ;;  %v6401_v27 = vld [vmem:[%s9837_s7 + $0x190] sm:$0xff]  ;;  %5002 = vmatpush.bf16.msrb.mxu3 %v6369_v56 }
 0x182   : > { %v824_v26 = vpop.f32.mrf.mxu0  ;;  %v2344_v9 = vsel %vm7838_vm14, 0, %v7843_v49  ;;  %v2965_v34 = vshll.u32 %v7843_v49, 16  ;;  %v2215_v19 = vsel %vm10123_vm11, %v2210_v11, %v7854_v59  ;;  %v3569_v2 = vshll.u32 %v7245_v41, 16  ;;  %vm10125_vm10 = vmmov %vm10123_vm11 }
 0x183   : > { %v825_v36 = vadd.f32 %v7287_v39, %v824_v26  ;;  %v4086_v50 = vshrl.u32 %v2344_v9, 16  ;;  %v4089_v26 = vshll.u32 %v2344_v9, 16  ;;  %v2448_v9 = vsel %vm2416_vm6, 65537, %v10054_v21  ;;  %vm10128_vm6 = vmmov %vm10127_vm5 }
 0x184   : > { %v7871_v60 = vrot.slane %v2965_v34, 1  ;;  %v986_v34 = vpack.c.bf16 %v950_v17, %v950_v17  ;;  %v3571_v8 = vor.u32 %v3569_v2, %v7282_v13  ;;  %5358 = vmatpush.bf16.msra.mxu0 %v6401_v27  ;;  %v6400_v13 = vld [vmem:[%s9837_s7 + $0x188] sm:$0xff]  ;;  %v2480_v2 = vunpack.c.l.b16 %v2448_v9 }
 0x185   : > { %v875_v38 = vmul.f32 %v7309_v48, %v825_v36  ;;  %v7877_v58 = vrot.slane %v4086_v50, 7  ;;  %v2317_v36 = vunpack.c.l.b16 %v2215_v19  ;;  %v2318_v50 = vunpack.c.h.b16 %v2215_v19 }
 0x186   : > { %v2968_v61 = vsel %vm10125_vm10, %v2963_v6, %v7871_v60  ;;  %v2800_v6 = vsel %vm7049_vm15, 0, %v7135_v44  ;;  %v2537_v19 = vor.u32 %v2535_v10, %v7873_v30  ;;  %v1351_v56 = vsel %vm6636_vm4, 0, %v986_v34  ;;  %vm10133_vm10 = vmmov %vm10127_vm5 }
 0x187   : > { %v915_v11 = vadd.f32 %v7324_v22, %v875_v38  ;;  %v7894_v32 = vpop.f32.mrf.mxu1  ;;  %v4091_v41 = vor.u32 %v4089_v26, %v7877_v58  ;;  %v3958_v55 = vshrl.u32 %v2968_v61, 16  ;;  %v7908_v26 = vor.u32 %v2528_v62, %v2527_v54 }
 0x188   : > { %10126 = vst [vmem:[#allocation44_spill] sm:$0xff] %v7894_v32  ;;  %v3961_v32 = vshll.u32 %v2968_v61, 16  ;;  %vm7920_vm11 = vcmp.ne.s32.totalorder %v2317_v36, %v6687_v63  ;;  %vm7925_vm7 = vcmp.ne.s32.totalorder %v2318_v50, %v6694_v4  ;;  %v3654_v10 = vshrl.u32 %v2800_v6, 16  ;;  %5359 = vmatpush.bf16.msra.mxu0 %v6400_v13 }
 0x189   : > { %v951_v20 = vmax.f32 %v915_v11, 0.0  ;;  %v4092_v17 = vsel %vm10127_vm5, %v7758_v23, %v4091_v41  ;;  %v7903_v38 = vrot.slane %v3958_v55, 7  ;;  %v1002_v9 = vadd.s32 56, %v6622_v16  ;;  %v6399_v41 = vld [vmem:[%s9837_s7 + $0x180] sm:$0xff] }
 0x18a   : > { %v827_v40 = vpop.f32.mrf.mxu0  ;;  %4892 = vmatmul.bf16.gmra.mxu3 %v4092_v17  ;;  %5114 = vmatmul.bf16.gmra.mxu1 %v3604_v0  ;;  %v7917_v0 = vsel %vm10128_vm6, %v7752_v47, %v3571_v8  ;;  %v1423_v34 = vunpack.c.l.b16 %v1351_v56  ;;  %v2538_v55 = vsel %vm10127_vm5, %v2527_v54, %v2537_v19  ;;  %vm7950_vm6 = vmpackc.low %vm7925_vm7, %vm7920_vm11  ;;  %v7956_v17 = vrot.slane %v3654_v10, 7 }
 0x18b   : > { %v987_v27 = vpack.c.bf16 %v951_v20, %v951_v20  ;;  %v828_v23 = vadd.f32 %v7287_v39, %v827_v40  ;;  %v3963_v61 = vor.u32 %v3961_v32, %v7903_v38  ;;  %v2216_v13 = vshrl.u32 %v7781_v45, 16 }
 0x18c   : > { %5360 = vmatpush.bf16.msra.mxu0 %v6399_v41  ;;  %v2651_v54 = vunpack.c.l.b16 %v7908_v26  ;;  %v2658_v19 = vunpack.c.l.b16 %v2538_v55  ;;  %v2659_v56 = vunpack.c.h.b16 %v2538_v55  ;;  %v3657_v62 = vshll.u32 %v2800_v6, 16 }
 0x18d   : > { %v1352_v40 = vsel %vm6636_vm4, 0, %v987_v27  ;;  %v876_v20 = vmul.f32 %v7309_v48, %v828_v23  ;;  %4941 = vmatmul.bf16.gmra.mxu0 %v7917_v0  ;;  %v7935_v47 = vsel %vm10133_vm10, %v7785_v14, %v3963_v61  ;;  %v10135_v14 = vmov 0 }
 0x18e   : > { %10134 = vst [vmem:[#allocation45_spill] sm:$0xff] %v7935_v47  ;;  %v1424_v32 = vunpack.c.l.b16 %v1352_v40  ;;  %4976 = vmatmul.bf16.gmra.mxu2 %v7935_v47  ;;  %v10136_v14 = vsel %vm7950_vm6, 4294967295, %v10135_v14  ;;  %v7961_v27 = vpack.c.b16 %v2480_v2, %v6651_v31  ;;  %v1520_v23 = vand.u32 15, %v1002_v9 }
 0x18f   : > { %v916_v8 = vadd.f32 %v7324_v22, %v876_v20  ;;  %v7944_v36 = vpop.f32.mrf.mxu1  ;;  %10137 = vst [vmem:[#allocation46_spill] sm:$0xff] %v10136_v14  ;;  %v2969_v10 = vshrl.u32 %v7843_v49, 16  ;;  %v3659_v2 = vor.u32 %v3657_v62, %v7956_v17  ;;  %v2218_v55 = vor.u32 %v2216_v13, %v7854_v59  ;;  %v6368_v59 = vld [vmem:[%s9837_s7 + $0x88] sm:$0xff]  ;;  %v6367_v13 = vld [vmem:[%s9837_s7 + $0x80] sm:$0xff] }
 0x190   : > { %v7954_v50 = vpack.c.b16 %v1424_v32, %v1423_v34  ;;  %v2652_v32 = vunpack.c.h.b16 %v7908_v26  ;;  %vm7979_vm11 = vcmp.ne.s32.totalorder %v2658_v19, %v6687_v63  ;;  %vm10141_vm7 = vsmask.f32 7424  ;;  %5003 = vmatpush.bf16.msrb.mxu3 %v6368_v59 }
 0x191   : > { %v952_v45 = vmax.f32 %v916_v8, 0.0  ;;  %v2971_v9 = vor.u32 %v2969_v10, %v7871_v60  ;;  %v6384_v60 = vld [vmem:[%s9837_s7 + $0x108] sm:$0xff]  ;;  %vm7992_vm10 = vcmp.ne.s32.totalorder %v2659_v56, %v6694_v4  ;;  %v2540_v26 = vshrl.u32 %v7961_v27, 16 }
 0x192   : > { %10138 = vst [vmem:[#allocation47_spill] sm:$0xff] %v7954_v50  ;;  %v829_v61 = vpop.f32.mrf.mxu0  ;;  %v2345_v11 = vsel %vm7950_vm6, 0, %v7954_v50  ;;  %v2973_v40 = vshll.u32 %v7954_v50, 16  ;;  %vm7997_vm5 = vcmp.eq.s32.totalorder %v1520_v23, 15  ;;  %v8010_v23 = vsel %vm7126_vm8, 0, %v7226_v43  ;;  %5181 = vmatpush.bf16.msrb.mxu2 %v6384_v60 }
 0x193   : > { %v830_v20 = vadd.f32 %v7287_v39, %v829_v61  ;;  %v4142_v34 = vshrl.u32 %v2345_v11, 16  ;;  %v4145_v14 = vshll.u32 %v2345_v11, 16  ;;  %v988_v19 = vpack.c.bf16 %v952_v45, %v952_v45 }
 0x194   : > { %v7972_v41 = vrot.slane %v2973_v40, 1  ;;  %v2324_v40 = vunpack.c.l.b16 %v2218_v55  ;;  %vm8020_vm14 = vcmp.ne.s32.totalorder %v2651_v54, %v6687_v63  ;;  %vm8025_vm8 = vcmp.ne.s32.totalorder %v2652_v32, %v6694_v4  ;;  %v8037_v54 = vld [vmem:[%s9834_s4] ss:$0 sm:$0xff]  ;;  %5004 = vmatpush.bf16.msrb.mxu3 %v6367_v13 }
 0x195   : > { %v877_v6 = vmul.f32 %v7309_v48, %v830_v20  ;;  %v7976_v47 = vrot.slane %v4142_v34, 7  ;;  %v2325_v20 = vunpack.c.h.b16 %v2218_v55  ;;  %v2543_v55 = vshll.u32 %v7961_v27, 16 }
 0x196   : > { %v2976_v39 = vsel %vm10141_vm7, %v2971_v9, %v7972_v41  ;;  %vm10146_vm7 = vsmask.f32 256  ;;  %v10152_v59 = vmov 0 }
 0x197   : > { %v917_v61 = vadd.f32 %v7324_v22, %v877_v6  ;;  %v8002_v11 = vpop.f32.mrf.mxu1  ;;  %v4147_v62 = vor.u32 %v4145_v14, %v7976_v47  ;;  %v4014_v10 = vshrl.u32 %v2976_v39, 16  ;;  %v3660_v56 = vsel %vm10146_vm7, %v7826_v1, %v3659_v2  ;;  %vm10147_vm6 = vmmov %vm10146_vm7 }
 0x198   : > { %v4017_v14 = vshll.u32 %v2976_v39, 16  ;;  %v1353_v6 = vsel %vm6636_vm4, 0, %v988_v19  ;;  %vm8050_vm7 = vcmp.ne.s32.totalorder %v2324_v40, %v6687_v63  ;;  %vm8055_vm2 = vcmp.ne.s32.totalorder %v2325_v20, %v6694_v4 }
 0x199   : > { %v953_v45 = vmax.f32 %v917_v61, 0.0  ;;  %v4148_v22 = vsel %vm10147_vm6, %v7877_v58, %v4147_v62  ;;  %v8014_v34 = vrot.slane %v4014_v10, 7  ;;  %v8029_v58 = vrot.slane %v2540_v26, 7  ;;  %vm8045_vm6 = vmpackc.low %vm7992_vm10, %vm7979_vm11  ;;  %v8071_v61 = vld [vmem:[%s9835_s5] ss:$0 sm:$0xff] }
 0x19a   : > { %v832_v1 = vpop.f32.mrf.mxu0  ;;  %4897 = vmatmul.bf16.gmra.mxu3 %v4148_v22  ;;  %5119 = vmatmul.bf16.gmra.mxu1 %v3660_v56  ;;  %v10153_v59 = vsel %vm8045_vm6, 4294967295, %v10152_v59  ;;  %v3710_v19 = vshrl.u32 %v8010_v23, 16  ;;  %vm10159_vm11 = vmpackc.low %vm7997_vm5, %vm7997_vm5  ;;  %vm10160_vm10 = vsmask.f32 256  ;;  %v1004_v56 = vadd.s32 72, %v6622_v16 }
 0x19b   : > { %v989_v39 = vpack.c.bf16 %v953_v45, %v953_v45  ;;  %v833_v60 = vadd.f32 %v8037_v54, %v832_v1  ;;  %v4019_v32 = vor.u32 %v4017_v14, %v8014_v34  ;;  %10154 = vst [vmem:[#allocation48_spill] sm:$0xff] %v10153_v59  ;;  %v2450_v8 = vsel %vm10159_vm11, 65537, %v10054_v21  ;;  %vm8088_vm5 = vmpackc.low %vm8025_vm8, %vm8020_vm14  ;;  %v8098_v22 = vld [vmem:[%s9836_s6] ss:$0 sm:$0xff] }
 0x19c   : > { %v1425_v40 = vunpack.c.l.b16 %v1353_v6  ;;  %v10162_v45 = vmov 0  ;;  %vm8107_vm8 = vmpackc.low %vm8055_vm2, %vm8050_vm7  ;;  %v10166_v2 = vmov 0  ;;  %v2545_v9 = vor.u32 %v2543_v55, %v8029_v58 }
 0x19d   : > { %v1354_v48 = vsel %vm6636_vm4, 0, %v989_v39  ;;  %v878_v62 = vmul.f32 %v8071_v61, %v833_v60  ;;  %4946 = vmatmul.bf16.gmra.mxu0 %v7316_v51  ;;  %v8077_v10 = vsel %vm10160_vm10, %v7903_v38, %v4019_v32  ;;  %v10163_v45 = vsel %vm8088_vm5, 4294967295, %v10162_v45  ;;  %v6383_v32 = vld [vmem:[%s9837_s7 + $0x100] sm:$0xff]  ;;  %vm10170_vm2 = vmmov %vm10160_vm10 }
 0x19e   : > { %10161 = vst [vmem:[#allocation49_spill] sm:$0xff] %v8077_v10  ;;  %v1426_v20 = vunpack.c.l.b16 %v1354_v48  ;;  %4981 = vmatmul.bf16.gmra.mxu2 %v8077_v10  ;;  %v2771_v38 = vsel %vm8045_vm6, 0, %v6783_v12  ;;  %v10167_v2 = vsel %vm8107_vm8, 4294967295, %v10166_v2  ;;  %v2482_v6 = vunpack.c.l.b16 %v2450_v8  ;;  %vm10174_vm10 = vmmov %vm10170_vm2 }
 0x19f   : > { %10164 = vst [vmem:[#allocation50_spill] sm:$0xff] %v10163_v45  ;;  %v918_v14 = vadd.f32 %v8098_v22, %v878_v62  ;;  %v8101_v1 = vpop.f32.mrf.mxu1  ;;  %v8114_v60 = vrot.slane %v3710_v19, 7  ;;  %vm9904_vm14 = vcmask 1046528   ;;  %v2770_v26 = vsel %vm8088_vm5, 0, %v6732_v28  ;;  %5182 = vmatpush.bf16.msrb.mxu2 %v6383_v32 }
 0x1a0   : > { %10165 = vst [vmem:[#allocation51_spill] sm:$0xff] %v8101_v1  ;;  %v8112_v39 = vpack.c.b16 %v1426_v20, %v1425_v40  ;;  %v8122_v48 = vrot.slane %v2771_v38, 1  ;;  %v1534_v62 = vand.u32 15, %v1004_v56  ;;  %v3713_v19 = vshll.u32 %v8010_v23, 16 }
 0x1a1   : > { %10168 = vst [vmem:[#allocation52_spill] sm:$0xff] %v10167_v2  ;;  %v954_v27 = vmax.f32 %v918_v14, 0.0  ;;  %v2977_v8 = vshrl.u32 %v7954_v50, 16  ;;  %v2546_v28 = vsel %vm10170_vm2, %v7873_v30, %v2545_v9  ;;  %v8134_v56 = vpack.c.b16 %v2482_v6, %v6651_v31 }
 0x1a2   : > { %10169 = vst [vmem:[#allocation53_spill] sm:$0xff] %v8112_v39  ;;  %v834_v13 = vpop.f32.mrf.mxu0  ;;  %v2346_v55 = vsel %vm8107_vm8, 0, %v8112_v39  ;;  %v2981_v40 = vshll.u32 %v8112_v39, 16  ;;  %v3715_v45 = vor.u32 %v3713_v19, %v8114_v60  ;;  %v8139_v32 = vrot.slane %v2770_v26, 1 }
 0x1a3   : > { %v835_v20 = vadd.f32 %v8037_v54, %v834_v13  ;;  %v4198_v14 = vshrl.u32 %v2346_v55, 16  ;;  %v990_v38 = vpack.c.bf16 %v954_v27, %v954_v27  ;;  %v2979_v12 = vor.u32 %v2977_v8, %v7972_v41 }
 0x1a4   : > { %v2983_v23 = vrot.slane %v2981_v40, 1  ;;  %v4201_v2 = vshll.u32 %v2346_v55, 16  ;;  %vm10171_vm7 = vsmask.f32 7424  ;;  %v2665_v1 = vunpack.c.l.b16 %v2546_v28 }
 0x1a5   : > { %v879_v59 = vmul.f32 %v8071_v61, %v835_v20  ;;  %v4200_v10 = vrot.slane %v4198_v14, 7  ;;  %v2666_v51 = vunpack.c.h.b16 %v2546_v28  ;;  %vm8142_vm11 = vcmp.eq.s32.totalorder %v1534_v62, 15 }
 0x1a6   : > { %v2984_v13 = vsel %vm10171_vm7, %v2979_v12, %v2983_v23  ;;  %v3008_v55 = vsel %vm9904_vm14, %v8139_v32, %v8122_v48  ;;  %v6398_v12 = vld [vmem:[%s9837_s7 + $0x178] sm:$0xff]  ;;  %v1355_v26 = vsel %vm6636_vm4, 0, %v990_v38  ;;  %v3716_v62 = vsel %vm10174_vm10, %v7956_v17, %v3715_v45  ;;  %vm2420_vm7 = vmpackc.low %vm8142_vm11, %vm8142_vm11 }
 0x1a7   : > { %v919_v9 = vadd.f32 %v8098_v22, %v879_v59  ;;  %v8147_v6 = vpop.f32.mrf.mxu1  ;;  %v4203_v41 = vor.u32 %v4201_v2, %v4200_v10  ;;  %v4070_v27 = vshrl.u32 %v2984_v13, 16  ;;  %v2802_v59 = vsel %vm7212_vm0, 0, %v7333_v7  ;;  %5264 = vmatpush.bf16.msra.mxu3 %v6398_v12  ;;  %vm10180_vm11 = vmmov %vm10170_vm2 }
 0x1a8   : > { %v2548_v10 = vshrl.u32 %v8134_v56, 16  ;;  %v4073_v40 = vshll.u32 %v2984_v13, 16  ;;  %v3332_v17 = vshrl.u32 %v3008_v55, 16  ;;  %vm8171_vm10 = vcmp.ne.s32.totalorder %v2665_v1, %v6687_v63 }
 0x1a9   : > { %v955_v2 = vmax.f32 %v919_v9, 0.0  ;;  %v4204_v19 = vsel %vm10170_vm2, %v7976_v47, %v4203_v41  ;;  %v8165_v8 = vrot.slane %v4070_v27, 7  ;;  %vm8176_vm14 = vcmp.ne.s32.totalorder %v2666_v51, %v6694_v4 }
 0x1aa   : > { %v837_v20 = vpop.f32.mrf.mxu0  ;;  %4902 = vmatmul.bf16.gmra.mxu3 %v4204_v19  ;;  %5124 = vmatmul.bf16.gmra.mxu1 %v3716_v62  ;;  %v2551_v14 = vshll.u32 %v8134_v56, 16  ;;  %v2985_v30 = vshrl.u32 %v8112_v39, 16  ;;  %v1427_v9 = vunpack.c.l.b16 %v1355_v26  ;;  %v3766_v41 = vshrl.u32 %v2802_v59, 16  ;;  %vm8201_vm2 = vmpackc.low %vm8176_vm14, %vm8171_vm10 }
 0x1ab   : > { %10175 = vst [vmem:[#allocation54_spill] sm:$0xff] %v8165_v8  ;;  %v991_v28 = vpack.c.bf16 %v955_v2, %v955_v2  ;;  %v838_v38 = vadd.f32 %v8037_v54, %v837_v20  ;;  %v4075_v13 = vor.u32 %v4073_v40, %v8165_v8  ;;  %v8184_v1 = vrot.slane %v2548_v10, 7 }
 0x1ac   : > { %v2452_v27 = vsel %vm2420_vm7, 65537, %v10054_v21  ;;  %v8195_v62 = vor.u32 %v2985_v30, %v2983_v23  ;;  %v10183_v26 = vmov 0  ;;  %v8206_v10 = vrot.slane %v3332_v17, 7 }
 0x1ad   : > { %v1356_v51 = vsel %vm6636_vm4, 0, %v991_v28  ;;  %v880_v12 = vmul.f32 %v8071_v61, %v838_v38  ;;  %5361 = vmatmul.bf16.vlgmr.msra.gmra.mxu0 %v6925_v42  ;;  %v8193_v56 = vsel %vm10180_vm11, %v8014_v34, %v4075_v13  ;;  %v10184_v26 = vsel %vm8201_vm2, 4294967295, %v10183_v26  ;;  %v6422_v42 = vld [vmem:[%s9837_s7 + $0x238] sm:$0xff]  ;;  %vm10187_vm4 = vmmov %vm10180_vm11 }
 0x1ae   : > { %10181 = vst [vmem:[#allocation55_spill] sm:$0xff] %v8193_v56  ;;  %v1428_v24 = vunpack.c.l.b16 %v1356_v51  ;;  %4986 = vmatmul.bf16.gmra.mxu2 %v8193_v56  ;;  %v3328_v2 = vshrl.u32 %v8139_v32, 16  ;;  %v3335_v19 = vshll.u32 %v3008_v55, 16  ;;  %v2484_v40 = vunpack.c.l.b16 %v2452_v27  ;;  %v6414_v51 = vld [vmem:[%s9837_s7 + $0x1f8] sm:$0xff]  ;;  %vm10188_vm14 = vmmov %vm10187_vm4 }
 0x1af   : > { %10182 = vst [vmem:[#allocation56_spill] sm:$0xff] %v8195_v62  ;;  %v920_v34 = vadd.f32 %v8098_v22, %v880_v12  ;;  %v8212_v23 = vpop.f32.mrf.mxu1  ;;  %v2772_v45 = vsel %vm8201_vm2, 0, %v6836_v5  ;;  %5531 = vmatpush.bf16.msra.mxu2 %v6422_v42  ;;  %v2553_v17 = vor.u32 %v2551_v14, %v8184_v1  ;;  %v1006_v47 = vadd.s32 88, %v6622_v16  ;;  %5442 = vmatpush.bf16.msra.mxu1 %v6414_v51  ;;  %vm10194_vm11 = vmmov %vm10187_vm4 }
 0x1b0   : > { %10185 = vst [vmem:[#allocation57_spill] sm:$0xff] %v10184_v26  ;;  %v8215_v20 = vpack.c.b16 %v1428_v24, %v1427_v9  ;;  %v8222_v38 = vrot.slane %v3766_v41, 7  ;;  %v4206_v13 = vshrl.u32 %v8195_v62, 16  ;;  %v3337_v32 = vor.u32 %v3335_v19, %v8206_v10  ;;  %v8236_v41 = vld [vmem:[%s9838_s8] ss:$0 sm:$0xff] }
 0x1b1   : > { %v956_v28 = vmax.f32 %v920_v34, 0.0  ;;  %v3769_v9 = vshll.u32 %v2802_v59, 16  ;;  %v8227_v27 = vrot.slane %v2772_v45, 1  ;;  %v2511_v14 = vpack.c.b16 %v2484_v40, %v6651_v31 }
 0x1b2   : > { %10186 = vst [vmem:[#allocation58_spill] sm:$0xff] %v8215_v20  ;;  %v839_v30 = vpop.f32.mrf.mxu0  ;;  %v3330_v12 = vrot.slane %v3328_v2, 7  ;;  %v2554_v24 = vsel %vm10187_vm4, %v8029_v58, %v2553_v17  ;;  %v1548_v42 = vand.u32 15, %v1006_v47  ;;  %v4208_v19 = vrot.slane %v4206_v13, 7  ;;  %v10190_v17 = vld [vmem:[#allocation19_spill] sm:$0xff] }
 0x1b3   : > { %v840_v55 = vadd.f32 %v8037_v54, %v839_v30  ;;  %v992_v54 = vpack.c.bf16 %v956_v28, %v956_v28  ;;  %v3771_v34 = vor.u32 %v3769_v9, %v8222_v38  ;;  %v4209_v26 = vshll.u32 %v8195_v62, 16 }
 0x1b4   : > { %v3338_v45 = vsel %vm10188_vm14, %v3330_v12, %v3337_v32  ;;  %vm10189_vm7 = vcmask 1046528   ;;  %v2556_v2 = vshrl.u32 %v2511_v14, 16  ;;  %v2672_v47 = vunpack.c.l.b16 %v2554_v24 }
 0x1b5   : > { %v881_v59 = vmul.f32 %v8071_v61, %v840_v55  ;;  %v3010_v58 = vsel %vm10189_vm7, %v8122_v48, %v8227_v27  ;;  %v4829_v61 = vadd.f32 %v8236_v41, %v10190_v17  ;;  %v2673_v28 = vunpack.c.h.b16 %v2554_v24 }
 0x1b6   : > { %vm8252_vm10 = vcmp.eq.s32.totalorder %v1548_v42, 15  ;;  %v3772_v9 = vsel %vm10194_vm11, %v8114_v60, %v3771_v34  ;;  %v4211_v51 = vor.u32 %v4209_v26, %v4208_v19  ;;  %v8265_v17 = vrot.slane %v2556_v2, 7  ;;  %v10196_v34 = vld [vmem:[#allocation9_spill] sm:$0xff] }
 0x1b7   : > { %v921_v40 = vadd.f32 %v8098_v22, %v881_v59  ;;  %v8244_v30 = vpop.f32.mrf.mxu1  ;;  %v1357_v22 = vsel %vm6689_vm12, 0, %v992_v54  ;;  %v2803_v59 = vsel %vm7329_vm1, 0, %v7406_v29  ;;  %v2559_v5 = vshll.u32 %v2511_v14, 16  ;;  %vm2422_vm4 = vmpackc.low %vm8252_vm10, %vm8252_vm10 }
 0x1b8   : > { %v1429_v54 = vunpack.c.l.b16 %v1357_v22  ;;  %v3421_v60 = vshrl.u32 %v3010_v58, 16  ;;  %vm2676_vm14 = vcmp.ne.s32.totalorder %v2672_v47, %v6687_v63  ;;  %vm2677_vm7 = vcmp.ne.s32.totalorder %v2673_v28, %v6694_v4 }
 0x1b9   : > { %v957_v55 = vmax.f32 %v921_v40, 0.0  ;;  %v4212_v19 = vsel %vm10194_vm11, %v8165_v8, %v4211_v51  ;;  %v2454_v40 = vsel %vm2422_vm4, 65537, %v10054_v21  ;;  %vm8280_vm10 = vmpackc.low %vm2677_vm7, %vm2676_vm14  ;;  %v2561_v47 = vor.u32 %v2559_v5, %v8265_v17 }
 0x1ba   : > { %v4917_v12 = vpop.f32.mrf.mxu0  ;;  %5005 = vmatmul.bf16.vlgmr.msrb.gmra.mxu3 %v3338_v45  ;;  %5129 = vmatmul.bf16.gmra.mxu1 %v3772_v9  ;;  %v3822_v45 = vshrl.u32 %v2803_v59, 16  ;;  %v4864_v28 = vadd.f32 %v8236_v41, %v8147_v6  ;;  %v8289_v32 = vrot.slane %v3421_v60, 7  ;;  %v1008_v22 = vadd.s32 104, %v6622_v16  ;;  %vm10205_vm4 = vmmov %vm10194_vm11 }
 0x1bb   : > { %v993_v24 = vpack.c.bf16 %v957_v55, %v957_v55  ;;  %v8263_v42 = vadd.f32 %v4917_v12, %v4829_v61  ;;  %v10197_v61 = vmov 0  ;;  %v4831_v55 = vadd.f32 %v8236_v41, %v7399_v15  ;;  %vm10209_vm7 = vmmov %vm10205_vm4 }
 0x1bc   : > { %v10198_v61 = vsel %vm8280_vm10, 4294967295, %v10197_v61  ;;  %v8294_v51 = vrot.slane %v3822_v45, 7  ;;  %v2486_v12 = vunpack.c.l.b16 %v2454_v40  ;;  %v3424_v5 = vshll.u32 %v3010_v58, 16 }
 0x1bd   : > { %v1358_v26 = vsel %vm6689_vm12, 0, %v993_v24  ;;  %5366 = vmatmul.bf16.gmra.mxu0 %v10196_v34  ;;  %10199 = vst [vmem:[#allocation19_spill] sm:$0xff] %v10198_v61  ;;  %v10202_v34 = vld [vmem:[#allocation7_spill] sm:$0xff]  ;;  %v3825_v60 = vshll.u32 %v2803_v59, 16  ;;  %vm10203_vm12 = vmmov %vm10194_vm11  ;;  %v6397_v59 = vld [vmem:[%s9837_s7 + $0x170] sm:$0xff]  ;;  %vm10210_vm11 = vcmask 1046528  }
 0x1be   : > { %v1430_v14 = vunpack.c.l.b16 %v1358_v26  ;;  %4991 = vmatmul.bf16.gmra.mxu2 %v4212_v19  ;;  %v2773_v6 = vsel %vm8280_vm10, 0, %v10202_v34  ;;  %v2562_v19 = vsel %vm10203_vm12, %v8184_v1, %v2561_v47  ;;  %v3426_v15 = vor.u32 %v3424_v5, %v8289_v32  ;;  %5265 = vmatpush.bf16.msra.mxu3 %v6397_v59 }
 0x1bf   : > { %v8278_v2 = vpop.f32.mrf.mxu1  ;;  %v3827_v45 = vor.u32 %v3825_v60, %v8294_v51  ;;  %v8307_v40 = vrot.slane %v2773_v6, 1  ;;  %v2679_v58 = vunpack.c.l.b16 %v2562_v19  ;;  %v4866_v1 = vadd.f32 %v8236_v41, %v8212_v23 }
 0x1c0   : > { %v8287_v13 = vpack.c.b16 %v1430_v14, %v1429_v54  ;;  %v1562_v14 = vand.u32 15, %v1008_v22  ;;  %v3427_v47 = vsel %vm10205_vm4, %v8206_v10, %v3426_v15  ;;  %v2804_v15 = vsel %vm7401_vm3, 0, %v7493_v3  ;;  %v10218_v22 = vld [vmem:[#allocation10_spill] sm:$0xff] }
 0x1c1   : > { %v4952_v9 = vpop.f32.mrf.mxu2  ;;  %v3828_v5 = vsel %vm10209_vm7, %v8222_v38, %v3827_v45  ;;  %v3012_v6 = vsel %vm10210_vm11, %v8227_v27, %v8307_v40  ;;  %vm2683_vm12 = vcmp.ne.s32.totalorder %v2679_v58, %v6687_v63  ;;  %v2832_v45 = vsel %vm6910_vm13, 0, %v7055_v25 }
 0x1c2   : > { %10200 = vst [vmem:[#allocation2_spill] sm:$0xff] %v8287_v13  ;;  %v8296_v24 = vadd.f32 %v4952_v9, %v4864_v28  ;;  %v4919_v26 = vpop.f32.mrf.mxu0  ;;  %v2512_v28 = vpack.c.b16 %v2486_v12, %v6651_v31  ;;  %v2680_v9 = vunpack.c.h.b16 %v2562_v19  ;;  %vm8319_vm14 = vcmp.eq.s32.totalorder %v1562_v14, 15 }
 0x1c3   : > { %v8301_v54 = vadd.f32 %v4919_v26, %v4831_v55  ;;  %v10208_v55 = vld [vmem:[#allocation23_spill] sm:$0xff]  ;;  %vm2424_vm7 = vmpackc.low %vm8319_vm14, %vm8319_vm14  ;;  %v3478_v27 = vshrl.u32 %v3012_v6, 16  ;;  %v10215_v58 = vmov 0  ;;  %v4869_v14 = vadd.f32 %v8236_v41, %v8244_v30 }
 0x1c4   : > { %10201 = vst [vmem:[#allocation17_spill] sm:$0xff] %v8296_v24  ;;  %v4834_v12 = vadd.f32 %v8236_v41, %v10208_v55  ;;  %v2564_v23 = vshrl.u32 %v2512_v28, 16  ;;  %vm2684_vm4 = vcmp.ne.s32.totalorder %v2680_v9, %v6694_v4  ;;  %v2567_v55 = vshll.u32 %v2512_v28, 16 }
 0x1c5   : > { %vm8348_vm11 = vmpackc.low %vm2684_vm4, %vm2683_vm12  ;;  %vm10223_vm13 = vsmask.f32 256  ;;  %vm10225_vm14 = vcmask 1046528   ;;  %v10310_v48 = vmov 0 }
 0x1c6   : > { %v10216_v58 = vsel %vm8348_vm11, 4294967295, %v10215_v58  ;;  %v8352_v9 = vrot.slane %v2564_v23, 7  ;;  %v2774_v28 = vsel %vm8348_vm11, 0, %v6996_v57  ;;  %v1010_v23 = vadd.s32 120, %v6622_v16  ;;  %vm10229_vm4 = vmmov %vm10223_vm13 }
 0x1c7   : > { %v8310_v24 = vpop.f32.mrf.mxu1  ;;  %10217 = vst [vmem:[#allocation21_spill] sm:$0xff] %v10216_v58  ;;  %v3881_v58 = vshll.u32 %v2804_v15, 16 }
 0x1c8   : > { %10204 = vst [vmem:[#allocation9_spill] sm:$0xff] %v8310_v24  ;;  %v2569_v8 = vor.u32 %v2567_v55, %v8352_v9 }
 0x1c9   : > { %v4954_v26 = vpop.f32.mrf.mxu2 }
 0x1ca   : > { %v8330_v60 = vadd.f32 %v4954_v26, %v4866_v1  ;;  %v4922_v10 = vpop.f32.mrf.mxu0  ;;  %5010 = vmatmul.bf16.gmra.mxu3 %v3427_v47  ;;  %5134 = vmatmul.bf16.gmra.mxu1 %v3828_v5  ;;  %v10214_v1 = vld [vmem:[#allocation13_spill] sm:$0xff]  ;;  %v3878_v47 = vshrl.u32 %v2804_v15, 16  ;;  %v2456_v26 = vsel %vm2424_vm7, 65537, %v10054_v21  ;;  %vm10230_vm7 = vmmov %vm10229_vm4 }
 0x1cb   : > { %v8337_v38 = vadd.f32 %v4922_v10, %v4834_v12  ;;  %v6421_v12 = vld [vmem:[%s9837_s7 + $0x230] sm:$0xff]  ;;  %v3558_v10 = vshrl.u32 %v2832_v45, 16  ;;  %v2488_v62 = vunpack.c.l.b16 %v2456_v26 }
 0x1cc   : > { %10211 = vst [vmem:[#allocation23_spill] sm:$0xff] %v8330_v60  ;;  %5532 = vmatpush.bf16.msra.mxu2 %v6421_v12  ;;  %v8371_v34 = vrot.slane %v3878_v47, 7  ;;  %v8380_v12 = vrot.slane %v2774_v28, 1  ;;  %v3561_v47 = vshll.u32 %v2832_v45, 16 }
 0x1cd   : > { %v8345_v59 = vpop.f32.mrf.mxu3  ;;  %5371 = vmatmul.bf16.gmra.mxu0 %v10214_v1  ;;  %v8363_v1 = vrot.slane %v3478_v27, 7  ;;  %v3481_v27 = vshll.u32 %v3012_v6, 16  ;;  %v8378_v57 = vrot.slane %v3558_v10, 7  ;;  %v2513_v6 = vpack.c.b16 %v2488_v62, %v6651_v31 }
 0x1ce   : > { %5183 = vmatmul.bf16.vlgmr.msrb.gmra.mxu2 %v10218_v22  ;;  %v10220_v22 = vld [vmem:[#allocation25_spill] sm:$0xff]  ;;  %v3883_v55 = vor.u32 %v3881_v58, %v8371_v34  ;;  %v3014_v45 = vsel %vm10225_vm14, %v8307_v40, %v8380_v12  ;;  %v4871_v10 = vadd.f32 %v8236_v41, %v8278_v2 }
 0x1cf   : > { %v8359_v5 = vpop.f32.mrf.mxu1  ;;  %v4836_v61 = vadd.f32 %v8236_v41, %v10220_v22  ;;  %v6413_v22 = vld [vmem:[%s9837_s7 + $0x1f0] sm:$0xff]  ;;  %v3563_v26 = vor.u32 %v3561_v47, %v8378_v57  ;;  %v2572_v40 = vshrl.u32 %v2513_v6, 16  ;;  %v2575_v58 = vshll.u32 %v2513_v6, 16  ;;  %v10241_v6 = vld [vmem:[#allocation31_spill] sm:$0xff] }
 0x1d0   : > { %10219 = vst [vmem:[#allocation6_spill] sm:$0xff] %v8359_v5  ;;  %v1576_v5 = vand.u32 15, %v1010_v23  ;;  %5443 = vmatpush.bf16.msra.mxu1 %v6413_v22 }
 0x1d1   : > { %v4957_v60 = vpop.f32.mrf.mxu2 }
 0x1d2   : > { %v8374_v56 = vadd.f32 %v4957_v60, %v4869_v14  ;;  %v4924_v30 = vpop.f32.mrf.mxu0  ;;  %v3483_v60 = vor.u32 %v3481_v27, %v8363_v1  ;;  %vm8400_vm12 = vcmp.eq.s32.totalorder %v1576_v5, 15  ;;  %v10232_v5 = vld [vmem:[#allocation26_spill] sm:$0xff] }
 0x1d3   : > { %v8376_v13 = vadd.f32 %v4924_v30, %v4836_v61  ;;  %v2570_v61 = vsel %vm10223_vm13, %v8265_v17, %v2569_v8  ;;  %v10228_v8 = vld [vmem:[#allocation28_spill] sm:$0xff]  ;;  %v3884_v30 = vsel %vm10230_vm7, %v8294_v51, %v3883_v55  ;;  %vm10233_vm13 = vnez %v10232_v5  ;;  %vm2426_vm14 = vmpackc.low %vm8400_vm12, %vm8400_vm12 }
 0x1d4   : > { %10221 = vst [vmem:[#allocation13_spill] sm:$0xff] %v8374_v56  ;;  %v2686_v14 = vunpack.c.l.b16 %v2570_v61  ;;  %v2687_v28 = vunpack.c.h.b16 %v2570_v61  ;;  %v4839_v62 = vadd.f32 %v8236_v41, %v10228_v8  ;;  %v3484_v23 = vsel %vm10229_vm4, %v8289_v32, %v3483_v60  ;;  %v10235_v32 = vld [vmem:[#allocation12_spill] sm:$0xff]  ;;  %vm10245_vm12 = vmmov %vm10229_vm4 }
 0x1d5   : > { %10222 = vst [vmem:[#allocation10_spill] sm:$0xff] %v8376_v13  ;;  %v8385_v24 = vpop.f32.mrf.mxu3  ;;  %v2805_v22 = vsel %vm10233_vm13, 0, %v7606_v33  ;;  %v3534_v61 = vshrl.u32 %v3014_v45, 16  ;;  %v3564_v51 = vsel %vm10229_vm4, %v10235_v32, %v3563_v26  ;;  %v2833_v60 = vsel %vm6990_vm9, 0, %v7135_v44 }
 0x1d6   : > { %vm2690_vm7 = vcmp.ne.s32.totalorder %v2686_v14, %v6687_v63  ;;  %vm2691_vm11 = vcmp.ne.s32.totalorder %v2687_v28, %v6694_v4  ;;  %v8429_v8 = vrot.slane %v2572_v40, 7  ;;  %v3614_v53 = vshrl.u32 %v2833_v60, 16 }
 0x1d7   : > { %v8392_v15 = vpop.f32.mrf.mxu1  ;;  %vm8437_vm9 = vmpackc.low %vm2691_vm11, %vm2690_vm7  ;;  %v10238_v14 = vmov 0  ;;  %v4874_v28 = vadd.f32 %v8236_v41, %v8345_v59  ;;  %v1012_v40 = vadd.s32 136, %v6622_v16  ;;  %vm10249_vm7 = vcmask 1046528  }
 0x1d8   : > { %10224 = vst [vmem:[#allocation25_spill] sm:$0xff] %v8392_v15  ;;  %v10239_v14 = vsel %vm8437_vm9, 4294967295, %v10238_v14  ;;  %v3937_v15 = vshll.u32 %v2805_v22, 16  ;;  %vm10243_vm11 = vmmov %vm10229_vm4 }
 0x1d9   : > { %v4959_v17 = vpop.f32.mrf.mxu2 }
 0x1da   : > { %v8410_v27 = vadd.f32 %v4959_v17, %v4871_v10  ;;  %v4927_v2 = vpop.f32.mrf.mxu0  ;;  %5015 = vmatmul.bf16.gmra.mxu3 %v3484_v23  ;;  %5139 = vmatmul.bf16.gmra.mxu1 %v3884_v30  ;;  %v3934_v10 = vshrl.u32 %v2805_v22, 16  ;;  %v2458_v17 = vsel %vm2426_vm14, 65537, %v10054_v21  ;;  %v8435_v23 = vrot.slane %v3534_v61, 7 }
 0x1db   : > { %v8415_v47 = vadd.f32 %v4927_v2, %v4839_v62  ;;  %v10236_v62 = vld [vmem:[#allocation29_spill] sm:$0xff]  ;;  %v3537_v30 = vshll.u32 %v3014_v45, 16  ;;  %v4841_v2 = vadd.f32 %v8236_v41, %v10241_v6  ;;  %v2577_v61 = vor.u32 %v2575_v58, %v8429_v8 }
 0x1dc   : > { %10231 = vst [vmem:[#allocation28_spill] sm:$0xff] %v8410_v27  ;;  %v3617_v6 = vshll.u32 %v2833_v60, 16  ;;  %v6396_v60 = vld [vmem:[%s9837_s7 + $0x168] sm:$0xff] }
 0x1dd   : > { %10234 = vst [vmem:[#allocation26_spill] sm:$0xff] %v8415_v47  ;;  %v8427_v55 = vpop.f32.mrf.mxu3  ;;  %5376 = vmatmul.bf16.gmra.mxu0 %v3564_v51  ;;  %v8446_v51 = vrot.slane %v3934_v10, 7  ;;  %v3539_v45 = vor.u32 %v3537_v30, %v8435_v23  ;;  %v8457_v47 = vrot.slane %v3614_v53, 7  ;;  %v1590_v10 = vand.u32 15, %v1012_v40  ;;  %v10248_v40 = vld [vmem:[#allocation33_spill] sm:$0xff]  ;;  %5266 = vmatpush.bf16.msra.mxu3 %v6396_v60 }
 0x1de   : > { %5188 = vmatmul.bf16.gmra.mxu2 %v10236_v62  ;;  %10240 = vst [vmem:[#allocation29_spill] sm:$0xff] %v10239_v14  ;;  %v2490_v62 = vunpack.c.l.b16 %v2458_v17 }
 0x1df   : > { %v8433_v26 = vpop.f32.mrf.mxu1  ;;  %v3939_v58 = vor.u32 %v3937_v15, %v8446_v51  ;;  %v3540_v22 = vsel %vm10245_vm12, %v8363_v1, %v3539_v45  ;;  %v3619_v53 = vor.u32 %v3617_v6, %v8457_v47  ;;  %v4876_v15 = vadd.f32 %v8236_v41, %v8385_v24  ;;  %vm10254_vm12 = vmmov %vm10229_vm4 }
 0x1e0   : > { %10237 = vst [vmem:[#allocation12_spill] sm:$0xff] %v8433_v26  ;;  %v2775_v26 = vsel %vm8437_vm9, 0, %v7055_v25  ;;  %vm8477_vm14 = vcmp.eq.s32.totalorder %v1590_v10, 15  ;;  %v10251_v10 = vld [vmem:[#allocation32_spill] sm:$0xff] }
 0x1e1   : > { %v4962_v32 = vpop.f32.mrf.mxu2  ;;  %v8462_v17 = vrot.slane %v2775_v26, 1  ;;  %v3940_v1 = vsel %vm10229_vm4, %v8371_v34, %v3939_v58  ;;  %v3620_v34 = vsel %vm10254_vm12, %v8378_v57, %v3619_v53  ;;  %vm2428_vm4 = vmpackc.low %vm8477_vm14, %vm8477_vm14  ;;  %v2834_v58 = vsel %vm7049_vm15, 0, %v7226_v43  ;;  %v10255_v53 = vld [vmem:[#allocation34_spill] sm:$0xff] }
 0x1e2   : > { %v8449_v27 = vadd.f32 %v4962_v32, %v4874_v28  ;;  %v4929_v56 = vpop.f32.mrf.mxu0  ;;  %v2578_v28 = vsel %vm10243_vm11, %v8352_v9, %v2577_v61  ;;  %v2514_v32 = vpack.c.b16 %v2490_v62, %v6651_v31  ;;  %vm10252_vm11 = vnez %v10251_v10  ;;  %v6420_v9 = vld [vmem:[%s9837_s7 + $0x228] sm:$0xff] }
 0x1e3   : > { %v8454_v59 = vadd.f32 %v4929_v56, %v4841_v2  ;;  %v2693_v26 = vunpack.c.l.b16 %v2578_v28  ;;  %v2694_v30 = vunpack.c.h.b16 %v2578_v28  ;;  %v4844_v2 = vadd.f32 %v8236_v41, %v10248_v40  ;;  %5533 = vmatpush.bf16.msra.mxu2 %v6420_v9 }
 0x1e4   : > { %10242 = vst [vmem:[#allocation31_spill] sm:$0xff] %v8449_v27  ;;  %v3016_v62 = vsel %vm10249_vm7, %v8380_v12, %v8462_v17  ;;  %v2580_v45 = vshrl.u32 %v2514_v32, 16  ;;  %v2806_v28 = vsel %vm10252_vm11, 0, %v7725_v37  ;;  %v2583_v57 = vshll.u32 %v2514_v32, 16 }
 0x1e5   : > { %v8459_v13 = vpop.f32.mrf.mxu3  ;;  %v3590_v12 = vshrl.u32 %v3016_v62, 16  ;;  %vm2697_vm7 = vcmp.ne.s32.totalorder %v2693_v26, %v6687_v63  ;;  %vm2698_vm9 = vcmp.ne.s32.totalorder %v2694_v30, %v6694_v4  ;;  %v3990_v60 = vshrl.u32 %v2806_v28, 16 }
 0x1e6   : > { %v2460_v35 = vsel %vm2428_vm4, 65537, %v10054_v21  ;;  %v3670_v26 = vshrl.u32 %v2834_v58, 16  ;;  %vm8516_vm15 = vmpackc.low %vm2698_vm9, %vm2697_vm7  ;;  %v10257_v30 = vmov 0  ;;  %v1014_v32 = vadd.s32 152, %v6622_v16 }
 0x1e7   : > { %v8467_v56 = vpop.f32.mrf.mxu1  ;;  %v10258_v30 = vsel %vm8516_vm15, 4294967295, %v10257_v30  ;;  %v8527_v14 = vrot.slane %v3990_v60, 7  ;;  %v2492_v25 = vunpack.c.l.b16 %v2460_v35  ;;  %v3993_v9 = vshll.u32 %v2806_v28, 16  ;;  %v6412_v60 = vld [vmem:[%s9837_s7 + $0x1e8] sm:$0xff]  ;;  %vm10263_vm9 = vmmov %vm10254_vm12 }
 0x1e8   : > { %10244 = vst [vmem:[#allocation59_spill] sm:$0xff] %v8467_v56  ;;  %v3593_v56 = vshll.u32 %v3016_v62, 16  ;;  %v3673_v35 = vshll.u32 %v2834_v58, 16  ;;  %5444 = vmatpush.bf16.msra.mxu1 %v6412_v60  ;;  %v4881_v58 = vadd.f32 %v8236_v41, %v8459_v13  ;;  %vm10268_vm12 = vmmov %vm10263_vm9  ;;  %vm10270_vm7 = vcmask 1046528  }
 0x1e9   : > { %v4964_v61 = vpop.f32.mrf.mxu2  ;;  %10259 = vst [vmem:[#allocation60_spill] sm:$0xff] %v10258_v30  ;;  %v3995_v62 = vor.u32 %v3993_v9, %v8527_v14  ;;  %vm10269_vm4 = vmmov %vm10263_vm9  ;;  %v10352_v10 = vmov 0 }
 0x1ea   : > { %v8488_v24 = vadd.f32 %v4964_v61, %v4876_v15  ;;  %v4932_v6 = vpop.f32.mrf.mxu0  ;;  %5020 = vmatmul.bf16.gmra.mxu3 %v3540_v22  ;;  %5144 = vmatmul.bf16.gmra.mxu1 %v3940_v1  ;;  %v8507_v15 = vrot.slane %v2580_v45, 7  ;;  %v4879_v61 = vadd.f32 %v8236_v41, %v8427_v55  ;;  %v8522_v1 = vrot.slane %v3590_v12, 7  ;;  %v10260_v45 = vld [vmem:[#allocation36_spill] sm:$0xff] }
 0x1eb   : > { %v8493_v40 = vadd.f32 %v4932_v6, %v4844_v2  ;;  %v4846_v6 = vadd.f32 %v8236_v41, %v10260_v45  ;;  %v2776_v55 = vsel %vm8516_vm15, 0, %v7135_v44 }
 0x1ec   : > { %10250 = vst [vmem:[#allocation33_spill] sm:$0xff] %v8488_v24  ;;  %v2585_v24 = vor.u32 %v2583_v57, %v8507_v15  ;;  %v3595_v57 = vor.u32 %v3593_v56, %v8522_v1 }
 0x1ed   : > { %10253 = vst [vmem:[#allocation32_spill] sm:$0xff] %v8493_v40  ;;  %v8505_v22 = vpop.f32.mrf.mxu3  ;;  %5381 = vmatmul.bf16.gmra.mxu0 %v3620_v34  ;;  %v8537_v40 = vrot.slane %v3670_v26, 7  ;;  %v10264_v26 = vld [vmem:[#allocation39_spill] sm:$0xff] }
 0x1ee   : > { %5193 = vmatmul.bf16.gmra.mxu2 %v10255_v53  ;;  %v2586_v28 = vsel %vm10263_vm9, %v8429_v8, %v2585_v24  ;;  %v3996_v8 = vsel %vm10269_vm4, %v8446_v51, %v3995_v62 }
 0x1ef   : > { %v8514_v2 = vpop.f32.mrf.mxu1  ;;  %v3675_v56 = vor.u32 %v3673_v35, %v8537_v40  ;;  %v2701_v9 = vunpack.c.h.b16 %v2586_v28 }
 0x1f0   : > { %10256 = vst [vmem:[#allocation34_spill] sm:$0xff] %v8514_v2 }
 0x1f1   : > { %v4967_v34 = vpop.f32.mrf.mxu2  ;;  %vm2705_vm10 = vcmp.ne.s32.totalorder %v2701_v9, %v6694_v4 }
 0x1f2   : > { %v8530_v27 = vadd.f32 %v4967_v34, %v4879_v61  ;;  %v4934_v2 = vpop.f32.mrf.mxu0  ;;  %v1604_v61 = vand.u32 15, %v1014_v32  ;;  %v8546_v34 = vrot.slane %v2776_v55, 1  ;;  %v2700_v32 = vunpack.c.l.b16 %v2586_v28 }
 0x1f3   : > { %v8535_v12 = vadd.f32 %v4934_v2, %v4846_v6  ;;  %v2515_v2 = vpack.c.b16 %v2492_v25, %v6651_v31  ;;  %v4849_v6 = vadd.f32 %v8236_v41, %v10264_v26  ;;  %v3596_v25 = vsel %vm10268_vm12, %v8435_v23, %v3595_v57  ;;  %vm10275_vm12 = vmmov %vm10269_vm4 }
 0x1f4   : > { %10261 = vst [vmem:[#allocation36_spill] sm:$0xff] %v8530_v27  ;;  %vm8558_vm14 = vcmp.eq.s32.totalorder %v1604_v61, 15  ;;  %v3018_v24 = vsel %vm10270_vm7, %v8462_v17, %v8546_v34  ;;  %v10272_v61 = vld [vmem:[#allocation37_spill] sm:$0xff]  ;;  %v3676_v23 = vsel %vm10275_vm12, %v8457_v47, %v3675_v56  ;;  %vm10276_vm7 = vnez %v10029_v46 }
 0x1f5   : > { %10262 = vst [vmem:[#allocation61_spill] sm:$0xff] %v8535_v12  ;;  %v8543_v45 = vpop.f32.mrf.mxu3  ;;  %v2588_v35 = vshrl.u32 %v2515_v2, 16  ;;  %vm10273_vm9 = vnez %v10272_v61  ;;  %vm2430_vm4 = vmpackc.low %vm8558_vm14, %vm8558_vm14  ;;  %v3646_v51 = vshrl.u32 %v3018_v24, 16  ;;  %v2835_v17 = vsel %vm10276_vm7, 0, %v7333_v7 }
 0x1f6   : > { %v2807_v28 = vsel %vm10273_vm9, 0, %v7843_v49  ;;  %vm2704_vm15 = vcmp.ne.s32.totalorder %v2700_v32, %v6687_v63  ;;  %v2591_v47 = vshll.u32 %v2515_v2, 16  ;;  %v2462_v56 = vsel %vm2430_vm4, 65537, %v10054_v21 }
 0x1f7   : > { %v8553_v30 = vpop.f32.mrf.mxu1  ;;  %v4046_v62 = vshrl.u32 %v2807_v28, 16  ;;  %v3726_v55 = vshrl.u32 %v2835_v17, 16  ;;  %vm8594_vm14 = vmpackc.low %vm2705_vm10, %vm2704_vm15  ;;  %v10278_v46 = vmov 0  ;;  %v4884_v32 = vadd.f32 %v8236_v41, %v8505_v22 }
 0x1f8   : > { %10265 = vst [vmem:[#allocation39_spill] sm:$0xff] %v8553_v30  ;;  %v10279_v46 = vsel %vm8594_vm14, 4294967295, %v10278_v46  ;;  %v8600_v9 = vrot.slane %v3646_v51, 7  ;;  %v2777_v22 = vsel %vm8594_vm14, 0, %v7226_v43  ;;  %v4049_v30 = vshll.u32 %v2807_v28, 16  ;;  %vm10283_vm10 = vmmov %vm10275_vm12 }
 0x1f9   : > { %v4969_v60 = vpop.f32.mrf.mxu2  ;;  %10280 = vst [vmem:[#allocation64_spill] sm:$0xff] %v10279_v46  ;;  %vm10287_vm12 = vmmov %vm10283_vm10  ;;  %vm10289_vm7 = vcmask 1046528  }
 0x1fa   : > { %v8569_v26 = vadd.f32 %v4969_v60, %v4881_v58  ;;  %v4937_v13 = vpop.f32.mrf.mxu0  ;;  %5025 = vmatmul.bf16.gmra.mxu3 %v3596_v25  ;;  %5149 = vmatmul.bf16.gmra.mxu1 %v3996_v8  ;;  %v1016_v60 = vadd.s32 168, %v6622_v16  ;;  %v10281_v25 = vld [vmem:[#allocation42_spill] sm:$0xff]  ;;  %vm10288_vm4 = vmmov %vm10283_vm10 }
 0x1fb   : > { %v8574_v44 = vadd.f32 %v4937_v13, %v4849_v6  ;;  %v8588_v6 = vrot.slane %v2588_v35, 7  ;;  %v4851_v2 = vadd.f32 %v8236_v41, %v10281_v25  ;;  %v8605_v35 = vrot.slane %v4046_v62, 7 }
 0x1fc   : > { %10271 = vst [vmem:[#allocation62_spill] sm:$0xff] %v8569_v26  ;;  %v3729_v62 = vshll.u32 %v2835_v17, 16  ;;  %v1618_v12 = vand.u32 15, %v1016_v60  ;;  %v6395_v17 = vld [vmem:[%s9837_s7 + $0x160] sm:$0xff] }
 0x1fd   : > { %10274 = vst [vmem:[#allocation37_spill] sm:$0xff] %v8574_v44  ;;  %v8586_v57 = vpop.f32.mrf.mxu3  ;;  %5386 = vmatmul.bf16.gmra.mxu0 %v3676_v23  ;;  %v2593_v13 = vor.u32 %v2591_v47, %v8588_v6  ;;  %v2494_v23 = vunpack.c.l.b16 %v2462_v56  ;;  %v8615_v44 = vrot.slane %v3726_v55, 7  ;;  %v4051_v47 = vor.u32 %v4049_v30, %v8605_v35  ;;  %5267 = vmatpush.bf16.msra.mxu3 %v6395_v17 }
 0x1fe   : > { %5198 = vmatmul.bf16.gmra.mxu2 %v7803_v52  ;;  %v8621_v56 = vrot.slane %v2777_v22, 1  ;;  %v4886_v30 = vadd.f32 %v8236_v41, %v8543_v45  ;;  %vm8636_vm15 = vcmp.eq.s32.totalorder %v1618_v12, 15  ;;  %v10291_v12 = vld [vmem:[#allocation43_spill] sm:$0xff] }
 0x1ff   : > { %v8592_v58 = vpop.f32.mrf.mxu1 }
 0x200   : > { %10277 = vst [vmem:[#allocation63_spill] sm:$0xff] %v8592_v58  ;;  %v3649_v58 = vshll.u32 %v3018_v24, 16  ;;  %v2594_v24 = vsel %vm10283_vm10, %v8507_v15, %v2593_v13  ;;  %v3020_v22 = vsel %vm10289_vm7, %v8546_v34, %v8621_v56  ;;  %vm10292_vm10 = vnez %v10291_v12 }
 0x201   : > { %v4972_v8 = vpop.f32.mrf.mxu2  ;;  %v2707_v60 = vunpack.c.l.b16 %v2594_v24  ;;  %v2836_v34 = vsel %vm7212_vm0, 0, %v7406_v29  ;;  %v3705_v43 = vshll.u32 %v3020_v22, 16  ;;  %v10381_v12 = vmov 0 }
 0x202   : > { %v8608_v26 = vadd.f32 %v4972_v8, %v4884_v32  ;;  %v4939_v27 = vpop.f32.mrf.mxu0  ;;  %v3651_v25 = vor.u32 %v3649_v58, %v8600_v9  ;;  %v2516_v32 = vpack.c.b16 %v2494_v23, %v6651_v31  ;;  %v3731_v58 = vor.u32 %v3729_v62, %v8615_v44 }
 0x203   : > { %v8613_v51 = vadd.f32 %v4939_v27, %v4851_v2  ;;  %v10284_v27 = vld [vmem:[#allocation44_spill] sm:$0xff]  ;;  %v2708_v2 = vunpack.c.h.b16 %v2594_v24  ;;  %v4052_v23 = vsel %vm10288_vm4, %v8527_v14, %v4051_v47  ;;  %vm2711_vm7 = vcmp.ne.s32.totalorder %v2707_v60, %v6687_v63 }
 0x204   : > { %10282 = vst [vmem:[#allocation42_spill] sm:$0xff] %v8608_v26  ;;  %v4854_v28 = vadd.f32 %v8236_v41, %v10284_v27  ;;  %v3652_v13 = vsel %vm10287_vm12, %v8522_v1, %v3651_v25  ;;  %v2596_v62 = vshrl.u32 %v2516_v32, 16  ;;  %v2808_v27 = vsel %vm10292_vm10, 0, %v7954_v50  ;;  %vm10293_vm12 = vmmov %vm10288_vm4 }
 0x205   : > { %v8618_v52 = vpop.f32.mrf.mxu3  ;;  %v3732_v14 = vsel %vm10293_vm12, %v8537_v40, %v3731_v58  ;;  %vm2432_vm4 = vmpackc.low %vm8636_vm15, %vm8636_vm15  ;;  %v3702_v1 = vshrl.u32 %v3020_v22, 16  ;;  %vm2712_vm14 = vcmp.ne.s32.totalorder %v2708_v2, %v6694_v4  ;;  %v4102_v47 = vshrl.u32 %v2808_v27, 16  ;;  %v6419_v58 = vld [vmem:[%s9837_s7 + $0x220] sm:$0xff] }
 0x206   : > { %v2599_v40 = vshll.u32 %v2516_v32, 16  ;;  %v2464_v18 = vsel %vm2432_vm4, 65537, %v10054_v21  ;;  %vm8675_vm0 = vmpackc.low %vm2712_vm14, %vm2711_vm7  ;;  %v10294_v60 = vmov 0  ;;  %v4889_v2 = vadd.f32 %v8236_v41, %v8586_v57  ;;  %5534 = vmatpush.bf16.msra.mxu2 %v6419_v58 }
 0x207   : > { %v8628_v55 = vpop.f32.mrf.mxu1  ;;  %v10295_v60 = vsel %vm8675_vm0, 4294967295, %v10294_v60  ;;  %v8681_v15 = vrot.slane %v3702_v1, 7  ;;  %v1018_v32 = vadd.s32 184, %v6622_v16  ;;  %v2778_v57 = vsel %vm8675_vm0, 0, %v7333_v7  ;;  %v6411_v1 = vld [vmem:[%s9837_s7 + $0x1e0] sm:$0xff]  ;;  %vm10298_vm14 = vmmov %vm10293_vm12 }
 0x208   : > { %10296 = vst [vmem:[#allocation43_spill] sm:$0xff] %v10295_v60  ;;  %5445 = vmatpush.bf16.msra.mxu1 %v6411_v1  ;;  %v8705_v60 = vrot.slane %v2778_v57, 1  ;;  %vm10302_vm4 = vmmov %vm10293_vm12  ;;  %vm10303_vm7 = vcmask 1046528  }
 0x209   : > { %v4974_v8 = vpop.f32.mrf.mxu2 }
 0x20a   : > { %v8647_v45 = vadd.f32 %v4974_v8, %v4886_v30  ;;  %v4942_v24 = vpop.f32.mrf.mxu0  ;;  %5030 = vmatmul.bf16.gmra.mxu3 %v3652_v13  ;;  %5154 = vmatmul.bf16.gmra.mxu1 %v4052_v23  ;;  %v3782_v30 = vshrl.u32 %v2836_v34, 16  ;;  %v4856_v8 = vadd.f32 %v8236_v41, %v7944_v36  ;;  %v8686_v23 = vrot.slane %v4102_v47, 7 }
 0x20b   : > { %v8652_v46 = vadd.f32 %v4942_v24, %v4854_v28  ;;  %v8666_v28 = vrot.slane %v2596_v62, 7  ;;  %v2496_v24 = vunpack.c.l.b16 %v2464_v18  ;;  %v4105_v36 = vshll.u32 %v2808_v27, 16 }
 0x20c   : > { %10290 = vst [vmem:[#allocation44_spill] sm:$0xff] %v8647_v45  ;;  %v8699_v47 = vrot.slane %v3782_v30, 7  ;;  %v3785_v18 = vshll.u32 %v2836_v34, 16  ;;  %v4859_v27 = vadd.f32 %v8236_v41, %v8002_v11 }
 0x20d   : > { %v8664_v25 = vpop.f32.mrf.mxu3  ;;  %5391 = vmatmul.bf16.gmra.mxu0 %v3732_v14  ;;  %v2601_v62 = vor.u32 %v2599_v40, %v8666_v28  ;;  %v3707_v40 = vor.u32 %v3705_v43, %v8681_v15  ;;  %v4107_v22 = vor.u32 %v4105_v36, %v8686_v23  ;;  %v4891_v43 = vadd.f32 %v8236_v41, %v8618_v52 }
 0x20e   : > { %5203 = vmatmul.bf16.gmra.mxu2 %v7917_v0  ;;  %v3787_v30 = vor.u32 %v3785_v18, %v8699_v47 }
 0x20f   : > { %v8673_v17 = vpop.f32.mrf.mxu1  ;;  %v2602_v7 = vsel %vm10298_vm14, %v8588_v6, %v2601_v62  ;;  %v3708_v6 = vsel %vm10293_vm12, %v8600_v9, %v3707_v40  ;;  %v4108_v11 = vsel %vm10302_vm4, %v8605_v35, %v4107_v22  ;;  %v3022_v62 = vsel %vm10303_vm7, %v8621_v56, %v8705_v60  ;;  %v6410_v9 = vld [vmem:[%s9837_s7 + $0x1d8] sm:$0xff]  ;;  %vm10308_vm12 = vmmov %vm10302_vm4 }
 0x210   : > { %v3788_v35 = vsel %vm10308_vm12, %v8615_v44, %v3787_v30  ;;  %v3758_v56 = vshrl.u32 %v3022_v62, 16  ;;  %5446 = vmatpush.bf16.msra.mxu1 %v6410_v9  ;;  %v10309_v30 = vld [vmem:[#allocation16_spill] sm:$0xff] }
 0x211   : > { %v4977_v13 = vpop.f32.mrf.mxu2 }
 0x212   : > { %v8689_v14 = vadd.f32 %v4977_v13, %v4889_v2  ;;  %v4944_v45 = vpop.f32.mrf.mxu0  ;;  %v1632_v2 = vand.u32 15, %v1018_v32  ;;  %v2714_v32 = vunpack.c.l.b16 %v2602_v7 }
 0x213   : > { %v8697_v58 = vadd.f32 %v4944_v45, %v4856_v8  ;;  %v2517_v45 = vpack.c.b16 %v2496_v24, %v6651_v31  ;;  %v2715_v8 = vunpack.c.h.b16 %v2602_v7  ;;  %v10305_v7 = vld [vmem:[#allocation46_spill] sm:$0xff] }
 0x214   : > { %10297 = vst [vmem:[#allocation65_spill] sm:$0xff] %v8689_v14  ;;  %vm8717_vm15 = vcmp.eq.s32.totalorder %v1632_v2, 15  ;;  %vm10306_vm14 = vnez %v10305_v7  ;;  %v2837_v2 = vsel %vm7329_vm1, 0, %v7493_v3  ;;  %vm2718_vm7 = vcmp.ne.s32.totalorder %v2714_v32, %v6687_v63  ;;  %v6409_v32 = vld [vmem:[%s9837_s7 + $0x1d0] sm:$0xff]  ;;  %vm10317_vm1 = vmmov %vm10308_vm12 }
 0x215   : > { %v8702_v13 = vpop.f32.mrf.mxu3  ;;  %v2604_v52 = vshrl.u32 %v2517_v45, 16  ;;  %v2809_v18 = vsel %vm10306_vm14, 0, %v8112_v39  ;;  %vm2434_vm4 = vmpackc.low %vm8717_vm15, %vm8717_vm15  ;;  %vm2719_vm0 = vcmp.ne.s32.totalorder %v2715_v8, %v6694_v4  ;;  %v2607_v44 = vshll.u32 %v2517_v45, 16  ;;  %5447 = vmatpush.bf16.msra.mxu1 %v6409_v32 }
 0x216   : > { %v2466_v57 = vsel %vm2434_vm4, 65537, %v10054_v21  ;;  %vm8754_vm15 = vmpackc.low %vm2719_vm0, %vm2718_vm7  ;;  %v4894_v8 = vadd.f32 %v8236_v41, %v8664_v25  ;;  %v1020_v45 = vadd.s32 200, %v6622_v16  ;;  %v3761_v25 = vshll.u32 %v3022_v62, 16 }
 0x217   : > { %v8715_v34 = vpop.f32.mrf.mxu1  ;;  %v10311_v48 = vsel %vm8754_vm15, 4294967295, %v10310_v48  ;;  %v4161_v32 = vshll.u32 %v2809_v18, 16  ;;  %vm10320_vm12 = vmmov %vm10317_vm1  ;;  %vm10322_vm7 = vcmask 1046528  }
 0x218   : > { %10299 = vst [vmem:[#allocation66_spill] sm:$0xff] %v8715_v34  ;;  %vm10321_vm4 = vmmov %vm10317_vm1 }
 0x219   : > { %v4979_v1 = vpop.f32.mrf.mxu2  ;;  %10312 = vst [vmem:[#allocation16_spill] sm:$0xff] %v10311_v48 }
 0x21a   : > { %v8728_v24 = vadd.f32 %v4979_v1, %v4891_v43  ;;  %v4947_v36 = vpop.f32.mrf.mxu0  ;;  %5035 = vmatmul.bf16.gmra.mxu3 %v3708_v6  ;;  %5159 = vmatmul.bf16.gmra.mxu1 %v4108_v11  ;;  %v8750_v43 = vrot.slane %v2604_v52, 7  ;;  %v3838_v1 = vshrl.u32 %v2837_v2, 16  ;;  %v8763_v6 = vrot.slane %v3758_v56, 7  ;;  %v10313_v11 = vld [vmem:[#allocation51_spill] sm:$0xff] }
 0x21b   : > { %v8736_v40 = vadd.f32 %v4947_v36, %v4859_v27  ;;  %v4158_v27 = vshrl.u32 %v2809_v18, 16  ;;  %v4861_v52 = vadd.f32 %v8236_v41, %v10313_v11  ;;  %v2779_v56 = vsel %vm8754_vm15, 0, %v7406_v29  ;;  %v6408_v11 = vld [vmem:[%s9837_s7 + $0x1c8] sm:$0xff] }
 0x21c   : > { %10304 = vst [vmem:[#allocation67_spill] sm:$0xff] %v8728_v24  ;;  %v2498_v24 = vunpack.c.l.b16 %v2466_v57  ;;  %v3841_v57 = vshll.u32 %v2837_v2, 16  ;;  %5448 = vmatpush.bf16.msra.mxu1 %v6408_v11  ;;  %v6394_v2 = vld [vmem:[%s9837_s7 + $0x158] sm:$0xff] }
 0x21d   : > { %10307 = vst [vmem:[#allocation46_spill] sm:$0xff] %v8736_v40  ;;  %v8748_v22 = vpop.f32.mrf.mxu3  ;;  %5396 = vmatmul.bf16.gmra.mxu0 %v3788_v35  ;;  %v8768_v9 = vrot.slane %v4158_v27, 7  ;;  %v2609_v35 = vor.u32 %v2607_v44, %v8750_v43  ;;  %v8783_v40 = vrot.slane %v3838_v1, 7  ;;  %v3763_v44 = vor.u32 %v3761_v25, %v8763_v6  ;;  %v6407_v1 = vld [vmem:[%s9837_s7 + $0x1c0] sm:$0xff]  ;;  %5268 = vmatpush.bf16.msra.mxu3 %v6394_v2  ;;  %v6418_v2 = vld [vmem:[%s9837_s7 + $0x218] sm:$0xff] }
 0x21e   : > { %5208 = vmatmul.bf16.gmra.mxu2 %v10309_v30 }
 0x21f   : > { %v8771_v14 = vpop.f32.mrf.mxu1  ;;  %v4163_v62 = vor.u32 %v4161_v32, %v8768_v9  ;;  %v2610_v48 = vsel %vm10317_vm1, %v8666_v28, %v2609_v35  ;;  %v3843_v18 = vor.u32 %v3841_v57, %v8783_v40  ;;  %v2810_v57 = vsel %vm8107_vm8, 0, %v8215_v20  ;;  %5535 = vmatpush.bf16.msra.mxu2 %v6418_v2 }
 0x220   : > { %10314 = vst [vmem:[#allocation51_spill] sm:$0xff] %v8771_v14  ;;  %v2722_v25 = vunpack.c.h.b16 %v2610_v48  ;;  %5449 = vmatpush.bf16.msra.mxu1 %v6407_v1 }
 0x221   : > { %v4982_v36 = vpop.f32.mrf.mxu2  ;;  %v4164_v35 = vsel %vm10321_vm4, %v8686_v23, %v4163_v62  ;;  %v4222_v62 = vshrl.u32 %v2810_v57, 16 }
 0x222   : > { %v8773_v26 = vadd.f32 %v4982_v36, %v4894_v8  ;;  %v4949_v34 = vpop.f32.mrf.mxu0  ;;  %v1646_v8 = vand.u32 15, %v1020_v45  ;;  %v4896_v45 = vadd.f32 %v8236_v41, %v8702_v13 }
 0x223   : > { %v8781_v27 = vadd.f32 %v4949_v34, %v4861_v52  ;;  %v2518_v34 = vpack.c.b16 %v2498_v24, %v6651_v31  ;;  %v2721_v52 = vunpack.c.l.b16 %v2610_v48  ;;  %v3764_v24 = vsel %vm10320_vm12, %v8681_v15, %v3763_v44 }
 0x224   : > { %10315 = vst [vmem:[#allocation68_spill] sm:$0xff] %v8773_v26  ;;  %v8789_v26 = vrot.slane %v2779_v56, 1  ;;  %vm8803_vm0 = vcmp.eq.s32.totalorder %v1646_v8, 15  ;;  %v3844_v15 = vsel %vm10317_vm1, %v8699_v47, %v3843_v18  ;;  %v2838_v44 = vsel %vm7401_vm3, 0, %v7606_v33  ;;  %v10326_v18 = vld [vmem:[#allocation20_spill] sm:$0xff] }
 0x225   : > { %10316 = vst [vmem:[#allocation69_spill] sm:$0xff] %v8781_v27  ;;  %v8786_v36 = vpop.f32.mrf.mxu3  ;;  %v2612_v13 = vshrl.u32 %v2518_v34, 16  ;;  %vm2436_vm12 = vmpackc.low %vm8803_vm0, %vm8803_vm0  ;;  %vm2725_vm4 = vcmp.ne.s32.totalorder %v2721_v52, %v6687_v63  ;;  %v2615_v47 = vshll.u32 %v2518_v34, 16  ;;  %v3894_v19 = vshrl.u32 %v2838_v44, 16 }
 0x226   : > { %v3024_v11 = vsel %vm10322_vm7, %v8705_v60, %v8789_v26  ;;  %vm2726_vm7 = vcmp.ne.s32.totalorder %v2722_v25, %v6694_v4  ;;  %v10327_v56 = vmov 0  ;;  %v4899_v52 = vadd.f32 %v8236_v41, %v8748_v22  ;;  %vm10329_vm0 = vmmov %vm10317_vm1 }
 0x227   : > { %v8824_v23 = vpop.f32.mrf.mxu1  ;;  %v3814_v60 = vshrl.u32 %v3024_v11, 16  ;;  %v8831_v1 = vrot.slane %v2612_v13, 7  ;;  %vm8838_vm3 = vmpackc.low %vm2726_vm7, %vm2725_vm4  ;;  %v1022_v34 = vadd.s32 216, %v6622_v16  ;;  %v3817_v29 = vshll.u32 %v3024_v11, 16 }
 0x228   : > { %10325 = vst [vmem:[#allocation52_spill] sm:$0xff] %v8824_v23  ;;  %v10328_v56 = vsel %vm8838_vm3, 4294967295, %v10327_v56  ;;  %v2780_v23 = vsel %vm8838_vm3, 0, %v7493_v3  ;;  %v8853_v14 = vrot.slane %v3894_v19, 7  ;;  %v4901_v19 = vadd.f32 %v8236_v41, %v8786_v36  ;;  %vm10333_vm4 = vmmov %vm10329_vm0 }
 0x229   : > { %v4984_v28 = vpop.f32.mrf.mxu2  ;;  %v8844_v25 = vrot.slane %v3814_v60, 7  ;;  %v2617_v13 = vor.u32 %v2615_v47, %v8831_v1  ;;  %v3897_v60 = vshll.u32 %v2838_v44, 16  ;;  %v1660_v2 = vand.u32 15, %v1022_v34  ;;  %vm10335_vm3 = vmmov %vm10333_vm4 }
 0x22a   : > { %v8814_v32 = vadd.f32 %v4984_v28, %v4896_v45  ;;  %5040 = vmatmul.bf16.gmra.mxu3 %v3764_v24  ;;  %5164 = vmatmul.bf16.gmra.mxu1 %v4164_v35  ;;  %v2468_v45 = vsel %vm2436_vm12, 65537, %v10054_v21  ;;  %v4224_v24 = vrot.slane %v4222_v62, 7  ;;  %v4225_v35 = vshll.u32 %v2810_v57, 16  ;;  %vm10332_vm12 = vmmov %vm10329_vm0 }
 0x22b   : > { %v3819_v22 = vor.u32 %v3817_v29, %v8844_v25  ;;  %v3025_v62 = vrot.slane %v2780_v23, 1  ;;  %v2618_v57 = vsel %vm10329_vm0, %v8750_v43, %v2617_v13  ;;  %v3899_v11 = vor.u32 %v3897_v60, %v8853_v14  ;;  %v6476_v60 = vld [vmem:[%s9838_s8] ss:$0 sm:$0xff] }
 0x22c   : > { %10323 = vst [vmem:[#allocation70_spill] sm:$0xff] %v8814_v32  ;;  %vm8864_vm1 = vcmp.eq.s32.totalorder %v1660_v2, 15  ;;  %vm10334_vm7 = vcmask 1046528   ;;  %v1024_v29 = vadd.s32 232, %v6622_v16 }
 0x22d   : > { %v4903_v8 = vpop.f32.mrf.mxu3  ;;  %5401 = vmatmul.bf16.gmra.mxu0 %v3844_v15  ;;  %v2500_v15 = vunpack.c.l.b16 %v2468_v45  ;;  %v3820_v23 = vsel %vm10332_vm12, %v8763_v6, %v3819_v22  ;;  %v3026_v34 = vsel %vm10334_vm7, %v8789_v26, %v3025_v62  ;;  %vm2438_vm0 = vmpackc.low %vm8864_vm1, %vm8864_vm1  ;;  %v3900_v41 = vsel %vm10335_vm3, %v8783_v40, %v3899_v11 }
 0x22e   : > { %5213 = vmatmul.bf16.gmra.mxu2 %v10326_v18  ;;  %v4227_v18 = vor.u32 %v4225_v35, %v4224_v24  ;;  %v3870_v36 = vshrl.u32 %v3026_v34, 16  ;;  %v2839_v26 = vsel %vm10233_vm13, 0, %v7725_v37  ;;  %v2470_v40 = vsel %vm2438_vm0, 65537, %v10054_v21 }
 0x22f   : > { %v2519_v47 = vpack.c.b16 %v2500_v15, %v6651_v31  ;;  %v8859_v45 = vpop.f32.mrf.mxu1  ;;  %v10336_v15 = vld [vmem:[#allocation24_spill] sm:$0xff]  ;;  %v10337_v22 = vmov 0  ;;  %v4904_v2 = vadd.f32 %v6476_v60, %v4903_v8  ;;  %vm10341_vm13 = vsmask.f32 256 }
 0x230   : > { %v4228_v43 = vsel %vm10333_vm4, %v8768_v9, %v4227_v18  ;;  %vm10343_vm1 = vmmov %vm10341_vm13  ;;  %vm10345_vm0 = vcmask 1046528  }
 0x231   : > { %v4987_v28 = vpop.f32.mrf.mxu2  ;;  %v2620_v24 = vshrl.u32 %v2519_v47, 16  ;;  %v2623_v18 = vshll.u32 %v2519_v47, 16  ;;  %v10340_v47 = vld [vmem:[#allocation5_spill] sm:$0xff]  ;;  %vm10344_vm7 = vmmov %vm10343_vm1 }
 0x232   : > { %v8848_v32 = vadd.f32 %v4987_v28, %v4899_v52  ;;  %v2728_v52 = vunpack.c.l.b16 %v2618_v57  ;;  %v2729_v28 = vunpack.c.h.b16 %v2618_v57  ;;  %v8900_v57 = vrot.slane %v3870_v36, 7 }
 0x233   : > { %v8886_v9 = vrot.slane %v2620_v24, 7  ;;  %v3388_v11 = vshrl.u32 %v10340_v47, 16  ;;  %v3953_v47 = vshll.u32 %v2839_v26, 16 }
 0x234   : > { %vm2732_vm12 = vcmp.ne.s32.totalorder %v2728_v52, %v6687_v63  ;;  %vm2733_vm4 = vcmp.ne.s32.totalorder %v2729_v28, %v6694_v4  ;;  %v2502_v28 = vunpack.c.l.b16 %v2470_v40 }
 0x235   : > { %v4905_v27 = vpop.f32.mrf.mxu3  ;;  %vm8891_vm3 = vmpackc.low %vm2733_vm4, %vm2732_vm12  ;;  %v2625_v52 = vor.u32 %v2623_v18, %v8886_v9  ;;  %v3390_v24 = vrot.slane %v3388_v11, 7  ;;  %v6393_v11 = vld [vmem:[%s9837_s7 + $0x150] sm:$0xff] }
 0x236   : > { %v10338_v22 = vsel %vm8891_vm3, 4294967295, %v10337_v22  ;;  %v2781_v8 = vsel %vm8891_vm3, 0, %v7606_v33  ;;  %v2520_v40 = vpack.c.b16 %v2502_v28, %v6651_v31  ;;  %5269 = vmatpush.bf16.msra.mxu3 %v6393_v11  ;;  %vm10349_vm4 = vmmov %vm10343_vm1 }
 0x237   : > { %10339 = vst [vmem:[#allocation24_spill] sm:$0xff] %v10338_v22  ;;  %v8898_v5 = vpop.f32.mrf.mxu1  ;;  %v2626_v18 = vsel %vm10341_vm13, %v8831_v1, %v2625_v52 }
 0x238   : > { %v2735_v1 = vunpack.c.l.b16 %v2626_v18 }
 0x239   : > { %v4989_v44 = vpop.f32.mrf.mxu2 }
 0x23a   : > { %v8874_v35 = vadd.f32 %v4989_v44, %v4901_v19  ;;  %5045 = vmatmul.bf16.gmra.mxu3 %v3820_v23  ;;  %5169 = vmatmul.bf16.gmra.mxu1 %v4228_v43  ;;  %v3873_v23 = vshll.u32 %v3026_v34, 16  ;;  %vm2739_vm13 = vcmp.ne.s32.totalorder %v2735_v1, %v6687_v63 }
 0x23c   : > { %v3875_v43 = vor.u32 %v3873_v23, %v8900_v57 }
 0x23d   : > { %v5006_v6 = vpop.f32.mrf.mxu3  ;;  %5406 = vmatmul.bf16.gmra.mxu0 %v3900_v41 }
 0x23e   : > { %v5007_v13 = vadd.f32 %v5006_v6, %v8263_v42  ;;  %5218 = vmatmul.bf16.gmra.mxu2 %v10336_v15  ;;  %v3950_v42 = vshrl.u32 %v2839_v26, 16  ;;  %v8913_v6 = vrot.slane %v2781_v8, 1  ;;  %v3876_v23 = vsel %vm10344_vm7, %v8844_v25, %v3875_v43 }
 0x23f   : > { %v2628_v26 = vshrl.u32 %v2520_v40, 16  ;;  %v2840_v43 = vsel %vm10252_vm11, 0, %v7843_v49  ;;  %vm10356_vm11 = vmmov %vm10349_vm4 }
 0x240   : > { %v8911_v41 = vrot.slane %v3950_v42, 7  ;;  %v4906_v42 = vadd.f32 %v6476_v60, %v4905_v27  ;;  %v3028_v28 = vsel %vm10345_vm0, %v3025_v62, %v8913_v6 }
 0x241   : > { %v4992_v19 = vpop.f32.mrf.mxu2  ;;  %v3926_v60 = vshrl.u32 %v3028_v28, 16 }
 0x242   : > { %v8905_v44 = vadd.f32 %v4992_v19, %v4904_v2  ;;  %v1674_v2 = vand.u32 15, %v1024_v29  ;;  %v10342_v19 = vld [vmem:[#allocation27_spill] sm:$0xff]  ;;  %v3955_v8 = vor.u32 %v3953_v47, %v8911_v41 }
 0x243   : > { %v3398_v22 = vsel %vm10343_vm1, %v3390_v24, %v10342_v19  ;;  %v8933_v24 = vpop.f32.mrf.mxu1  ;;  %v10351_v19 = vld [vmem:[#allocation9_spill] sm:$0xff] }
 0x244   : > { %vm8929_vm12 = vcmp.eq.s32.totalorder %v1674_v2, 15  ;;  %v3956_v25 = vsel %vm10349_vm4, %v8853_v14, %v3955_v8  ;;  %v6417_v2 = vld [vmem:[%s9837_s7 + $0x210] sm:$0xff]  ;;  %v5096_v11 = vadd.f32 %v10351_v19, %v5007_v13  ;;  %v1026_v8 = vadd.s32 248, %v6622_v16  ;;  %v10357_v16 = vld [vmem:[#allocation10_spill] sm:$0xff] }
 0x245   : > { %v5008_v36 = vpop.f32.mrf.mxu3  ;;  %vm2440_vm1 = vmpackc.low %vm8929_vm12, %vm8929_vm12  ;;  %5536 = vmatpush.bf16.msra.mxu2 %v6417_v2  ;;  %v4009_v19 = vshll.u32 %v2840_v43, 16 }
 0x246   : > { %v5009_v34 = vadd.f32 %v5008_v36, %v8301_v54  ;;  %v2736_v54 = vunpack.c.h.b16 %v2626_v18  ;;  %v8947_v36 = vrot.slane %v2628_v26, 7  ;;  %v10350_v18 = vld [vmem:[#allocation30_spill] sm:$0xff]  ;;  %v2472_v47 = vsel %vm2440_vm1, 65537, %v10054_v21  ;;  %vm10359_vm12 = vmmov %vm10349_vm4 }
 0x247   : > { %vm10363_vm1 = vmmov %vm10356_vm11 }
 0x248   : > { %vm2740_vm7 = vcmp.ne.s32.totalorder %v2736_v54, %v6694_v4  ;;  %v3929_v54 = vshll.u32 %v3028_v28, 16 }
 0x249   : > { %v4994_v52 = vpop.f32.mrf.mxu2  ;;  %vm8956_vm0 = vmpackc.low %vm2740_vm7, %vm2739_vm13  ;;  %vm10362_vm13 = vcmask 1046528  }
 0x24a   : > { %v8935_v27 = vadd.f32 %v4994_v52, %v4906_v42  ;;  %5050 = vmatmul.bf16.gmra.mxu3 %v3876_v23  ;;  %5450 = vmatmul.bf16.vlgmr.msra.gmra.mxu1 %v3398_v22  ;;  %v2631_v22 = vshll.u32 %v2520_v40, 16  ;;  %v4006_v42 = vshrl.u32 %v2840_v43, 16  ;;  %v10353_v10 = vsel %vm8956_vm0, 4294967295, %v10352_v10 }
 0x24b   : > { %10354 = vst [vmem:[#allocation27_spill] sm:$0xff] %v10353_v10  ;;  %v8960_v40 = vrot.slane %v3926_v60, 7  ;;  %v2504_v52 = vunpack.c.l.b16 %v2472_v47  ;;  %v2782_v13 = vsel %vm8956_vm0, 0, %v7725_v37  ;;  %v8969_v26 = vpop.f32.mrf.mxu1 }
 0x24c   : > { %10348 = vst [vmem:[#allocation5_spill] sm:$0xff] %v8935_v27  ;;  %v8971_v29 = vrot.slane %v4006_v42, 7  ;;  %v3029_v47 = vrot.slane %v2782_v13, 1  ;;  %v10366_v13 = vmov 0 }
 0x24d   : > { %v5011_v62 = vpop.f32.mrf.mxu3  ;;  %5411 = vmatmul.bf16.gmra.mxu0 %v3956_v25  ;;  %v3931_v60 = vor.u32 %v3929_v54, %v8960_v40  ;;  %v2521_v28 = vpack.c.b16 %v2504_v52, %v6651_v31 }
 0x24e   : > { %v5012_v14 = vadd.f32 %v5011_v62, %v8337_v38  ;;  %5223 = vmatmul.bf16.gmra.mxu2 %v10350_v18  ;;  %v2633_v38 = vor.u32 %v2631_v22, %v8947_v36  ;;  %v1688_v22 = vand.u32 15, %v1026_v8  ;;  %v4011_v42 = vor.u32 %v4009_v19, %v8971_v29 }
 0x24f   : > { %v3932_v54 = vsel %vm10359_vm12, %v8900_v57, %v3931_v60  ;;  %v10369_v60 = vld [vmem:[#allocation25_spill] sm:$0xff] }
 0x250   : > { %v2634_v62 = vsel %vm10356_vm11, %v8886_v9, %v2633_v38  ;;  %vm8984_vm4 = vcmp.eq.s32.totalorder %v1688_v22, 15  ;;  %v2636_v38 = vshrl.u32 %v2521_v28, 16  ;;  %v4012_v8 = vsel %vm10363_vm1, %v8911_v41, %v4011_v42  ;;  %v10365_v41 = vld [vmem:[#allocation35_spill] sm:$0xff] }
 0x251   : > { %v5184_v23 = vpop.f32.mrf.mxu2  ;;  %v2743_v37 = vunpack.c.h.b16 %v2634_v62  ;;  %vm2442_vm12 = vmpackc.low %vm8984_vm4, %vm8984_vm4 }
 0x252   : > { %v8964_v1 = vadd.f32 %v5184_v23, %v5096_v11  ;;  %v8978_v11 = vpop.f32.mrf.mxu0  ;;  %v10358_v23 = vld [vmem:[#allocation6_spill] sm:$0xff]  ;;  %vm10372_vm4 = vmmov %vm10363_vm1 }
 0x253   : > { %v5098_v10 = vadd.f32 %v10358_v23, %v5009_v34  ;;  %v3030_v34 = vsel %vm10362_vm13, %v8913_v6, %v3029_v47  ;;  %vm2747_vm11 = vcmp.ne.s32.totalorder %v2743_v37, %v6694_v4  ;;  %v9003_v6 = vpop.f32.mrf.mxu1  ;;  %v2639_v37 = vshll.u32 %v2521_v28, 16 }
 0x254   : > { %10355 = vst [vmem:[#allocation30_spill] sm:$0xff] %v8964_v1  ;;  %v2742_v1 = vunpack.c.l.b16 %v2634_v62  ;;  %v5101_v62 = vadd.f32 %v10369_v60, %v5012_v14  ;;  %v3985_v9 = vshll.u32 %v3030_v34, 16 }
 0x255   : > { %v5013_v25 = vpop.f32.mrf.mxu3 }
 0x256   : > { %v5014_v2 = vadd.f32 %v5013_v25, %v10357_v16  ;;  %vm2746_vm7 = vcmp.ne.s32.totalorder %v2742_v1, %v6687_v63  ;;  %v9007_v1 = vrot.slane %v2636_v38, 7  ;;  %v2474_v25 = vsel %vm2442_vm12, 65537, %v10054_v21 }
 0x257   : > { %vm9009_vm13 = vmpackc.low %vm2747_vm11, %vm2746_vm7 }
 0x258   : > { %v10367_v13 = vsel %vm9009_vm13, 4294967295, %v10366_v13  ;;  %v2783_v28 = vsel %vm9009_vm13, 0, %v7843_v49  ;;  %v2641_v42 = vor.u32 %v2639_v37, %v9007_v1  ;;  %v6392_v37 = vld [vmem:[%s9837_s7 + $0x148] sm:$0xff]  ;;  %vm10377_vm7 = vmmov %vm10372_vm4 }
 0x259   : > { %v5186_v27 = vpop.f32.mrf.mxu2  ;;  %10368 = vst [vmem:[#allocation9_spill] sm:$0xff] %v10367_v13  ;;  %5270 = vmatpush.bf16.msra.mxu3 %v6392_v37  ;;  %v6416_v37 = vld [vmem:[%s9837_s7 + $0x208] sm:$0xff]  ;;  %v10385_v13 = vld [vmem:[#allocation61_spill] sm:$0xff] }
 0x25a   : > { %v8988_v43 = vadd.f32 %v5186_v27, %v5098_v10  ;;  %5055 = vmatmul.bf16.gmra.mxu3 %v3932_v54  ;;  %5455 = vmatmul.bf16.gmra.mxu1 %v10255_v53  ;;  %v3982_v27 = vshrl.u32 %v3030_v34, 16  ;;  %v2841_v53 = vsel %vm10273_vm9, 0, %v7954_v50  ;;  %v10364_v10 = vld [vmem:[#allocation26_spill] sm:$0xff]  ;;  %v9015_v61 = vpop.f32.mrf.mxu0  ;;  %v2506_v54 = vunpack.c.l.b16 %v2474_v25  ;;  %vm10370_vm9 = vmmov %vm10363_vm1  ;;  %v10371_v34 = vld [vmem:[#allocation12_spill] sm:$0xff] }
 0x25b   : > { %v4062_v22 = vshrl.u32 %v2841_v53, 16  ;;  %v2642_v60 = vsel %vm10370_vm9, %v8947_v36, %v2641_v42  ;;  %v9035_v25 = vpop.f32.mrf.mxu1  ;;  %vm10375_vm1 = vcmask 1046528   ;;  %5537 = vmatpush.bf16.msra.mxu2 %v6416_v37 }
 0x25c   : > { %v9017_v19 = vrot.slane %v3982_v27, 7  ;;  %v4065_v27 = vshll.u32 %v2841_v53, 16  ;;  %v2749_v53 = vunpack.c.l.b16 %v2642_v60 }
 0x25d   : > { %v5016_v57 = vpop.f32.mrf.mxu3  ;;  %5416 = vmatmul.bf16.gmra.mxu0 %v4012_v8  ;;  %v9025_v38 = vrot.slane %v4062_v22, 7  ;;  %v5103_v22 = vadd.f32 %v10371_v34, %v5014_v2 }
 0x25e   : > { %v5017_v52 = vadd.f32 %v5016_v57, %v10364_v10  ;;  %5228 = vmatmul.bf16.gmra.mxu2 %v10365_v41  ;;  %v3987_v14 = vor.u32 %v3985_v9, %v9017_v19  ;;  %v3031_v57 = vrot.slane %v2783_v28, 1  ;;  %v2750_v28 = vunpack.c.h.b16 %v2642_v60 }
 0x25f   : > { %vm2753_vm11 = vcmp.ne.s32.totalorder %v2749_v53, %v6687_v63 }
 0x260   : > { %v3032_v42 = vsel %vm10375_vm1, %v3029_v47, %v3031_v57  ;;  %vm2754_vm12 = vcmp.ne.s32.totalorder %v2750_v28, %v6694_v4  ;;  %v10379_v47 = vld [vmem:[#allocation41_spill] sm:$0xff] }
 0x261   : > { %v5189_v16 = vpop.f32.mrf.mxu2  ;;  %v4038_v34 = vshrl.u32 %v3032_v42, 16  ;;  %vm9062_vm9 = vmpackc.low %vm2754_vm12, %vm2753_vm11 }
 0x262   : > { %v9019_v23 = vadd.f32 %v5189_v16, %v5101_v62  ;;  %v2522_v62 = vpack.c.b16 %v2506_v54, %v6651_v31  ;;  %v4067_v16 = vor.u32 %v4065_v27, %v9025_v38  ;;  %v10374_v31 = vld [vmem:[#allocation40_spill] sm:$0xff]  ;;  %v10382_v12 = vsel %vm9062_vm9, 4294967295, %v10381_v12 }
 0x263   : > { %10383 = vst [vmem:[#allocation26_spill] sm:$0xff] %v10382_v12  ;;  %v4040_v28 = vrot.slane %v4038_v34, 7 }
 0x264   : > { %v2644_v54 = vshrl.u32 %v2522_v62, 16  ;;  %v4068_v2 = vsel %vm10377_vm7, %v8971_v29, %v4067_v16  ;;  %v10380_v16 = vld [vmem:[#allocation59_spill] sm:$0xff]  ;;  %vm10388_vm7 = vmmov %vm10372_vm4 }
 0x265   : > { %v5018_v8 = vpop.f32.mrf.mxu3 }
 0x266   : > { %v5019_v10 = vadd.f32 %v5018_v8, %v8454_v59  ;;  %v3988_v59 = vsel %vm10372_vm4, %v8960_v40, %v3987_v14  ;;  %v9045_v8 = vpop.f32.mrf.mxu0  ;;  %v2842_v40 = vsel %vm10292_vm10, 0, %v8112_v39  ;;  %v10378_v14 = vld [vmem:[#allocation32_spill] sm:$0xff]  ;;  %v9059_v29 = vrot.slane %v2644_v54, 7  ;;  %vm10386_vm10 = vmmov %vm10372_vm4 }
 0x267   : > { %10376 = vst [vmem:[#allocation6_spill] sm:$0xff] %v9045_v8 }
 0x269   : > { %v5191_v9 = vpop.f32.mrf.mxu2 }
 0x26a   : > { %v9041_v36 = vadd.f32 %v5191_v9, %v5103_v22  ;;  %5060 = vmatmul.bf16.gmra.mxu3 %v3988_v59  ;;  %5460 = vmatmul.bf16.gmra.mxu1 %v10374_v31  ;;  %v2647_v22 = vshll.u32 %v2522_v62, 16  ;;  %v5106_v9 = vadd.f32 %v10380_v16, %v5017_v52  ;;  %v4118_v59 = vshrl.u32 %v2842_v40, 16  ;;  %v9066_v31 = vpop.f32.mrf.mxu1 }
 0x26b   : > { %v2784_v62 = vsel %vm9062_vm9, 0, %v7954_v50 }
 0x26c   : > { %10373 = vst [vmem:[#allocation10_spill] sm:$0xff] %v9041_v36  ;;  %v4120_v52 = vrot.slane %v4118_v59, 7  ;;  %v4121_v36 = vshll.u32 %v2842_v40, 16  ;;  %v3033_v34 = vrot.slane %v2784_v62, 1 }
 0x26d   : > { %v5021_v27 = vpop.f32.mrf.mxu3  ;;  %5421 = vmatmul.bf16.gmra.mxu0 %v4068_v2 }
 0x26e   : > { %v5022_v60 = vadd.f32 %v5021_v27, %v10378_v14  ;;  %5233 = vmatmul.bf16.gmra.mxu2 %v10379_v47  ;;  %v2649_v27 = vor.u32 %v2647_v22, %v9059_v29  ;;  %v4041_v14 = vshll.u32 %v3032_v42, 16  ;;  %v9074_v54 = vpop.f32.mrf.mxu0  ;;  %v4123_v22 = vor.u32 %v4121_v36, %v4120_v52 }
 0x270   : > { %v4043_v21 = vor.u32 %v4041_v14, %v4040_v28  ;;  %v10392_v14 = vmov 0 }
 0x271   : > { %v5194_v53 = vpop.f32.mrf.mxu2 }
 0x272   : > { %v9068_v2 = vadd.f32 %v5194_v53, %v5106_v9  ;;  %v2650_v9 = vsel %vm10386_vm10, %v9007_v1, %v2649_v27  ;;  %v10387_v53 = vld [vmem:[#allocation34_spill] sm:$0xff]  ;;  %v4044_v12 = vsel %vm10372_vm4, %v9017_v19, %v4043_v21  ;;  %v9086_v40 = vpop.f32.mrf.mxu1  ;;  %v4124_v1 = vsel %vm10388_vm7, %v9025_v38, %v4123_v22  ;;  %v10389_v19 = vld [vmem:[#allocation37_spill] sm:$0xff] }
 0x273   : > { %v2756_v50 = vunpack.c.l.b16 %v2650_v9  ;;  %v2757_v59 = vunpack.c.h.b16 %v2650_v9  ;;  %v2843_v21 = vsel %vm10306_vm14, 0, %v8215_v20  ;;  %vm10398_vm14 = vmmov %vm10372_vm4 }
 0x274   : > { %10384 = vst [vmem:[#allocation35_spill] sm:$0xff] %v9068_v2  ;;  %v5108_v2 = vadd.f32 %v10387_v53, %v5019_v10  ;;  %v4174_v38 = vshrl.u32 %v2843_v21, 16  ;;  %v4177_v22 = vshll.u32 %v2843_v21, 16  ;;  %v2763_v21 = vunpack.c.l.b16 %v9059_v29  ;;  %vm10400_vm4 = vmmov %vm10375_vm1 }
 0x275   : > { %v5023_v16 = vpop.f32.mrf.mxu3  ;;  %vm2760_vm11 = vcmp.ne.s32.totalorder %v2756_v50, %v6687_v63  ;;  %vm2761_vm12 = vcmp.ne.s32.totalorder %v2757_v59, %v6694_v4 }
 0x276   : > { %v5024_v37 = vadd.f32 %v5023_v16, %v10385_v13  ;;  %v3034_v13 = vsel %vm10375_vm1, %v3031_v57, %v3033_v34  ;;  %v9097_v57 = vpop.f32.mrf.mxu0  ;;  %vm9100_vm10 = vmpackc.low %vm2761_vm12, %vm2760_vm11  ;;  %v4176_v53 = vrot.slane %v4174_v38, 7 }
 0x277   : > { %v4094_v36 = vshrl.u32 %v3034_v13, 16  ;;  %v10393_v14 = vsel %vm9100_vm10, 4294967295, %v10392_v14  ;;  %v4097_v50 = vshll.u32 %v3034_v13, 16  ;;  %v2785_v9 = vsel %vm9100_vm10, 0, %v8112_v39  ;;  %vm10402_vm1 = vmmov %vm10388_vm7 }
 0x278   : > { %10394 = vst [vmem:[#allocation25_spill] sm:$0xff] %v10393_v14  ;;  %v4179_v13 = vor.u32 %v4177_v22, %v4176_v53  ;;  %vm9130_vm7 = vcmp.ne.s32.totalorder %v2763_v21, %v6687_v63  ;;  %vm10412_vm12 = vmmov %vm10402_vm1 }
 0x279   : > { %v5196_v42 = vpop.f32.mrf.mxu2  ;;  %v4096_v7 = vrot.slane %v4094_v36, 7  ;;  %v6391_v36 = vld [vmem:[%s9837_s7 + $0x140] sm:$0xff] }
 0x27a   : > { %v9082_v8 = vadd.f32 %v5196_v42, %v5108_v2  ;;  %5065 = vmatmul.bf16.gmra.mxu3 %v4044_v12  ;;  %5465 = vmatmul.bf16.gmra.mxu1 %v7917_v0  ;;  %v10390_v12 = vld [vmem:[#allocation45_spill] sm:$0xff]  ;;  %v10391_v2 = vld [vmem:[#allocation39_spill] sm:$0xff]  ;;  %v4180_v22 = vsel %vm10402_vm1, %v4120_v52, %v4179_v13  ;;  %v6415_v52 = vld [vmem:[%s9837_s7 + $0x200] sm:$0xff] }
 0x27b   : > { %v5111_v27 = vadd.f32 %v10391_v2, %v5022_v60  ;;  %v4099_v59 = vor.u32 %v4097_v50, %v4096_v7  ;;  %5271 = vmatpush.bf16.msra.mxu3 %v6391_v36  ;;  %v2764_v50 = vunpack.c.h.b16 %v9059_v29  ;;  %v10406_v29 = vmov 0  ;;  %5538 = vmatpush.bf16.msra.mxu2 %v6415_v52 }
 0x27d   : > { %v5026_v10 = vpop.f32.mrf.mxu3  ;;  %5426 = vmatmul.bf16.gmra.mxu0 %v4124_v1  ;;  %v9109_v1 = vpop.f32.mrf.mxu1  ;;  %v4100_v38 = vsel %vm10398_vm14, %v4040_v28, %v4099_v59  ;;  %v10403_v59 = vmov 0  ;;  %vm9135_vm11 = vcmp.ne.s32.totalorder %v2764_v50, %v6694_v4  ;;  %vm10415_vm14 = vmmov %vm10402_vm1  ;;  %vm10420_vm1 = vsmask.f32 7424 }
 0x27e   : > { %v5027_v0 = vadd.f32 %v5026_v10, %v10389_v19  ;;  %5238 = vmatmul.bf16.gmra.mxu2 %v10390_v12  ;;  %v3035_v10 = vrot.slane %v2785_v9, 1  ;;  %v10396_v19 = vld [vmem:[#allocation63_spill] sm:$0xff]  ;;  %v10401_v9 = vld [vmem:[#allocation2_spill] sm:$0xff]  ;;  %v10404_v59 = vsel %vm9130_vm7, 4294967295, %v10403_v59  ;;  %v10407_v29 = vsel %vm9135_vm11, 4294967295, %v10406_v29 }
 0x27f   : > { %v5113_v2 = vadd.f32 %v10396_v19, %v5024_v37  ;;  %v2844_v37 = vsel %vm8107_vm8, 0, %v10401_v9  ;;  %10405 = vst [vmem:[#allocation41_spill] sm:$0xff] %v10404_v59  ;;  %vm2769_vm8 = vmpackc.low %vm9135_vm11, %vm9130_vm7 }
 0x280   : > { %10408 = vst [vmem:[#allocation59_spill] sm:$0xff] %v10407_v29  ;;  %v4246_v48 = vshrl.u32 %v2844_v37, 16  ;;  %v5116_v63 = vadd.f32 %v8628_v55, %v5027_v0  ;;  %v4249_v13 = vshll.u32 %v2844_v37, 16  ;;  %v2786_v55 = vsel %vm2769_vm8, 0, %v8215_v20 }
 0x281   : > { %v5199_v62 = vpop.f32.mrf.mxu2 }
 0x282   : > { %v9104_v16 = vadd.f32 %v5199_v62, %v5111_v27  ;;  %v9116_v27 = vpop.f32.mrf.mxu0 }
 0x283   : > { %10397 = vst [vmem:[#allocation40_spill] sm:$0xff] %v9116_v27 }
 0x284   : > { %10395 = vst [vmem:[#allocation12_spill] sm:$0xff] %v9104_v16 }
 0x285   : > { %v5028_v42 = vpop.f32.mrf.mxu3  ;;  %v9144_v36 = vpop.f32.mrf.mxu1 }
 0x286   : > { %v5029_v60 = vadd.f32 %v5028_v42, %v8613_v51  ;;  %v3036_v51 = vsel %vm10400_vm4, %v3033_v34, %v3035_v10  ;;  %v10409_v34 = vld [vmem:[#allocation49_spill] sm:$0xff] }
 0x287   : > { %v4150_v28 = vshrl.u32 %v3036_v51, 16 }
 0x288   : > { %v5118_v37 = vadd.f32 %v8673_v17, %v5029_v60  ;;  %v10417_v60 = vld [vmem:[#allocation46_spill] sm:$0xff] }
 0x289   : > { %v5201_v62 = vpop.f32.mrf.mxu2  ;;  %v4152_v19 = vrot.slane %v4150_v28, 7  ;;  %v3040_v28 = vshll.u32 %v8215_v20, 16 }
 0x28a   : > { %v9121_v14 = vadd.f32 %v5201_v62, %v5113_v2  ;;  %5070 = vmatmul.bf16.gmra.mxu3 %v4100_v38  ;;  %5470 = vmatmul.bf16.gmra.mxu1 %v10309_v30  ;;  %v4248_v2 = vrot.slane %v4246_v48, 7  ;;  %v9153_v62 = vpop.f32.mrf.mxu0  ;;  %v4153_v38 = vshll.u32 %v3036_v51, 16 }
 0x28b   : > { %10411 = vst [vmem:[#allocation34_spill] sm:$0xff] %v9153_v62 }
 0x28c   : > { %10399 = vst [vmem:[#allocation32_spill] sm:$0xff] %v9121_v14  ;;  %v4155_v21 = vor.u32 %v4153_v38, %v4152_v19 }
 0x28d   : > { %v5031_v42 = vpop.f32.mrf.mxu3  ;;  %5431 = vmatmul.bf16.gmra.mxu0 %v4180_v22  ;;  %v4251_v22 = vor.u32 %v4249_v13, %v4248_v2  ;;  %v9165_v52 = vpop.f32.mrf.mxu1  ;;  %v3042_v2 = vrot.slane %v3040_v28, 1 }
 0x28e   : > { %v5032_v30 = vadd.f32 %v5031_v42, %v8652_v46  ;;  %5243 = vmatmul.bf16.gmra.mxu2 %v10409_v34  ;;  %v3037_v42 = vrot.slane %v2786_v55, 1  ;;  %v4156_v51 = vsel %vm10412_vm12, %v4096_v7, %v4155_v21  ;;  %v10418_v7 = vld [vmem:[#allocation55_spill] sm:$0xff]  ;;  %v10419_v21 = vld [vmem:[#allocation56_spill] sm:$0xff] }
 0x28f   : > { %v4252_v38 = vsel %vm10415_vm14, %v4176_v53, %v4251_v22  ;;  %vm10430_vm14 = vmmov %vm10400_vm4 }
 0x291   : > { %v5204_v4 = vpop.f32.mrf.mxu2 }
 0x292   : > { %v9151_v46 = vadd.f32 %v5204_v4, %v5116_v63  ;;  %v10414_v4 = vld [vmem:[#allocation20_spill] sm:$0xff]  ;;  %v9172_v13 = vpop.f32.mrf.mxu0 }
 0x293   : > { %10416 = vst [vmem:[#allocation45_spill] sm:$0xff] %v9172_v13 }
 0x294   : > { %10410 = vst [vmem:[#allocation61_spill] sm:$0xff] %v9151_v46  ;;  %v10425_v46 = vld [vmem:[#allocation3_spill] sm:$0xff] }
 0x295   : > { %v5033_v0 = vpop.f32.mrf.mxu3  ;;  %v9184_v29 = vpop.f32.mrf.mxu1 }
 0x296   : > { %v5034_v50 = vadd.f32 %v5033_v0, %v8697_v58  ;;  %v3038_v58 = vsel %vm10400_vm4, %v3035_v10, %v3037_v42  ;;  %v10423_v42 = vld [vmem:[#allocation4_spill] sm:$0xff]  ;;  %vm10432_vm4 = vmmov %vm10412_vm12 }
 0x297   : > { %v4214_v17 = vshrl.u32 %v3038_v58, 16  ;;  %v4217_v10 = vshll.u32 %v3038_v58, 16 }
 0x299   : > { %v5206_v48 = vpop.f32.mrf.mxu2  ;;  %v4216_v59 = vrot.slane %v4214_v17, 7 }
 0x29a   : > { %v9167_v63 = vadd.f32 %v5206_v48, %v5118_v37  ;;  %5075 = vmatmul.bf16.gmra.mxu3 %v4156_v51  ;;  %5475 = vmatmul.bf16.gmra.mxu1 %v10414_v4  ;;  %v3043_v37 = vsel %vm10420_vm1, %v10419_v21, %v3042_v2  ;;  %v10421_v48 = vld [vmem:[#allocation66_spill] sm:$0xff]  ;;  %vm10439_vm1 = vmmov %vm10432_vm4 }
 0x29b   : > { %v5121_v51 = vadd.f32 %v10421_v48, %v5032_v30  ;;  %v4126_v53 = vshrl.u32 %v3043_v37, 16  ;;  %v2811_v30 = vsel %vm8088_vm5, 0, %v10425_v46  ;;  %v10427_v48 = vld [vmem:[#allocation69_spill] sm:$0xff] }
 0x29c   : > { %10413 = vst [vmem:[#allocation37_spill] sm:$0xff] %v9167_v63 }
 0x29d   : > { %v5036_v55 = vpop.f32.mrf.mxu3  ;;  %5436 = vmatmul.bf16.gmra.mxu0 %v4252_v38  ;;  %v2812_v38 = vsel %vm8045_vm6, 0, %v10423_v42  ;;  %v9186_v63 = vrot.slane %v4126_v53, 7 }
 0x29e   : > { %v5037_v0 = vadd.f32 %v5036_v55, %v10417_v60  ;;  %5248 = vmatmul.bf16.gmra.mxu2 %v10418_v7  ;;  %v4219_v60 = vor.u32 %v4217_v10, %v4216_v59  ;;  %v3065_v13 = vrot.slane %v2812_v38, 1  ;;  %v3044_v59 = vshrl.u32 %v8215_v20, 16  ;;  %v10431_v38 = vld [vmem:[#allocation54_spill] sm:$0xff] }
 0x2a0   : > { %v4220_v62 = vsel %vm10412_vm12, %v4152_v19, %v4219_v60  ;;  %v9206_v19 = vpop.f32.mrf.mxu1  ;;  %v10433_v60 = vld [vmem:[#allocation17_spill] sm:$0xff]  ;;  %vm10441_vm12 = vmmov %vm10430_vm14 }
 0x2a1   : > { %v5209_v4 = vpop.f32.mrf.mxu2 }
 0x2a2   : > { %v9179_v22 = vadd.f32 %v5209_v4, %v5121_v51  ;;  %v4129_v51 = vshll.u32 %v3043_v37, 16  ;;  %v10428_v4 = vld [vmem:[#allocation51_spill] sm:$0xff] }
 0x2a3   : > { %v5123_v58 = vadd.f32 %v10428_v4, %v5034_v50 }
 0x2a4   : > { %10422 = vst [vmem:[#allocation39_spill] sm:$0xff] %v9179_v22  ;;  %v3064_v22 = vrot.slane %v2811_v30, 1  ;;  %v4131_v16 = vor.u32 %v4129_v51, %v9186_v63 }
 0x2a5   : > { %v5038_v55 = vpop.f32.mrf.mxu3 }
 0x2a6   : > { %v5039_v17 = vadd.f32 %v5038_v55, %v10427_v48  ;;  %v3066_v46 = vsel %vm10430_vm14, %v3064_v22, %v3065_v13  ;;  %v9202_v37 = vsel %vm10432_vm4, %v10431_v38, %v4131_v16  ;;  %v9204_v55 = vor.u32 %v3044_v59, %v3042_v2  ;;  %v10436_v38 = vld [vmem:[#allocation7_spill] sm:$0xff]  ;;  %vm10444_vm14 = vmmov %vm10441_vm12 }
 0x2a7   : > { %v3368_v50 = vshrl.u32 %v3066_v46, 16  ;;  %v3371_v16 = vshll.u32 %v3066_v46, 16  ;;  %v2813_v2 = vsel %vm8201_vm2, 0, %v10436_v38  ;;  %vm10450_vm4 = vmmov %vm10439_vm1 }
 0x2a8   : > { %v4230_v51 = vshrl.u32 %v9204_v55, 16 }
 0x2a9   : > { %v5211_v14 = vpop.f32.mrf.mxu2 }
 0x2aa   : > { %v9196_v53 = vadd.f32 %v5211_v14, %v5123_v58  ;;  %5080 = vmatmul.bf16.gmra.mxu3 %v4220_v62  ;;  %5480 = vmatmul.bf16.gmra.mxu1 %v10336_v15  ;;  %v10434_v14 = vld [vmem:[#allocation52_spill] sm:$0xff]  ;;  %v3370_v15 = vrot.slane %v3368_v50, 7  ;;  %v3364_v58 = vshrl.u32 %v3064_v22, 16  ;;  %v4232_v27 = vrot.slane %v4230_v51, 7 }
 0x2ab   : > { %v5126_v62 = vadd.f32 %v10434_v14, %v5037_v0  ;;  %v3067_v0 = vrot.slane %v2813_v2, 1  ;;  %v2846_v50 = vsel %vm8045_vm6, 0, %v10436_v38  ;;  %v5128_v22 = vadd.f32 %v8859_v45, %v5039_v17  ;;  %vm10442_vm6 = vmmov %vm10439_vm1 }
 0x2ac   : > { %10429 = vst [vmem:[#allocation63_spill] sm:$0xff] %v9196_v53  ;;  %v3373_v20 = vor.u32 %v3371_v16, %v3370_v15  ;;  %v3366_v14 = vrot.slane %v3364_v58, 7  ;;  %v2845_v51 = vsel %vm8088_vm5, 0, %v10423_v42  ;;  %v3123_v58 = vrot.slane %v2846_v50, 1  ;;  %v10446_v50 = vld [vmem:[#allocation8_spill] sm:$0xff] }
 0x2ad   : > { %v5041_v10 = vpop.f32.mrf.mxu3  ;;  %v3068_v28 = vsel %vm10441_vm12, %v3065_v13, %v3067_v0  ;;  %v3122_v38 = vrot.slane %v2845_v51, 1 }
 0x2ae   : > { %v5042_v30 = vadd.f32 %v5041_v10, %v10433_v60  ;;  %5253 = vmatmul.bf16.gmra.mxu2 %v9202_v37  ;;  %v4233_v10 = vshll.u32 %v9204_v55, 16  ;;  %v10438_v60 = vld [vmem:[#allocation23_spill] sm:$0xff]  ;;  %v3438_v17 = vshrl.u32 %v3068_v28, 16 }
 0x2af   : > { %v3124_v21 = vsel %vm10444_vm14, %v3122_v38, %v3123_v58  ;;  %vm10459_vm14 = vmmov %vm10450_vm4 }
 0x2b0   : > { %v5131_v42 = vadd.f32 %v8898_v5, %v5042_v30  ;;  %v3407_v5 = vshll.u32 %v3124_v21, 16  ;;  %v2847_v30 = vsel %vm8201_vm2, 0, %v10446_v50 }
 0x2b1   : > { %v5214_v48 = vpop.f32.mrf.mxu2 }
 0x2b2   : > { %v9212_v4 = vadd.f32 %v5214_v48, %v5126_v62  ;;  %v9222_v62 = vpop.f32.mrf.mxu1  ;;  %v3374_v48 = vsel %vm10439_vm1, %v3366_v14, %v3373_v20  ;;  %v10443_v20 = vld [vmem:[#allocation13_spill] sm:$0xff]  ;;  %v3441_v14 = vshll.u32 %v3068_v28, 16  ;;  %vm10451_vm1 = vmmov %vm10441_vm12 }
 0x2b3   : > { %vm10452_vm12 = vmmov %vm10450_vm4 }
 0x2b4   : > { %10435 = vst [vmem:[#allocation2_spill] sm:$0xff] %v9212_v4  ;;  %v4235_v4 = vor.u32 %v4233_v10, %v4232_v27  ;;  %v3440_v10 = vrot.slane %v3438_v17, 7  ;;  %vm10454_vm2 = vmmov %vm10451_vm1 }
 0x2b5   : > { %v5043_v59 = vpop.f32.mrf.mxu3 }
 0x2b6   : > { %v5044_v39 = vadd.f32 %v5043_v59, %v10438_v60  ;;  %v4236_v45 = vsel %vm10442_vm6, %v9186_v63, %v4235_v4  ;;  %v3404_v60 = vshrl.u32 %v3124_v21, 16 }
 0x2b8   : > { %v3406_v51 = vrot.slane %v3404_v60, 7  ;;  %v5133_v17 = vadd.f32 %v8933_v24, %v5044_v39  ;;  %v10453_v39 = vld [vmem:[#allocation31_spill] sm:$0xff] }
 0x2b9   : > { %v5216_v46 = vpop.f32.mrf.mxu2 }
 0x2ba   : > { %v9229_v16 = vadd.f32 %v5216_v46, %v5128_v22  ;;  %5272 = vmatmul.bf16.vlgmr.msra.gmra.mxu3 %v3374_v48  ;;  %5485 = vmatmul.bf16.gmra.mxu1 %v10350_v18  ;;  %v9238_v18 = vpop.f32.mrf.mxu1  ;;  %v10447_v22 = vld [vmem:[#allocation19_spill] sm:$0xff]  ;;  %v3443_v48 = vor.u32 %v3441_v14, %v3440_v10  ;;  %v3125_v14 = vrot.slane %v2847_v30, 1  ;;  %v10456_v30 = vld [vmem:[#allocation21_spill] sm:$0xff] }
 0x2bb   : > { %vm10448_vm5 = vnez %v10447_v22  ;;  %vm10457_vm6 = vnez %v10456_v30  ;;  %v10462_v22 = vld [vmem:[#allocation36_spill] sm:$0xff] }
 0x2bc   : > { %10440 = vst [vmem:[#allocation49_spill] sm:$0xff] %v9229_v16  ;;  %v2814_v4 = vsel %vm10448_vm5, 0, %v10446_v50  ;;  %v3400_v16 = vshrl.u32 %v3122_v38, 16  ;;  %v3444_v28 = vsel %vm10450_vm4, %v3370_v15, %v3443_v48  ;;  %v3126_v15 = vsel %vm10454_vm2, %v3123_v58, %v3125_v14  ;;  %vm10460_vm4 = vmmov %vm10451_vm1 }
 0x2bd   : > { %v5046_v2 = vpop.f32.mrf.mxu3 }
 0x2be   : > { %v5047_v27 = vadd.f32 %v5046_v2, %v10443_v20  ;;  %5258 = vmatmul.bf16.gmra.mxu2 %v4236_v45  ;;  %v10449_v2 = vld [vmem:[#allocation28_spill] sm:$0xff]  ;;  %v3069_v20 = vrot.slane %v2814_v4, 1  ;;  %v3402_v38 = vrot.slane %v3400_v16, 7  ;;  %v10455_v16 = vld [vmem:[#allocation11_spill] sm:$0xff] }
 0x2c0   : > { %v3070_v60 = vsel %vm10451_vm1, %v3067_v0, %v3069_v20  ;;  %vm10461_vm1 = vmmov %vm10452_vm12 }
 0x2c1   : > { %v5219_v59 = vpop.f32.mrf.mxu2  ;;  %v3494_v50 = vshrl.u32 %v3070_v60, 16  ;;  %v3497_v0 = vshll.u32 %v3070_v60, 16 }
 0x2c2   : > { %v9240_v13 = vadd.f32 %v5219_v59, %v5131_v42  ;;  %v3409_v59 = vor.u32 %v3407_v5, %v3406_v51  ;;  %v9255_v21 = vpop.f32.mrf.mxu1 }
 0x2c4   : > { %10445 = vst [vmem:[#allocation20_spill] sm:$0xff] %v9240_v13  ;;  %v3410_v53 = vsel %vm10452_vm12, %v3402_v38, %v3409_v59 }
 0x2c5   : > { %v5048_v46 = vpop.f32.mrf.mxu3 }
 0x2c6   : > { %v5049_v45 = vadd.f32 %v5048_v46, %v10449_v2  ;;  %v5136_v46 = vadd.f32 %v8969_v26, %v5047_v27  ;;  %v3496_v2 = vrot.slane %v3494_v50, 7  ;;  %v2848_v26 = vsel %vm10448_vm5, 0, %v10455_v16  ;;  %vm10463_vm5 = vmmov %vm10454_vm2 }
 0x2c7   : > { %vm10469_vm2 = vmmov %vm10461_vm1 }
 0x2c8   : > { %v5138_v27 = vadd.f32 %v9003_v6, %v5049_v45 }
 0x2c9   : > { %v5221_v42 = vpop.f32.mrf.mxu2 }
 0x2ca   : > { %v9251_v13 = vadd.f32 %v5221_v42, %v5133_v17  ;;  %5277 = vmatmul.bf16.gmra.mxu3 %v3444_v28  ;;  %5490 = vmatmul.bf16.gmra.mxu1 %v10365_v41  ;;  %v3462_v41 = vshrl.u32 %v3126_v15, 16  ;;  %v2815_v17 = vsel %vm10457_vm6, 0, %v10455_v16  ;;  %v3499_v28 = vor.u32 %v3497_v0, %v3496_v2  ;;  %v9266_v38 = vpop.f32.mrf.mxu1 }
 0x2cb   : > { %v3071_v58 = vrot.slane %v2815_v17, 1  ;;  %v3127_v0 = vrot.slane %v2848_v26, 1  ;;  %v10465_v26 = vld [vmem:[#allocation14_spill] sm:$0xff] }
 0x2cc   : > { %v3464_v59 = vrot.slane %v3462_v41, 7  ;;  %v3500_v50 = vsel %vm10459_vm14, %v3440_v10, %v3499_v28  ;;  %vm10470_vm14 = vmmov %vm10460_vm4 }
 0x2cd   : > { %v5051_v4 = vpop.f32.mrf.mxu3  ;;  %v3072_v41 = vsel %vm10460_vm4, %v3069_v20, %v3071_v58  ;;  %v3128_v6 = vsel %vm10463_vm5, %v3125_v14, %v3127_v0  ;;  %vm10471_vm4 = vmmov %vm10461_vm1 }
 0x2ce   : > { %v5052_v24 = vadd.f32 %v5051_v4, %v10453_v39  ;;  %5539 = vmatmul.bf16.vlgmr.msra.gmra.mxu2 %v3410_v53  ;;  %v10458_v4 = vld [vmem:[#allocation33_spill] sm:$0xff]  ;;  %v3465_v39 = vshll.u32 %v3126_v15, 16  ;;  %v3553_v20 = vshll.u32 %v3072_v41, 16 }
 0x2d0   : > { %v5141_v10 = vadd.f32 %v9035_v25, %v5052_v24  ;;  %v2849_v25 = vsel %vm10457_vm6, 0, %v10465_v26  ;;  %vm10473_vm6 = vmmov %vm10463_vm5 }
 0x2d1   : > { %v5224_v48 = vpop.f32.mrf.mxu2  ;;  %vm10478_vm5 = vmmov %vm10469_vm2 }
 0x2d2   : > { %v9261_v5 = vadd.f32 %v5224_v48, %v5136_v46  ;;  %v3467_v46 = vor.u32 %v3465_v39, %v3464_v59  ;;  %v9281_v45 = vpop.f32.mrf.mxu1  ;;  %v3518_v39 = vshrl.u32 %v3128_v6, 16 }
 0x2d4   : > { %v3468_v15 = vsel %vm10461_vm1, %v3406_v51, %v3467_v46  ;;  %v3520_v46 = vrot.slane %v3518_v39, 7 }
 0x2d5   : > { %v5053_v42 = vpop.f32.mrf.mxu3 }
 0x2d6   : > { %v5054_v53 = vadd.f32 %v5053_v42, %v10458_v4  ;;  %v3550_v42 = vshrl.u32 %v3072_v41, 16 }
 0x2d8   : > { %v3552_v4 = vrot.slane %v3550_v42, 7  ;;  %v5143_v24 = vadd.f32 %v9066_v31, %v5054_v53 }
 0x2d9   : > { %v5226_v60 = vpop.f32.mrf.mxu2 }
 0x2da   : > { %v9274_v48 = vadd.f32 %v5226_v60, %v5138_v27  ;;  %5282 = vmatmul.bf16.gmra.mxu3 %v3500_v50  ;;  %5495 = vmatmul.bf16.gmra.mxu1 %v10379_v47  ;;  %v10466_v27 = vld [vmem:[#allocation29_spill] sm:$0xff]  ;;  %v3555_v50 = vor.u32 %v3553_v20, %v3552_v4 }
 0x2db   : > { %vm10467_vm12 = vnez %v10466_v27 }
 0x2dc   : > { %v2816_v51 = vsel %vm10467_vm12, 0, %v10465_v26  ;;  %v3556_v41 = vsel %vm10469_vm2, %v3496_v2, %v3555_v50  ;;  %vm10480_vm2 = vmmov %vm10473_vm6 }
 0x2dd   : > { %v5056_v17 = vpop.f32.mrf.mxu3  ;;  %v3073_v14 = vrot.slane %v2816_v51, 1  ;;  %v10472_v51 = vld [vmem:[#allocation42_spill] sm:$0xff] }
 0x2de   : > { %v5057_v16 = vadd.f32 %v5056_v17, %v10462_v22  ;;  %5544 = vmatmul.bf16.gmra.mxu2 %v3468_v15  ;;  %v10468_v17 = vld [vmem:[#allocation62_spill] sm:$0xff]  ;;  %v3521_v22 = vshll.u32 %v3128_v6, 16  ;;  %v3129_v6 = vrot.slane %v2849_v25, 1 }
 0x2df   : > { %v3074_v39 = vsel %vm10470_vm14, %v3071_v58, %v3073_v14  ;;  %v10475_v58 = vld [vmem:[#allocation60_spill] sm:$0xff]  ;;  %vm10481_vm14 = vmmov %vm10471_vm4 }
 0x2e0   : > { %v3606_v26 = vshrl.u32 %v3074_v39, 16  ;;  %v3130_v2 = vsel %vm10473_vm6, %v3127_v0, %v3129_v6  ;;  %v5146_v53 = vadd.f32 %v9086_v40, %v5057_v16  ;;  %vm10476_vm1 = vnez %v10475_v58  ;;  %vm10488_vm6 = vmmov %vm10478_vm5 }
 0x2e1   : > { %v5229_v28 = vpop.f32.mrf.mxu2 }
 0x2e2   : > { %v9284_v47 = vadd.f32 %v5229_v28, %v5141_v10  ;;  %v3523_v10 = vor.u32 %v3521_v22, %v3520_v46  ;;  %v9295_v28 = vpop.f32.mrf.mxu1  ;;  %v3608_v50 = vrot.slane %v3606_v26, 7 }
 0x2e4   : > { %10464 = vst [vmem:[#allocation46_spill] sm:$0xff] %v9284_v47  ;;  %v3524_v30 = vsel %vm10471_vm4, %v3464_v59, %v3523_v10 }
 0x2e5   : > { %v5058_v60 = vpop.f32.mrf.mxu3 }
 0x2e6   : > { %v5059_v15 = vadd.f32 %v5058_v60, %v10468_v17  ;;  %v3574_v17 = vshrl.u32 %v3130_v2, 16 }
 0x2e8   : > { %v3576_v10 = vrot.slane %v3574_v17, 7  ;;  %v5148_v16 = vadd.f32 %v9109_v1, %v5059_v15 }
 0x2e9   : > { %v5231_v42 = vpop.f32.mrf.mxu2 }
 0x2ea   : > { %v9297_v47 = vadd.f32 %v5231_v42, %v5143_v24  ;;  %5287 = vmatmul.bf16.gmra.mxu3 %v3556_v41  ;;  %5500 = vmatmul.bf16.gmra.mxu1 %v10390_v12  ;;  %v3609_v12 = vshll.u32 %v3074_v39, 16  ;;  %v10474_v24 = vld [vmem:[#allocation15_spill] sm:$0xff]  ;;  %v9310_v42 = vpop.f32.mrf.mxu1 }
 0x2eb   : > { %v2817_v25 = vsel %vm10476_vm1, 0, %v10474_v24  ;;  %v2850_v40 = vsel %vm10467_vm12, 0, %v10474_v24  ;;  %v10482_v24 = vld [vmem:[#allocation65_spill] sm:$0xff]  ;;  %vm10483_vm12 = vmmov %vm10480_vm2 }
 0x2ec   : > { %v3611_v41 = vor.u32 %v3609_v12, %v3608_v50  ;;  %v3075_v0 = vrot.slane %v2817_v25, 1  ;;  %v3131_v12 = vrot.slane %v2850_v40, 1  ;;  %v10484_v40 = vld [vmem:[#allocation18_spill] sm:$0xff] }
 0x2ed   : > { %v5061_v20 = vpop.f32.mrf.mxu3 }
 0x2ee   : > { %v5062_v31 = vadd.f32 %v5061_v20, %v10472_v51  ;;  %5549 = vmatmul.bf16.gmra.mxu2 %v3524_v30  ;;  %v10477_v20 = vld [vmem:[#allocation44_spill] sm:$0xff]  ;;  %v3577_v51 = vshll.u32 %v3130_v2, 16  ;;  %v3612_v26 = vsel %vm10478_vm5, %v3552_v4, %v3611_v41  ;;  %v3076_v17 = vsel %vm10480_vm2, %v3073_v14, %v3075_v0  ;;  %vm10490_vm5 = vmmov %vm10480_vm2 }
 0x2ef   : > { %v3132_v4 = vsel %vm10483_vm12, %v3129_v6, %v3131_v12  ;;  %v3665_v14 = vshll.u32 %v3076_v17, 16  ;;  %vm10491_vm2 = vmmov %vm10488_vm6 }
 0x2f0   : > { %v5151_v15 = vadd.f32 %v9144_v36, %v5062_v31  ;;  %v2851_v36 = vsel %vm10476_vm1, 0, %v10484_v40  ;;  %vm10493_vm1 = vmmov %vm10490_vm5 }
 0x2f1   : > { %v5234_v60 = vpop.f32.mrf.mxu2  ;;  %vm10499_vm12 = vmmov %vm10491_vm2 }
 0x2f2   : > { %v9305_v22 = vadd.f32 %v5234_v60, %v5146_v53  ;;  %v3579_v53 = vor.u32 %v3577_v51, %v3576_v10  ;;  %v9323_v27 = vpop.f32.mrf.mxu1  ;;  %v3630_v51 = vshrl.u32 %v3132_v4, 16 }
 0x2f4   : > { %v3580_v2 = vsel %vm10481_vm14, %v3520_v46, %v3579_v53  ;;  %v3632_v53 = vrot.slane %v3630_v51, 7 }
 0x2f5   : > { %v5063_v59 = vpop.f32.mrf.mxu3 }
 0x2f6   : > { %v5064_v30 = vadd.f32 %v5063_v59, %v10477_v20  ;;  %v3662_v59 = vshrl.u32 %v3076_v17, 16 }
 0x2f8   : > { %v3664_v20 = vrot.slane %v3662_v59, 7  ;;  %v5153_v31 = vadd.f32 %v9165_v52, %v5064_v30 }
 0x2f9   : > { %v5236_v39 = vpop.f32.mrf.mxu2 }
 0x2fa   : > { %v9318_v60 = vadd.f32 %v5236_v39, %v5148_v16  ;;  %5292 = vmatmul.bf16.gmra.mxu3 %v3612_v26  ;;  %5505 = vmatmul.bf16.gmra.mxu1 %v10409_v34  ;;  %v10485_v16 = vld [vmem:[#allocation64_spill] sm:$0xff]  ;;  %v3667_v26 = vor.u32 %v3665_v14, %v3664_v20  ;;  %v9337_v6 = vpop.f32.mrf.mxu1 }
 0x2fb   : > { %vm10486_vm4 = vnez %v10485_v16 }
 0x2fc   : > { %10479 = vst [vmem:[#allocation55_spill] sm:$0xff] %v9318_v60  ;;  %v2818_v46 = vsel %vm10486_vm4, 0, %v10484_v40  ;;  %v10487_v60 = vld [vmem:[#allocation67_spill] sm:$0xff]  ;;  %v3668_v59 = vsel %vm10488_vm6, %v3608_v50, %v3667_v26  ;;  %v10492_v40 = vld [vmem:[#allocation68_spill] sm:$0xff]  ;;  %vm10500_vm6 = vmmov %vm10493_vm1 }
 0x2fd   : > { %v5066_v25 = vpop.f32.mrf.mxu3 }
 0x2fe   : > { %v5067_v1 = vadd.f32 %v5066_v25, %v10482_v24  ;;  %5554 = vmatmul.bf16.gmra.mxu2 %v3580_v2  ;;  %v3077_v2 = vrot.slane %v2818_v46, 1  ;;  %v3633_v24 = vshll.u32 %v3132_v4, 16  ;;  %v3133_v4 = vrot.slane %v2851_v36, 1 }
 0x300   : > { %v3134_v52 = vsel %vm10493_vm1, %v3131_v12, %v3133_v4  ;;  %v5156_v50 = vadd.f32 %v9184_v29, %v5067_v1  ;;  %v10498_v12 = vld [vmem:[#allocation70_spill] sm:$0xff] }
 0x301   : > { %v5239_v41 = vpop.f32.mrf.mxu2  ;;  %v3686_v26 = vshrl.u32 %v3134_v52, 16 }
 0x302   : > { %v9328_v34 = vadd.f32 %v5239_v41, %v5151_v15  ;;  %v3635_v15 = vor.u32 %v3633_v24, %v3632_v53  ;;  %v9349_v24 = vpop.f32.mrf.mxu1 }
 0x304   : > { %v3636_v58 = vsel %vm10491_vm2, %v3576_v10, %v3635_v15  ;;  %v10496_v10 = vld [vmem:[#allocation43_spill] sm:$0xff] }
 0x305   : > { %v5068_v39 = vpop.f32.mrf.mxu3  ;;  %vm10497_vm14 = vnez %v10496_v10 }
 0x306   : > { %v5069_v25 = vadd.f32 %v5068_v39, %v10487_v60  ;;  %v3078_v60 = vsel %vm10490_vm5, %v3075_v0, %v3077_v2  ;;  %v3098_v0 = vshll.u32 %v10401_v9, 16  ;;  %vm10501_vm5 = vsmask.f32 7424 }
 0x307   : > { %v3718_v14 = vshrl.u32 %v3078_v60, 16  ;;  %v3721_v36 = vshll.u32 %v3078_v60, 16 }
 0x308   : > { %v3100_v1 = vrot.slane %v3098_v0, 1 }
 0x309   : > { %v5241_v17 = vpop.f32.mrf.mxu2  ;;  %v3720_v39 = vrot.slane %v3718_v14, 7  ;;  %v3689_v14 = vshll.u32 %v3134_v52, 16 }
 0x30a   : > { %v9341_v41 = vadd.f32 %v5241_v17, %v5153_v31  ;;  %5297 = vmatmul.bf16.gmra.mxu3 %v3668_v59  ;;  %5510 = vmatmul.bf16.gmra.mxu1 %v10418_v7  ;;  %v10495_v31 = vld [vmem:[#allocation22_spill] sm:$0xff]  ;;  %v3101_v52 = vsel %vm10501_vm5, %v9204_v55, %v3100_v1 }
 0x30b   : > { %v2819_v17 = vsel %vm10497_vm14, 0, %v10495_v31  ;;  %v3723_v15 = vor.u32 %v3721_v36, %v3720_v39  ;;  %v9369_v36 = vpop.f32.mrf.mxu1 }
 0x30c   : > { %10489 = vst [vmem:[#allocation56_spill] sm:$0xff] %v9341_v41  ;;  %v3079_v29 = vrot.slane %v2819_v17, 1 }
 0x30d   : > { %v5071_v51 = vpop.f32.mrf.mxu3  ;;  %v3724_v60 = vsel %vm10499_vm12, %v3664_v20, %v3723_v15 }
 0x30e   : > { %v5072_v46 = vadd.f32 %v5071_v51, %v10492_v40  ;;  %5559 = vmatmul.bf16.gmra.mxu2 %v3636_v58  ;;  %v3688_v51 = vrot.slane %v3686_v26, 7  ;;  %v2852_v40 = vsel %vm10486_vm4, 0, %v10495_v31  ;;  %v3080_v26 = vsel %vm10500_vm6, %v3077_v2, %v3079_v29  ;;  %vm10502_vm4 = vmmov %vm10491_vm2 }
 0x30f   : > { %v3135_v0 = vrot.slane %v2852_v40, 1  ;;  %v4182_v31 = vshrl.u32 %v3101_v52, 16  ;;  %vm10503_vm2 = vmmov %vm10493_vm1  ;;  %v3777_v40 = vshll.u32 %v3080_v26, 16 }
 0x310   : > { %vm10505_vm1 = vmmov %vm10502_vm4 }
 0x311   : > { %v5244_v30 = vpop.f32.mrf.mxu2  ;;  %v3136_v17 = vsel %vm10503_vm2, %v3133_v4, %v3135_v0  ;;  %v4184_v15 = vrot.slane %v4182_v31, 7  ;;  %v3102_v4 = vshrl.u32 %v10401_v9, 16  ;;  %vm10506_vm12 = vmmov %vm10505_vm1 }
 0x312   : > { %v9351_v7 = vadd.f32 %v5244_v30, %v5156_v50  ;;  %v5158_v50 = vadd.f32 %v9206_v19, %v5069_v25  ;;  %v3774_v25 = vshrl.u32 %v3080_v26, 16  ;;  %v3742_v55 = vshrl.u32 %v3136_v17, 16  ;;  %vm10507_vm6 = vmmov %vm10503_vm2 }
 0x313   : > { %v2853_v26 = vsel %vm10497_vm14, 0, %v7493_v3  ;;  %vm10508_vm5 = vmmov %vm10505_vm1 }
 0x314   : > { %10494 = vst [vmem:[#allocation66_spill] sm:$0xff] %v9351_v7  ;;  %v3691_v7 = vor.u32 %v3689_v14, %v3688_v51  ;;  %v3776_v2 = vrot.slane %v3774_v25, 7  ;;  %vm10509_vm14 = vmmov %vm10503_vm2 }
 0x315   : > { %v5073_v59 = vpop.f32.mrf.mxu3  ;;  %vm10512_vm2 = vmmov %vm10505_vm1 }
 0x316   : > { %v5074_v58 = vadd.f32 %v5073_v59, %v10498_v12  ;;  %v3692_v19 = vsel %vm10502_vm4, %v3632_v53, %v3691_v7  ;;  %v4185_v12 = vshll.u32 %v3101_v52, 16  ;;  %v2820_v53 = vsel %vm8754_vm15, 0, %v7493_v3 }
 0x317   : > { %v3745_v52 = vshll.u32 %v3136_v17, 16  ;;  %v3137_v17 = vrot.slane %v2853_v26, 1  ;;  %vm10510_vm4 = vnez %v10328_v56 }
 0x319   : > { %v5246_v30 = vpop.f32.mrf.mxu2 }
 0x31a   : > { %v9363_v41 = vadd.f32 %v5246_v30, %v5158_v50  ;;  %5302 = vmatmul.bf16.gmra.mxu3 %v3724_v60  ;;  %5515 = vmatmul.bf16.gmra.mxu1 %v9202_v37  ;;  %v5161_v37 = vadd.f32 %v9222_v62, %v5072_v46  ;;  %v3779_v30 = vor.u32 %v3777_v40, %v3776_v2  ;;  %v3744_v60 = vrot.slane %v3742_v55, 7 }
 0x31b   : > { %v3081_v46 = vrot.slane %v2820_v53, 1 }
 0x31c   : > { %v3780_v31 = vsel %vm10505_vm1, %v3720_v39, %v3779_v30  ;;  %v3138_v39 = vsel %vm10509_vm14, %v3135_v0, %v3137_v17 }
 0x31d   : > { %v5076_v16 = vpop.f32.mrf.mxu3 }
 0x31e   : > { %v5077_v20 = vadd.f32 %v5076_v16, %v8848_v32  ;;  %5564 = vmatmul.bf16.gmra.mxu2 %v3692_v19  ;;  %v4187_v32 = vor.u32 %v4185_v12, %v4184_v15  ;;  %v9381_v16 = vpop.f32.mrf.mxu1  ;;  %v5163_v19 = vadd.f32 %v9238_v18, %v5074_v58  ;;  %v3104_v12 = vor.u32 %v3102_v4, %v3100_v1 }
 0x320   : > { %v4254_v18 = vshrl.u32 %v3104_v12, 16  ;;  %v5166_v1 = vadd.f32 %v9255_v21, %v5077_v20  ;;  %v3801_v21 = vshll.u32 %v3138_v39, 16  ;;  %v2854_v20 = vsel %vm8754_vm15, 0, %v7606_v33 }
 0x321   : > { %v5249_v59 = vpop.f32.mrf.mxu2 }
 0x322   : > { %v9375_v14 = vadd.f32 %v5249_v59, %v5161_v37  ;;  %v4188_v37 = vsel %vm10506_vm12, %v9186_v63, %v4187_v32  ;;  %v3747_v59 = vor.u32 %v3745_v52, %v3744_v60  ;;  %v4256_v30 = vrot.slane %v4254_v18, 7  ;;  %vm10513_vm12 = vmmov %vm10507_vm6 }
 0x323   : > { %v4257_v32 = vshll.u32 %v3104_v12, 16  ;;  %vm10515_vm15 = vmmov %vm10513_vm12 }
 0x324   : > { %v3748_v3 = vsel %vm10508_vm5, %v3688_v51, %v3747_v59  ;;  %v2821_v51 = vsel %vm10510_vm4, 0, %v7606_v33  ;;  %vm10519_vm5 = vmmov %vm10505_vm1 }
 0x325   : > { %v5078_v7 = vpop.f32.mrf.mxu3  ;;  %vm10520_vm14 = vmmov %vm10513_vm12 }
 0x326   : > { %v5079_v62 = vadd.f32 %v5078_v7, %v8874_v35  ;;  %v3082_v35 = vsel %vm10507_vm6, %v3079_v29, %v3081_v46  ;;  %v9397_v63 = vpop.f32.mrf.mxu1  ;;  %v3798_v29 = vshrl.u32 %v3138_v39, 16  ;;  %vm10514_vm6 = vmmov %vm10505_vm1 }
 0x327   : > { %v3830_v10 = vshrl.u32 %v3082_v35, 16  ;;  %v3833_v52 = vshll.u32 %v3082_v35, 16 }
 0x328   : > { %v3800_v0 = vrot.slane %v3798_v29, 7  ;;  %v5168_v59 = vadd.f32 %v9266_v38, %v5079_v62 }
 0x329   : > { %v5251_v25 = vpop.f32.mrf.mxu2  ;;  %v3832_v7 = vrot.slane %v3830_v10, 7 }
 0x32a   : > { %v9391_v55 = vadd.f32 %v5251_v25, %v5163_v19  ;;  %5307 = vmatmul.bf16.gmra.mxu3 %v3780_v31  ;;  %5520 = vmatmul.bf16.gmra.mxu1 %v4188_v37  ;;  %v4259_v19 = vor.u32 %v4257_v32, %v4256_v30  ;;  %v10511_v25 = vld [vmem:[#allocation5_spill] sm:$0xff]  ;;  %v3083_v37 = vrot.slane %v2821_v51, 1  ;;  %v9465_v51 = vpop.f32.mrf.mxu0 }
 0x32b   : > { %v3835_v26 = vor.u32 %v3833_v52, %v3832_v7  ;;  %v10516_v52 = vld [vmem:[#allocation38_spill] sm:$0xff] }
 0x32c   : > { %v3084_v39 = vsel %vm10513_vm12, %v3081_v46, %v3083_v37  ;;  %v2822_v46 = vsel %vm8891_vm3, 0, %v10516_v52 }
 0x32d   : > { %v5081_v40 = vpop.f32.mrf.mxu3  ;;  %v3836_v35 = vsel %vm10512_vm2, %v3776_v2, %v3835_v26  ;;  %v3886_v50 = vshrl.u32 %v3084_v39, 16  ;;  %v3889_v29 = vshll.u32 %v3084_v39, 16  ;;  %vm10521_vm2 = vmmov %vm10505_vm1 }
 0x32e   : > { %v5082_v58 = vadd.f32 %v5081_v40, %v8905_v44  ;;  %5569 = vmatmul.bf16.gmra.mxu2 %v3748_v3  ;;  %v4260_v40 = vsel %vm10505_vm1, %v4184_v15, %v4259_v19  ;;  %v3803_v3 = vor.u32 %v3801_v21, %v3800_v0  ;;  %v9412_v10 = vpop.f32.mrf.mxu1 }
 0x32f   : > { %v3888_v62 = vrot.slane %v3886_v50, 7 }
 0x330   : > { %v3804_v33 = vsel %vm10514_vm6, %v3744_v60, %v3803_v3  ;;  %v5171_v2 = vadd.f32 %v9281_v45, %v5082_v58  ;;  %v3085_v60 = vrot.slane %v2822_v46, 1  ;;  %v2855_v45 = vsel %vm10510_vm4, 0, %v10516_v52  ;;  %vm10522_vm4 = vmmov %vm10513_vm12 }
 0x331   : > { %v5254_v53 = vpop.f32.mrf.mxu2  ;;  %v3891_v26 = vor.u32 %v3889_v29, %v3888_v62  ;;  %v3141_v3 = vrot.slane %v2855_v45, 1  ;;  %v2856_v46 = vsel %vm8891_vm3, 0, %v7843_v49  ;;  %vm10524_vm12 = vmmov %vm10522_vm4 }
 0x332   : > { %v9400_v4 = vadd.f32 %v5254_v53, %v5166_v1  ;;  %v3139_v1 = vrot.slane %v2854_v20, 1  ;;  %vm10526_vm3 = vmmov %vm10505_vm1 }
 0x333   : > { %vm10527_vm6 = vmmov %vm10522_vm4 }
 0x334   : > { %v3140_v38 = vsel %vm10515_vm15, %v3137_v17, %v3139_v1  ;;  %v10518_v17 = vld [vmem:[#allocation30_spill] sm:$0xff]  ;;  %vm10532_vm15 = vmmov %vm10505_vm1 }
 0x335   : > { %v5083_v44 = vpop.f32.mrf.mxu3  ;;  %v3854_v30 = vshrl.u32 %v3140_v38, 16 }
 0x336   : > { %v5084_v31 = vadd.f32 %v5083_v44, %v10511_v25  ;;  %v3857_v25 = vshll.u32 %v3140_v38, 16 }
 0x337   : > { %v3856_v19 = vrot.slane %v3854_v30, 7 }
 0x338   : > { %v5173_v21 = vadd.f32 %v9295_v28, %v5084_v31  ;;  %v3142_v28 = vsel %vm10522_vm4, %v3139_v1, %v3141_v3  ;;  %v2823_v1 = vsel %vm8956_vm0, 0, %v7843_v49 }
 0x339   : > { %v5256_v12 = vpop.f32.mrf.mxu2  ;;  %v3087_v29 = vrot.slane %v2823_v1, 1  ;;  %v3913_v52 = vshll.u32 %v3142_v28, 16 }
 0x33a   : > { %v9414_v18 = vadd.f32 %v5256_v12, %v5168_v59  ;;  %5312 = vmatmul.bf16.gmra.mxu3 %v3836_v35  ;;  %5525 = vmatmul.bf16.gmra.mxu1 %v4260_v40  ;;  %v3892_v59 = vsel %vm10519_vm5, %v3832_v7, %v3891_v26  ;;  %v3859_v12 = vor.u32 %v3857_v25, %v3856_v19  ;;  %vm10533_vm5 = vmmov %vm10522_vm4 }
 0x33b   : > { %v3086_v40 = vsel %vm10520_vm14, %v3083_v37, %v3085_v60  ;;  %vm10535_vm14 = vmmov %vm10522_vm4 }
 0x33c   : > { %v3860_v56 = vsel %vm10521_vm2, %v3800_v0, %v3859_v12  ;;  %v3942_v50 = vshrl.u32 %v3086_v40, 16  ;;  %v3945_v0 = vshll.u32 %v3086_v40, 16  ;;  %v9469_v12 = vpop.f32.mrf.mxu1  ;;  %v10528_v40 = vld [vmem:[#allocation10_spill] sm:$0xff] }
 0x33d   : > { %v5273_v53 = vpop.f32.mrf.mxu3 }
 0x33e   : > { %5574 = vmatmul.bf16.gmra.mxu2 %v3804_v33  ;;  %v5274_v58 = vadd.f32 %v5273_v53, %v10518_v17  ;;  %v3910_v53 = vshrl.u32 %v3142_v28, 16 }
 0x340   : > { %v5363_v39 = vadd.f32 %v8978_v11, %v5274_v58  ;;  %v3944_v11 = vrot.slane %v3942_v50, 7  ;;  %v3912_v30 = vrot.slane %v3910_v53, 7  ;;  %v3088_v58 = vsel %vm10524_vm12, %v3085_v60, %v3087_v29 }
 0x341   : > { %v5259_v15 = vpop.f32.mrf.mxu2 }
 0x342   : > { %v9420_v32 = vadd.f32 %v5259_v15, %v5171_v2  ;;  %v5452_v7 = vadd.f32 %v9310_v42, %v5363_v39  ;;  %v3947_v15 = vor.u32 %v3945_v0, %v3944_v11 }
 0x344   : > { %v3948_v45 = vsel %vm10505_vm1, %v3888_v62, %v3947_v15 }
 0x345   : > { %v5275_v44 = vpop.f32.mrf.mxu3 }
 0x346   : > { %v5276_v31 = vadd.f32 %v5275_v44, %v8988_v43 }
 0x348   : > { %v5365_v43 = vadd.f32 %v9015_v61, %v5276_v31  ;;  %v3915_v61 = vor.u32 %v3913_v52, %v3912_v30  ;;  %v4001_v31 = vshll.u32 %v3088_v58, 16  ;;  %v10531_v52 = vld [vmem:[#allocation35_spill] sm:$0xff] }
 0x349   : > { %v5261_v20 = vpop.f32.mrf.mxu2 }
 0x34a   : > { %v9431_v35 = vadd.f32 %v5261_v20, %v5173_v21  ;;  %5317 = vmatmul.bf16.gmra.mxu3 %v3892_v59  ;;  %v5454_v26 = vadd.f32 %v9323_v27, %v5365_v43  ;;  %v3143_v21 = vrot.slane %v2856_v46, 1  ;;  %v10525_v20 = vld [vmem:[#allocation6_spill] sm:$0xff]  ;;  %v3998_v27 = vshrl.u32 %v3088_v58, 16 }
 0x34c   : > { %v3144_v62 = vsel %vm10527_vm6, %v3141_v3, %v3143_v21 }
 0x34d   : > { %v5278_v33 = vpop.f32.mrf.mxu3  ;;  %v3966_v50 = vshrl.u32 %v3144_v62, 16 }
 0x34e   : > { %5579 = vmatmul.bf16.gmra.mxu2 %v3860_v56  ;;  %v5279_v44 = vadd.f32 %v5278_v33, %v9019_v23  ;;  %v3916_v23 = vsel %vm10526_vm3, %v3856_v19, %v3915_v61  ;;  %v4000_v56 = vrot.slane %v3998_v27, 7 }
 0x34f   : > { %v3968_v1 = vrot.slane %v3966_v50, 7 }
 0x350   : > { %v5368_v59 = vadd.f32 %v10525_v20, %v5279_v44  ;;  %v4003_v0 = vor.u32 %v4001_v31, %v4000_v56 }
 0x351   : > { %v5540_v37 = vpop.f32.mrf.mxu2 }
 0x352   : > { %v9445_v38 = vadd.f32 %v5540_v37, %v5452_v7  ;;  %v5457_v60 = vadd.f32 %v9337_v6, %v5368_v59  ;;  %v10529_v7 = vld [vmem:[#allocation47_spill] sm:$0xff]  ;;  %v9481_v6 = vpop.f32.mrf.mxu0 }
 0x353   : > { %v2824_v19 = vsel %vm9009_vm13, 0, %v10529_v7  ;;  %v2857_v15 = vsel %vm8956_vm0, 0, %v10529_v7  ;;  %vm10534_vm0 = vmmov %vm10505_vm1  ;;  %v10538_v7 = vld [vmem:[#allocation40_spill] sm:$0xff] }
 0x354   : > { %5620 = vst [vmem:[%s9443_s21] sm:$0xff] %v9445_v38  ;;  %v3089_v43 = vrot.slane %v2824_v19, 1  ;;  %v3145_v20 = vrot.slane %v2857_v15, 1  ;;  %vm10540_vm2 = vmmov %vm10534_vm0 }
 0x355   : > { %v5280_v42 = vpop.f32.mrf.mxu3  ;;  %vm10543_vm1 = vmmov %vm10522_vm4 }
 0x356   : > { %v5281_v39 = vadd.f32 %v5280_v42, %v10528_v40  ;;  %v3969_v42 = vshll.u32 %v3144_v62, 16  ;;  %v3090_v58 = vsel %vm10533_vm5, %v3087_v29, %v3089_v43  ;;  %vm10549_vm12 = vmmov %vm10534_vm0 }
 0x357   : > { %vm10550_vm3 = vmmov %vm10543_vm1 }
 0x358   : > { %v5370_v53 = vadd.f32 %v9074_v54, %v5281_v39  ;;  %v4004_v54 = vsel %vm10532_vm15, %v3944_v11, %v4003_v0  ;;  %v3146_v11 = vsel %vm10535_vm14, %v3143_v21, %v3145_v20  ;;  %vm10552_vm6 = vmmov %vm10543_vm1 }
 0x359   : > { %v5542_v25 = vpop.f32.mrf.mxu2  ;;  %v4022_v39 = vshrl.u32 %v3146_v11, 16  ;;  %vm10557_vm7 = vmmov %vm10534_vm0 }
 0x35a   : > { %v9459_v17 = vadd.f32 %v5542_v25, %v5454_v26  ;;  %5322 = vmatmul.bf16.gmra.mxu3 %v3948_v45  ;;  %v5459_v44 = vadd.f32 %v9349_v24, %v5370_v53  ;;  %v3971_v25 = vor.u32 %v3969_v42, %v3968_v1  ;;  %v9489_v45 = vpop.f32.mrf.mxu1  ;;  %v9501_v62 = vpop.f32.mrf.mxu0  ;;  %v10539_v42 = vld [vmem:[#allocation12_spill] sm:$0xff]  ;;  %vm10558_vm11 = vmmov %vm10543_vm1 }
 0x35b   : > { %v4024_v19 = vrot.slane %v4022_v39, 7  ;;  %vm10563_vm15 = vmmov %vm10534_vm0 }
 0x35c   : > { %5621 = vst [vmem:[%s9443_s21 + $0x8] sm:$0xff] %v9459_v17  ;;  %v3972_v24 = vsel %vm10534_vm0, %v3912_v30, %v3971_v25  ;;  %vm10565_vm5 = vmmov %vm10534_vm0 }
 0x35d   : > { %v5283_v49 = vpop.f32.mrf.mxu3  ;;  %vm10569_vm14 = vmmov %vm10540_vm2 }
 0x35e   : > { %5584 = vmatmul.bf16.gmra.mxu2 %v3916_v23  ;;  %v5284_v46 = vadd.f32 %v5283_v49, %v10531_v52  ;;  %v4054_v49 = vshrl.u32 %v3090_v58, 16 }
 0x360   : > { %v5373_v59 = vadd.f32 %v9097_v57, %v5284_v46  ;;  %v4056_v40 = vrot.slane %v4054_v49, 7 }
 0x361   : > { %v5545_v33 = vpop.f32.mrf.mxu2 }
 0x362   : > { %v9473_v28 = vadd.f32 %v5545_v33, %v5457_v60  ;;  %v5462_v27 = vadd.f32 %v9369_v36, %v5373_v59  ;;  %v4057_v60 = vshll.u32 %v3090_v58, 16  ;;  %v10536_v33 = vld [vmem:[#allocation53_spill] sm:$0xff]  ;;  %v9508_v31 = vpop.f32.mrf.mxu1  ;;  %v9522_v59 = vpop.f32.mrf.mxu0 }
 0x363   : > { %v2825_v30 = vsel %vm9062_vm9, 0, %v10536_v33  ;;  %v2858_v0 = vsel %vm9009_vm13, 0, %v10536_v33  ;;  %vm10542_vm13 = vmmov %vm10534_vm0 }
 0x364   : > { %5622 = vst [vmem:[%s9443_s21 + $0x10] sm:$0xff] %v9473_v28  ;;  %v4059_v36 = vor.u32 %v4057_v60, %v4056_v40  ;;  %v3091_v53 = vrot.slane %v2825_v30, 1  ;;  %v3147_v58 = vrot.slane %v2858_v0, 1 }
 0x365   : > { %v5285_v3 = vpop.f32.mrf.mxu3 }
 0x366   : > { %v5286_v23 = vadd.f32 %v5285_v3, %v9082_v8  ;;  %v4025_v3 = vshll.u32 %v3146_v11, 16  ;;  %v3092_v25 = vsel %vm10522_vm4, %v3089_v43, %v3091_v53 }
 0x367   : > { %v4113_v30 = vshll.u32 %v3092_v25, 16 }
 0x368   : > { %v5375_v21 = vadd.f32 %v10538_v7, %v5286_v23  ;;  %v10544_v23 = vld [vmem:[#allocation32_spill] sm:$0xff]  ;;  %v10545_v7 = vld [vmem:[#allocation58_spill] sm:$0xff] }
 0x369   : > { %v5547_v26 = vpop.f32.mrf.mxu2 }
 0x36a   : > { %v9491_v61 = vadd.f32 %v5547_v26, %v5459_v44  ;;  %5327 = vmatmul.bf16.gmra.mxu3 %v4004_v54  ;;  %v5464_v52 = vadd.f32 %v9381_v16, %v5375_v21  ;;  %v4060_v44 = vsel %vm10540_vm2, %v4000_v56, %v4059_v36  ;;  %v4027_v26 = vor.u32 %v4025_v3, %v4024_v19  ;;  %v9528_v11 = vpop.f32.mrf.mxu1  ;;  %v10547_v36 = vld [vmem:[#allocation45_spill] sm:$0xff]  ;;  %v9541_v0 = vpop.f32.mrf.mxu0 }
 0x36b   : > { %v3148_v56 = vsel %vm10543_vm1, %v3145_v20, %v3147_v58  ;;  %vm5791_vm2 = vcmask 1040384  }
 0x36c   : > { %5623 = vst [vmem:[%s9443_s21 + $0x18] sm:$0xff] %v9491_v61  ;;  %v4028_v16 = vsel %vm10542_vm13, %v3968_v1, %v4027_v26  ;;  %v4078_v60 = vshrl.u32 %v3148_v56, 16  ;;  %v2826_v1 = vsel %vm9100_vm10, 0, %v10545_v7 }
 0x36d   : > { %v5288_v2 = vpop.f32.mrf.mxu3 }
 0x36e   : > { %5589 = vmatmul.bf16.gmra.mxu2 %v3972_v24  ;;  %v5289_v15 = vadd.f32 %v5288_v2, %v10539_v42  ;;  %v10541_v24 = vld [vmem:[#allocation34_spill] sm:$0xff]  ;;  %v4110_v2 = vshrl.u32 %v3092_v25, 16  ;;  %v3093_v42 = vrot.slane %v2826_v1, 1 }
 0x370   : > { %v5378_v49 = vadd.f32 %v10541_v24, %v5289_v15  ;;  %v4112_v39 = vrot.slane %v4110_v2, 7  ;;  %v4081_v15 = vshll.u32 %v3148_v56, 16 }
 0x371   : > { %v5550_v29 = vpop.f32.mrf.mxu2 }
 0x372   : > { %v9503_v57 = vadd.f32 %v5550_v29, %v5462_v27  ;;  %v5467_v43 = vadd.f32 %v9397_v63, %v5378_v49  ;;  %v4080_v63 = vrot.slane %v4078_v60, 7 }
 0x374   : > { %5624 = vst [vmem:[%s9443_s21 + $0x20] sm:$0xff] %v9503_v57 }
 0x375   : > { %v5290_v8 = vpop.f32.mrf.mxu3 }
 0x376   : > { %v5291_v27 = vadd.f32 %v5290_v8, %v10544_v23  ;;  %v4115_v8 = vor.u32 %v4113_v30, %v4112_v39  ;;  %v3094_v23 = vsel %vm10550_vm3, %v3091_v53, %v3093_v42 }
 0x378   : > { %v5380_v3 = vadd.f32 %v10547_v36, %v5291_v27  ;;  %v4116_v49 = vsel %vm10549_vm12, %v4056_v40, %v4115_v8  ;;  %v9559_v40 = vpop.f32.mrf.mxu0 }
 0x379   : > { %v5552_v46 = vpop.f32.mrf.mxu2 }
 0x37a   : > { %v9519_v54 = vadd.f32 %v5552_v46, %v5464_v52  ;;  %5332 = vmatmul.bf16.gmra.mxu3 %v4060_v44  ;;  %v2859_v52 = vsel %vm9062_vm9, 0, %v10545_v7  ;;  %v9546_v46 = vpop.f32.mrf.mxu1  ;;  %v10548_v44 = vld [vmem:[#allocation61_spill] sm:$0xff]  ;;  %v5469_v25 = vadd.f32 %v9412_v10, %v5380_v3  ;;  %vm10551_vm9 = vmmov %vm10534_vm0  ;;  %v4169_v3 = vshll.u32 %v3094_v23, 16 }
 0x37b   : > { %v3149_v56 = vrot.slane %v2859_v52, 1 }
 0x37c   : > { %5625 = vst [vmem:[%s9443_s21 + $0x28] sm:$0xff] %v9519_v54 }
 0x37d   : > { %v5293_v37 = vpop.f32.mrf.mxu3  ;;  %v3150_v10 = vsel %vm10552_vm6, %v3147_v58, %v3149_v56  ;;  %v2827_v58 = vsel %vm2769_vm8, 0, %v10401_v9  ;;  %vm10560_vm8 = vmmov %vm10543_vm1 }
 0x37e   : > { %5594 = vmatmul.bf16.gmra.mxu2 %v4028_v16  ;;  %v5294_v26 = vadd.f32 %v5293_v37, %v10548_v44  ;;  %v4083_v16 = vor.u32 %v4081_v15, %v4080_v63  ;;  %v4134_v1 = vshrl.u32 %v3150_v10, 16  ;;  %v3095_v44 = vrot.slane %v2827_v58, 1 }
 0x380   : > { %v5383_v27 = vadd.f32 %v9465_v51, %v5294_v26  ;;  %v4084_v37 = vsel %vm10551_vm9, %v4024_v19, %v4083_v16  ;;  %v4136_v52 = vrot.slane %v4134_v1, 7  ;;  %v4137_v26 = vshll.u32 %v3150_v10, 16 }
 0x381   : > { %v5555_v29 = vpop.f32.mrf.mxu2 }
 0x382   : > { %v9533_v33 = vadd.f32 %v5555_v29, %v5467_v43  ;;  %v4166_v43 = vshrl.u32 %v3094_v23, 16  ;;  %v10553_v29 = vld [vmem:[#allocation37_spill] sm:$0xff]  ;;  %v5472_v30 = vadd.f32 %v9469_v12, %v5383_v27  ;;  %v9563_v51 = vpop.f32.mrf.mxu1  ;;  %v9581_v23 = vpop.f32.mrf.mxu0 }
 0x384   : > { %5626 = vst [vmem:[%s9443_s21 + $0x30] sm:$0xff] %v9533_v33  ;;  %v4168_v7 = vrot.slane %v4166_v43, 7 }
 0x385   : > { %v5295_v20 = vpop.f32.mrf.mxu3 }
 0x386   : > { %v5296_v60 = vadd.f32 %v5295_v20, %v10553_v29  ;;  %v4171_v20 = vor.u32 %v4169_v3, %v4168_v7  ;;  %v3096_v29 = vsel %vm10558_vm11, %v3093_v42, %v3095_v44 }
 0x387   : > { %v4241_v19 = vshll.u32 %v3096_v29, 16 }
 0x388   : > { %v5385_v15 = vadd.f32 %v9481_v6, %v5296_v60  ;;  %v4172_v6 = vsel %vm10557_vm7, %v4112_v39, %v4171_v20 }
 0x389   : > { %v5557_v24 = vpop.f32.mrf.mxu2 }
 0x38a   : > { %v9551_v2 = vadd.f32 %v5557_v24, %v5469_v25  ;;  %5337 = vmatmul.bf16.gmra.mxu3 %v4116_v49  ;;  %v2860_v25 = vsel %vm9100_vm10, 0, %v10401_v9  ;;  %v10556_v24 = vld [vmem:[#allocation39_spill] sm:$0xff]  ;;  %v5474_v16 = vadd.f32 %v9489_v45, %v5385_v15  ;;  %v5486_v60 = vpop.f32.mrf.mxu1  ;;  %vm10559_vm10 = vmmov %vm10534_vm0 }
 0x38b   : > { %v3151_v10 = vrot.slane %v2860_v25, 1  ;;  %vm10566_vm0 = vmmov %vm10543_vm1 }
 0x38c   : > { %5627 = vst [vmem:[%s9443_s21 + $0x38] sm:$0xff] %v9551_v2 }
 0x38d   : > { %v5298_v50 = vpop.f32.mrf.mxu3  ;;  %v3152_v39 = vsel %vm10560_vm8, %v3149_v56, %v3151_v10 }
 0x38e   : > { %5599 = vmatmul.bf16.gmra.mxu2 %v4084_v37  ;;  %v5299_v49 = vadd.f32 %v5298_v50, %v10556_v24  ;;  %v4139_v37 = vor.u32 %v4137_v26, %v4136_v52  ;;  %v4238_v50 = vshrl.u32 %v3096_v29, 16  ;;  %v4190_v8 = vshrl.u32 %v3152_v39, 16 }
 0x38f   : > { %v4193_v56 = vshll.u32 %v3152_v39, 16 }
 0x390   : > { %v5388_v21 = vadd.f32 %v9501_v62, %v5299_v49  ;;  %v4140_v45 = vsel %vm10559_vm10, %v4080_v63, %v4139_v37  ;;  %v4240_v42 = vrot.slane %v4238_v50, 7  ;;  %v5399_v62 = vpop.f32.mrf.mxu0  ;;  %v4192_v44 = vrot.slane %v4190_v8, 7  ;;  %v10568_v8 = vld [vmem:[#allocation20_spill] sm:$0xff] }
 0x391   : > { %v5560_v53 = vpop.f32.mrf.mxu2 }
 0x392   : > { %v9565_v36 = vadd.f32 %v5560_v53, %v5472_v30  ;;  %v10561_v30 = vld [vmem:[#allocation63_spill] sm:$0xff]  ;;  %v5477_v1 = vadd.f32 %v9508_v31, %v5388_v21  ;;  %v4243_v20 = vor.u32 %v4241_v19, %v4240_v42  ;;  %v5488_v26 = vpop.f32.mrf.mxu1 }
 0x394   : > { %5628 = vst [vmem:[%s9443_s21 + $0x40] sm:$0xff] %v9565_v36  ;;  %v4244_v49 = vsel %vm10563_vm15, %v4168_v7, %v4243_v20  ;;  %v10567_v7 = vld [vmem:[#allocation49_spill] sm:$0xff] }
 0x395   : > { %v5300_v12 = vpop.f32.mrf.mxu3 }
 0x396   : > { %v5301_v53 = vadd.f32 %v5300_v12, %v10561_v30  ;;  %v10562_v12 = vld [vmem:[#allocation2_spill] sm:$0xff] }
 0x398   : > { %v5390_v15 = vadd.f32 %v9522_v59, %v5301_v53  ;;  %v10564_v59 = vmov 0   ;;  %v5402_v29 = vpop.f32.mrf.mxu0 }
 0x399   : > { %v5562_v27 = vpop.f32.mrf.mxu2 }
 0x39a   : > { %v9584_v43 = vadd.f32 %v5562_v27, %v5474_v16  ;;  %5342 = vmatmul.bf16.gmra.mxu3 %v4172_v6  ;;  %v5479_v31 = vadd.f32 %v9528_v11, %v5390_v15  ;;  %v4195_v16 = vor.u32 %v4193_v56, %v4192_v44  ;;  %v3153_v6 = vrot.slane %v10564_v59, 1 }
 0x39c   : > { %5629 = vst [vmem:[%s9443_s21 + $0x48] sm:$0xff] %v9584_v43  ;;  %v3154_v11 = vsel %vm10566_vm0, %v3151_v10, %v3153_v6 }
 0x39d   : > { %v5303_v9 = vpop.f32.mrf.mxu3  ;;  %v4262_v53 = vshrl.u32 %v3154_v11, 16 }
 0x39e   : > { %5604 = vmatmul.bf16.gmra.mxu2 %v4140_v45  ;;  %v5304_v25 = vadd.f32 %v5303_v9, %v10562_v12  ;;  %v4196_v9 = vsel %vm10565_vm5, %v4136_v52, %v4195_v16  ;;  %v5491_v45 = vpop.f32.mrf.mxu1  ;;  %v4265_v52 = vshll.u32 %v3154_v11, 16 }
 0x39f   : > { %v4264_v42 = vrot.slane %v4262_v53, 7 }
 0x3a0   : > { %v5393_v37 = vadd.f32 %v9541_v0, %v5304_v25  ;;  %v5404_v19 = vpop.f32.mrf.mxu0 }
 0x3a1   : > { %v5565_v3 = vpop.f32.mrf.mxu2 }
 0x3a2   : > { %v9594_v58 = vadd.f32 %v5565_v3, %v5477_v1  ;;  %v5482_v39 = vadd.f32 %v9546_v46, %v5393_v37  ;;  %v4267_v46 = vor.u32 %v4265_v52, %v4264_v42 }
 0x3a4   : > { %5630 = vst [vmem:[%s9443_s21 + $0x50] sm:$0xff] %v9594_v58  ;;  %v4268_v25 = vsel %vm10569_vm14, %v4192_v44, %v4267_v46 }
 0x3a5   : > { %v5305_v63 = vpop.f32.mrf.mxu3 }
 0x3a6   : > { %v5306_v50 = vadd.f32 %v5305_v63, %v10567_v7  ;;  %v5493_v20 = vpop.f32.mrf.mxu1 }
 0x3a8   : > { %v5395_v0 = vadd.f32 %v9559_v40, %v5306_v50 }
 0x3a9   : > { %v5567_v24 = vpop.f32.mrf.mxu2 }
 0x3aa   : > { %v9602_v27 = vadd.f32 %v5567_v24, %v5479_v31  ;;  %5347 = vmatmul.bf16.gmra.mxu3 %v4244_v49  ;;  %v5484_v15 = vadd.f32 %v9563_v51, %v5395_v0  ;;  %v5407_v49 = vpop.f32.mrf.mxu0 }
 0x3ac   : > { %5631 = vst [vmem:[%s9443_s21 + $0x58] sm:$0xff] %v9602_v27 }
 0x3ad   : > { %v5308_v21 = vpop.f32.mrf.mxu3 }
 0x3ae   : > { %5609 = vmatmul.bf16.gmra.mxu2 %v4196_v9  ;;  %v5309_v10 = vadd.f32 %v5308_v21, %v10568_v8  ;;  %v5496_v59 = vpop.f32.mrf.mxu1 }
 0x3b0   : > { %v5398_v12 = vadd.f32 %v9581_v23, %v5309_v10 }
 0x3b1   : > { %v5570_v30 = vpop.f32.mrf.mxu2 }
 0x3b2   : > { %v9612_v1 = vadd.f32 %v5570_v30, %v5482_v39  ;;  %v5487_v24 = vadd.f32 %v5486_v60, %v5398_v12  ;;  %v5409_v11 = vpop.f32.mrf.mxu0 }
 0x3b4   : > { %5632 = vst [vmem:[%s9443_s21 + $0x60] sm:$0xff] %v9612_v1 }
 0x3b5   : > { %v5310_v3 = vpop.f32.mrf.mxu3 }
 0x3b6   : > { %v5311_v31 = vadd.f32 %v5310_v3, %v9251_v13  ;;  %v5498_v60 = vpop.f32.mrf.mxu1  ;;  %v10570_v3 = vld [vmem:[#allocation46_spill] sm:$0xff] }
 0x3b8   : > { %v5400_v6 = vadd.f32 %v5399_v62, %v5311_v31 }
 0x3b9   : > { %v5572_v63 = vpop.f32.mrf.mxu2 }
 0x3ba   : > { %v9619_v56 = vadd.f32 %v5572_v63, %v5484_v15  ;;  %v5489_v21 = vadd.f32 %v5488_v26, %v5400_v6 }
 0x3bc   : > { %5633 = vst [vmem:[%s9443_s21 + $0x68] sm:$0xff] %v9619_v56 }
 0x3bd   : > { %v5313_v40 = vpop.f32.mrf.mxu3 }
 0x3be   : > { %5614 = vmatmul.bf16.gmra.mxu2 %v4268_v25  ;;  %v5314_v37 = vadd.f32 %v5313_v40, %v9261_v5  ;;  %v5412_v5 = vpop.f32.mrf.mxu0  ;;  %v5501_v0 = vpop.f32.mrf.mxu1 }
 0x3c0   : > { %v5403_v7 = vadd.f32 %v5402_v29, %v5314_v37 }
 0x3c1   : > { %v5575_v51 = vpop.f32.mrf.mxu2 }
 0x3c2   : > { %v9626_v16 = vadd.f32 %v5575_v51, %v5487_v24  ;;  %v5492_v62 = vadd.f32 %v5491_v45, %v5403_v7 }
 0x3c4   : > { %5634 = vst [vmem:[%s9443_s21 + $0x70] sm:$0xff] %v9626_v16 }
 0x3c5   : > { %v5315_v23 = vpop.f32.mrf.mxu3 }
 0x3c6   : > { %v5316_v50 = vadd.f32 %v5315_v23, %v9274_v48  ;;  %v5414_v45 = vpop.f32.mrf.mxu0  ;;  %v5503_v46 = vpop.f32.mrf.mxu1 }
 0x3c8   : > { %v5405_v53 = vadd.f32 %v5404_v19, %v5316_v50  ;;  %v5652_v50 = vadd.f32 %v9459_v17, %v9445_v38 }
 0x3c9   : > { %v5577_v9 = vpop.f32.mrf.mxu2 }
 0x3ca   : > { %v9631_v44 = vadd.f32 %v5577_v9, %v5489_v21  ;;  %v5494_v42 = vadd.f32 %v5493_v20, %v5405_v53 }
 0x3cc   : > { %5635 = vst [vmem:[%s9443_s21 + $0x78] sm:$0xff] %v9631_v44 }
 0x3cd   : > { %v5318_v13 = vpop.f32.mrf.mxu3 }
 0x3ce   : > { %v5319_v29 = vadd.f32 %v5318_v13, %v10570_v3  ;;  %v5417_v24 = vpop.f32.mrf.mxu0  ;;  %v5506_v6 = vpop.f32.mrf.mxu1 }
 0x3d0   : > { %v5408_v10 = vadd.f32 %v5407_v49, %v5319_v29 }
 0x3d1   : > { %v5580_v39 = vpop.f32.mrf.mxu2 }
 0x3d2   : > { %v9636_v30 = vadd.f32 %v5580_v39, %v5492_v62  ;;  %v5497_v15 = vadd.f32 %v5496_v59, %v5408_v10  ;;  %v10571_v59 = vld [vmem:[#allocation55_spill] sm:$0xff] }
 0x3d4   : > { %5636 = vst [vmem:[%s9443_s21 + $0x80] sm:$0xff] %v9636_v30 }
 0x3d5   : > { %v5320_v26 = vpop.f32.mrf.mxu3 }
 0x3d6   : > { %v5321_v19 = vadd.f32 %v5320_v26, %v9297_v47  ;;  %v5419_v7 = vpop.f32.mrf.mxu0 }
 0x3d8   : > { %v5410_v40 = vadd.f32 %v5409_v11, %v5321_v19 }
 0x3d9   : > { %v5582_v52 = vpop.f32.mrf.mxu2 }
 0x3da   : > { %v9641_v8 = vadd.f32 %v5582_v52, %v5494_v42  ;;  %v5499_v31 = vadd.f32 %v5498_v60, %v5410_v40  ;;  %v5508_v60 = vpop.f32.mrf.mxu1 }
 0x3dc   : > { %5637 = vst [vmem:[%s9443_s21 + $0x88] sm:$0xff] %v9641_v8 }
 0x3dd   : > { %v5323_v48 = vpop.f32.mrf.mxu3 }
 0x3de   : > { %v5324_v25 = vadd.f32 %v5323_v48, %v9305_v22  ;;  %v5422_v29 = vpop.f32.mrf.mxu0 }
 0x3e0   : > { %v5413_v23 = vadd.f32 %v5412_v5, %v5324_v25  ;;  %v5653_v5 = vadd.f32 %v5652_v50, %v9473_v28 }
 0x3e1   : > { %v5585_v63 = vpop.f32.mrf.mxu2 }
 0x3e2   : > { %v9646_v12 = vadd.f32 %v5585_v63, %v5497_v15  ;;  %v5502_v21 = vadd.f32 %v5501_v0, %v5413_v23  ;;  %v5654_v0 = vadd.f32 %v5653_v5, %v9491_v61  ;;  %v5511_v48 = vpop.f32.mrf.mxu1  ;;  %v10573_v23 = vld [vmem:[#allocation66_spill] sm:$0xff] }
 0x3e4   : > { %5638 = vst [vmem:[%s9443_s21 + $0x90] sm:$0xff] %v9646_v12  ;;  %v5655_v52 = vadd.f32 %v5654_v0, %v9503_v57 }
 0x3e5   : > { %v5325_v20 = vpop.f32.mrf.mxu3 }
 0x3e6   : > { %v5326_v37 = vadd.f32 %v5325_v20, %v10571_v59  ;;  %v5656_v10 = vadd.f32 %v5655_v52, %v9519_v54 }
 0x3e8   : > { %v5415_v13 = vadd.f32 %v5414_v45, %v5326_v37  ;;  %v5657_v63 = vadd.f32 %v5656_v10, %v9533_v33 }
 0x3e9   : > { %v5587_v49 = vpop.f32.mrf.mxu2 }
 0x3ea   : > { %v9651_v51 = vadd.f32 %v5587_v49, %v5499_v31  ;;  %v5504_v39 = vadd.f32 %v5503_v46, %v5415_v13  ;;  %v5658_v40 = vadd.f32 %v5657_v63, %v9551_v2  ;;  %v5513_v37 = vpop.f32.mrf.mxu1 }
 0x3ec   : > { %5639 = vst [vmem:[%s9443_s21 + $0x98] sm:$0xff] %v9651_v51  ;;  %v5659_v31 = vadd.f32 %v5658_v40, %v9565_v36 }
 0x3ed   : > { %v5328_v47 = vpop.f32.mrf.mxu3 }
 0x3ee   : > { %v5329_v62 = vadd.f32 %v5328_v47, %v9328_v34  ;;  %v10572_v34 = vld [vmem:[#allocation56_spill] sm:$0xff]  ;;  %v5660_v49 = vadd.f32 %v5659_v31, %v9584_v43 }
 0x3f0   : > { %v5418_v3 = vadd.f32 %v5417_v24, %v5329_v62  ;;  %v5424_v24 = vpop.f32.mrf.mxu0 }
 0x3f1   : > { %v5590_v9 = vpop.f32.mrf.mxu2 }
 0x3f2   : > { %v9656_v11 = vadd.f32 %v5590_v9, %v5502_v21  ;;  %v5507_v19 = vadd.f32 %v5506_v6, %v5418_v3  ;;  %v5661_v21 = vadd.f32 %v5660_v49, %v9594_v58 }
 0x3f4   : > { %5640 = vst [vmem:[%s9443_s21 + $0xa0] sm:$0xff] %v9656_v11 }
 0x3f5   : > { %v5330_v22 = vpop.f32.mrf.mxu3 }
 0x3f6   : > { %v5331_v45 = vadd.f32 %v5330_v22, %v10572_v34 }
 0x3f8   : > { %v5420_v20 = vadd.f32 %v5419_v7, %v5331_v45  ;;  %v5662_v7 = vadd.f32 %v5661_v21, %v9602_v27 }
 0x3f9   : > { %v5592_v53 = vpop.f32.mrf.mxu2 }
 0x3fa   : > { %v9664_v26 = vadd.f32 %v5592_v53, %v5504_v39  ;;  %v5509_v6 = vadd.f32 %v5508_v60, %v5420_v20  ;;  %v5663_v50 = vadd.f32 %v5662_v7, %v9612_v1  ;;  %v5427_v53 = vpop.f32.mrf.mxu0 }
 0x3fc   : > { %5641 = vst [vmem:[%s9443_s21 + $0xa8] sm:$0xff] %v9664_v26  ;;  %v5664_v62 = vadd.f32 %v5663_v50, %v9619_v56 }
 0x3fd   : > { %v5333_v42 = vpop.f32.mrf.mxu3 }
 0x3fe   : > { %v5334_v47 = vadd.f32 %v5333_v42, %v10573_v23  ;;  %v5665_v0 = vadd.f32 %v5664_v62, %v9626_v16  ;;  %v5516_v42 = vpop.f32.mrf.mxu1 }
 0x400   : > { %v5423_v13 = vadd.f32 %v5422_v29, %v5334_v47  ;;  %v5666_v29 = vadd.f32 %v5665_v0, %v9631_v44 }
 0x401   : > { %v5595_v15 = vpop.f32.mrf.mxu2 }
 0x402   : > { %v9673_v46 = vadd.f32 %v5595_v15, %v5507_v19  ;;  %v5512_v60 = vadd.f32 %v5511_v48, %v5423_v13  ;;  %v5667_v34 = vadd.f32 %v5666_v29, %v9636_v30  ;;  %v5429_v40 = vpop.f32.mrf.mxu0 }
 0x404   : > { %5642 = vst [vmem:[%s9443_s21 + $0xb0] sm:$0xff] %v9673_v46  ;;  %v5668_v45 = vadd.f32 %v5667_v34, %v9641_v8 }
 0x405   : > { %v5335_v25 = vpop.f32.mrf.mxu3 }
 0x406   : > { %v5336_v39 = vadd.f32 %v5335_v25, %v9363_v41  ;;  %v5669_v15 = vadd.f32 %v5668_v45, %v9646_v12  ;;  %v5518_v31 = vpop.f32.mrf.mxu1 }
 0x408   : > { %v5425_v52 = vadd.f32 %v5424_v24, %v5336_v39  ;;  %v5670_v20 = vadd.f32 %v5669_v15, %v9651_v51 }
 0x409   : > { %v5597_v59 = vpop.f32.mrf.mxu2 }
 0x40a   : > { %v9682_v9 = vadd.f32 %v5597_v59, %v5509_v6  ;;  %v5514_v48 = vadd.f32 %v5513_v37, %v5425_v52  ;;  %v5671_v24 = vadd.f32 %v5670_v20, %v9656_v11  ;;  %v5432_v13 = vpop.f32.mrf.mxu0 }
 0x40c   : > { %5643 = vst [vmem:[%s9443_s21 + $0xb8] sm:$0xff] %v9682_v9  ;;  %v5672_v23 = vadd.f32 %v5671_v24, %v9664_v26 }
 0x40d   : > { %v5338_v22 = vpop.f32.mrf.mxu3 }
 0x40e   : > { %v5339_v41 = vadd.f32 %v5338_v22, %v9375_v14  ;;  %v5673_v59 = vadd.f32 %v5672_v23, %v9673_v46  ;;  %v5521_v50 = vpop.f32.mrf.mxu1 }
 0x410   : > { %v5428_v25 = vadd.f32 %v5427_v53, %v5339_v41  ;;  %v5674_v21 = vadd.f32 %v5673_v59, %v9682_v9 }
 0x411   : > { %v5600_v5 = vpop.f32.mrf.mxu2 }
 0x412   : > { %v9691_v3 = vadd.f32 %v5600_v5, %v5512_v60  ;;  %v5517_v47 = vadd.f32 %v5516_v42, %v5428_v25  ;;  %v5434_v52 = vpop.f32.mrf.mxu0 }
 0x414   : > { %5644 = vst [vmem:[%s9443_s21 + $0xc0] sm:$0xff] %v9691_v3  ;;  %v5675_v22 = vadd.f32 %v5674_v21, %v9691_v3 }
 0x415   : > { %v5340_v10 = vpop.f32.mrf.mxu3 }
 0x416   : > { %v5341_v14 = vadd.f32 %v5340_v10, %v9391_v55  ;;  %v5523_v41 = vpop.f32.mrf.mxu1 }
 0x418   : > { %v5430_v7 = vadd.f32 %v5429_v40, %v5341_v14 }
 0x419   : > { %v5602_v19 = vpop.f32.mrf.mxu2 }
 0x41a   : > { %v9700_v63 = vadd.f32 %v5602_v19, %v5514_v48  ;;  %v5519_v39 = vadd.f32 %v5518_v31, %v5430_v7  ;;  %v5437_v25 = vpop.f32.mrf.mxu0 }
 0x41c   : > { %5645 = vst [vmem:[%s9443_s21 + $0xc8] sm:$0xff] %v9700_v63  ;;  %v5676_v62 = vadd.f32 %v5675_v22, %v9700_v63 }
 0x41d   : > { %v5343_v49 = vpop.f32.mrf.mxu3 }
 0x41e   : > { %v5344_v55 = vadd.f32 %v5343_v49, %v9400_v4  ;;  %v5526_v23 = vpop.f32.mrf.mxu1 }
 0x420   : > { %v5433_v42 = vadd.f32 %v5432_v13, %v5344_v55 }
 0x421   : > { %v5605_v6 = vpop.f32.mrf.mxu2 }
 0x422   : > { %v9709_v37 = vadd.f32 %v5605_v6, %v5517_v47  ;;  %v5522_v34 = vadd.f32 %v5521_v50, %v5433_v42 }
 0x424   : > { %5646 = vst [vmem:[%s9443_s21 + $0xd0] sm:$0xff] %v9709_v37  ;;  %v5677_v5 = vadd.f32 %v5676_v62, %v9709_v37 }
 0x425   : > { %v5345_v60 = vpop.f32.mrf.mxu3 }
 0x426   : > { %v5346_v10 = vadd.f32 %v5345_v60, %v9414_v18  ;;  %v5528_v22 = vpop.f32.mrf.mxu1 }
 0x428   : > { %v5435_v19 = vadd.f32 %v5434_v52, %v5346_v10 }
 0x429   : > { %v5607_v53 = vpop.f32.mrf.mxu2 }
 0x42a   : > { %v9718_v0 = vadd.f32 %v5607_v53, %v5519_v39  ;;  %v5524_v20 = vadd.f32 %v5523_v41, %v5435_v19 }
 0x42c   : > { %5647 = vst [vmem:[%s9443_s21 + $0xd8] sm:$0xff] %v9718_v0  ;;  %v5678_v29 = vadd.f32 %v5677_v5, %v9718_v0 }
 0x42d   : > { %v5348_v48 = vpop.f32.mrf.mxu3 }
 0x42e   : > { %v5349_v40 = vadd.f32 %v5348_v48, %v9420_v32  ;;  %v5439_v32 = vpop.f32.mrf.mxu0 }
 0x430   : > { %v5438_v18 = vadd.f32 %v5437_v25, %v5349_v40 }
 0x431   : > { %v5610_v45 = vpop.f32.mrf.mxu2 }
 0x432   : > { %v9724_v4 = vadd.f32 %v5610_v45, %v5522_v34  ;;  %v5527_v6 = vadd.f32 %v5526_v23, %v5438_v18 }
 0x434   : > { %5648 = vst [vmem:[%s9443_s21 + $0xe0] sm:$0xff] %v9724_v4  ;;  %v5679_v15 = vadd.f32 %v5678_v29, %v9724_v4 }
 0x435   : > { %v5350_v14 = vpop.f32.mrf.mxu3 }
 0x436   : > { %v5351_v47 = vadd.f32 %v5350_v14, %v9431_v35 }
 0x438   : > { %v5440_v7 = vadd.f32 %v5439_v32, %v5351_v47 }
 0x439   : > { %v5612_v31 = vpop.f32.mrf.mxu2 }
 0x43a   : > { %v9730_v24 = vadd.f32 %v5612_v31, %v5524_v20  ;;  %v5529_v50 = vadd.f32 %v5528_v22, %v5440_v7 }
 0x43c   : > { %5649 = vst [vmem:[%s9443_s21 + $0xe8] sm:$0xff] %v9730_v24  ;;  %v5680_v49 = vadd.f32 %v5679_v15, %v9730_v24 }
 0x441   : > { %v5615_v59 = vpop.f32.mrf.mxu2 }
 0x442   : > { %v9736_v21 = vadd.f32 %v5615_v59, %v5527_v6 }
 0x444   : > { %5650 = vst [vmem:[%s9443_s21 + $0xf0] sm:$0xff] %v9736_v21  ;;  %v5681_v13 = vadd.f32 %v5680_v49, %v9736_v21 }
 0x449   : > { %v5617_v62 = vpop.f32.mrf.mxu2 }
 0x44a   : > { %v9741_v55 = vadd.f32 %v5617_v62, %v5529_v50 }
 0x44c   : > { %5651 = vst [vmem:[%s9443_s21 + $0xf8] sm:$0xff] %v9741_v55  ;;  %v5682_v39 = vadd.f32 %v5681_v13, %v9741_v55 }
 0x44e   : > { %v5683_v35 = vrot.slane %v5682_v39, 4 }
 0x450   : > { %v5684_v60 = vadd.f32 %v5683_v35, %v5682_v39 }
 0x452   : > { %v5685_v53 = vrot.slane %v5684_v60, 2 }
 0x454   : > { %v5686_v5 = vadd.f32 %v5685_v53, %v5684_v60 }
 0x456   : > { %v5687_v42 = vrot.slane %v5686_v5, 1 }
 0x458   : > { %v9746_v29 = vadd.f32 %v5687_v42, %v5686_v5 }
 0x45a   : > { %v9749_v52 = vmul.f32 0.00390625, %v9746_v29 }
 0x45c   : > { %v5690_v10 = vsub.f32 %v9445_v38, %v9749_v52  ;;  %v5691_v34 = vsub.f32 %v9459_v17, %v9749_v52  ;;  %v5692_v45 = vsub.f32 %v9473_v28, %v9749_v52  ;;  %v5693_v19 = vsub.f32 %v9491_v61, %v9749_v52 }
 0x45d   : > { %v5694_v15 = vsub.f32 %v9503_v57, %v9749_v52  ;;  %v5695_v25 = vsub.f32 %v9519_v54, %v9749_v52  ;;  %v5696_v17 = vsub.f32 %v9533_v33, %v9749_v52  ;;  %v5697_v49 = vsub.f32 %v9551_v2, %v9749_v52 }
 0x45e   : > { %v5722_v41 = vmul.f32 %v5690_v10, %v5690_v10  ;;  %v5723_v48 = vmul.f32 %v5691_v34, %v5691_v34  ;;  %v5724_v40 = vmul.f32 %v5692_v45, %v5692_v45  ;;  %v5725_v38 = vmul.f32 %v5693_v19, %v5693_v19 }
 0x45f   : > { %v5726_v18 = vmul.f32 %v5694_v15, %v5694_v15  ;;  %v5727_v23 = vmul.f32 %v5695_v25, %v5695_v25  ;;  %v5698_v57 = vsub.f32 %v9565_v36, %v9749_v52  ;;  %v5728_v14 = vmul.f32 %v5696_v17, %v5696_v17 }
 0x460   : > { %v5754_v20 = vadd.f32 %v5723_v48, %v5722_v41  ;;  %v5699_v54 = vsub.f32 %v9584_v43, %v9749_v52  ;;  %v5729_v6 = vmul.f32 %v5697_v49, %v5697_v49  ;;  %v5700_v33 = vsub.f32 %v9594_v58, %v9749_v52 }
 0x461   : > { %v5730_v32 = vmul.f32 %v5698_v57, %v5698_v57  ;;  %v5701_v2 = vsub.f32 %v9602_v27, %v9749_v52  ;;  %v5702_v36 = vsub.f32 %v9612_v1, %v9749_v52  ;;  %v5703_v43 = vsub.f32 %v9619_v56, %v9749_v52 }
 0x462   : > { %v5755_v31 = vadd.f32 %v5754_v20, %v5724_v40  ;;  %v5731_v13 = vmul.f32 %v5699_v54, %v5699_v54  ;;  %v5732_v50 = vmul.f32 %v5700_v33, %v5700_v33  ;;  %v5704_v58 = vsub.f32 %v9626_v16, %v9749_v52 }
 0x463   : > { %v5733_v39 = vmul.f32 %v5701_v2, %v5701_v2  ;;  %v5734_v60 = vmul.f32 %v5702_v36, %v5702_v36  ;;  %v5705_v27 = vsub.f32 %v9631_v44, %v9749_v52  ;;  %v5735_v5 = vmul.f32 %v5703_v43, %v5703_v43 }
 0x464   : > { %v5756_v28 = vadd.f32 %v5755_v31, %v5725_v38  ;;  %v5706_v1 = vsub.f32 %v9636_v30, %v9749_v52  ;;  %v5736_v10 = vmul.f32 %v5704_v58, %v5704_v58  ;;  %v5707_v56 = vsub.f32 %v9641_v8, %v9749_v52 }
 0x465   : > { %v5737_v45 = vmul.f32 %v5705_v27, %v5705_v27  ;;  %v5708_v16 = vsub.f32 %v9646_v12, %v9749_v52  ;;  %v5709_v44 = vsub.f32 %v9651_v51, %v9749_v52  ;;  %v5710_v30 = vsub.f32 %v9656_v11, %v9749_v52 }
 0x466   : > { %v5757_v61 = vadd.f32 %v5756_v28, %v5726_v18  ;;  %v5738_v48 = vmul.f32 %v5706_v1, %v5706_v1  ;;  %v5739_v15 = vmul.f32 %v5707_v56, %v5707_v56  ;;  %v5711_v8 = vsub.f32 %v9664_v26, %v9749_v52 }
 0x467   : > { %v5740_v20 = vmul.f32 %v5708_v16, %v5708_v16  ;;  %v5741_v38 = vmul.f32 %v5709_v44, %v5709_v44  ;;  %v5712_v12 = vsub.f32 %v9673_v46, %v9749_v52  ;;  %v5742_v17 = vmul.f32 %v5710_v30, %v5710_v30 }
 0x468   : > { %v5758_v47 = vadd.f32 %v5757_v61, %v5727_v23  ;;  %v5713_v51 = vsub.f32 %v9682_v9, %v9749_v52  ;;  %v5743_v28 = vmul.f32 %v5711_v8, %v5711_v8  ;;  %v5714_v11 = vsub.f32 %v9691_v3, %v9749_v52 }
 0x469   : > { %v5744_v23 = vmul.f32 %v5712_v12, %v5712_v12  ;;  %v5715_v26 = vsub.f32 %v9700_v63, %v9749_v52  ;;  %v5716_v46 = vsub.f32 %v9709_v37, %v9749_v52  ;;  %v5717_v9 = vsub.f32 %v9718_v0, %v9749_v52 }
 0x46a   : > { %v5759_v59 = vadd.f32 %v5758_v47, %v5728_v14  ;;  %v5745_v57 = vmul.f32 %v5713_v51, %v5713_v51  ;;  %v5746_v47 = vmul.f32 %v5714_v11, %v5714_v11  ;;  %v5718_v3 = vsub.f32 %v9724_v4, %v9749_v52 }
 0x46b   : > { %v5748_v33 = vmul.f32 %v5716_v46, %v5716_v46  ;;  %v5719_v63 = vsub.f32 %v9730_v24, %v9749_v52  ;;  %v5720_v37 = vsub.f32 %v9736_v21, %v9749_v52  ;;  %v5721_v0 = vsub.f32 %v9741_v55, %v9749_v52 }
 0x46c   : > { %v5760_v7 = vadd.f32 %v5759_v59, %v5729_v6  ;;  %v5747_v6 = vmul.f32 %v5715_v26, %v5715_v26 }
 0x46d   : > { %v5751_v36 = vmul.f32 %v5719_v63, %v5719_v63  ;;  %v5752_v4 = vmul.f32 %v5720_v37, %v5720_v37  ;;  %v5753_v43 = vmul.f32 %v5721_v0, %v5721_v0 }
 0x46e   : > { %v5761_v22 = vadd.f32 %v5760_v7, %v5730_v32  ;;  %v5749_v7 = vmul.f32 %v5717_v9, %v5717_v9 }
 0x470   : > { %v5762_v62 = vadd.f32 %v5761_v22, %v5731_v13  ;;  %v5750_v13 = vmul.f32 %v5718_v3, %v5718_v3 }
 0x472   : > { %v5763_v35 = vadd.f32 %v5762_v62, %v5732_v50 }
 0x474   : > { %v5764_v53 = vadd.f32 %v5763_v35, %v5733_v39 }
 0x476   : > { %v5765_v42 = vadd.f32 %v5764_v53, %v5734_v60 }
 0x478   : > { %v5766_v34 = vadd.f32 %v5765_v42, %v5735_v5 }
 0x47a   : > { %v5767_v41 = vadd.f32 %v5766_v34, %v5736_v10 }
 0x47c   : > { %v5768_v19 = vadd.f32 %v5767_v41, %v5737_v45 }
 0x47e   : > { %v5769_v40 = vadd.f32 %v5768_v19, %v5738_v48 }
 0x480   : > { %v5770_v25 = vadd.f32 %v5769_v40, %v5739_v15 }
 0x482   : > { %v5771_v31 = vadd.f32 %v5770_v25, %v5740_v20 }
 0x484   : > { %v5772_v18 = vadd.f32 %v5771_v31, %v5741_v38 }
 0x486   : > { %v5773_v49 = vadd.f32 %v5772_v18, %v5742_v17 }
 0x488   : > { %v5774_v61 = vadd.f32 %v5773_v49, %v5743_v28 }
 0x48a   : > { %v5775_v14 = vadd.f32 %v5774_v61, %v5744_v23 }
 0x48c   : > { %v5776_v54 = vadd.f32 %v5775_v14, %v5745_v57 }
 0x48e   : > { %v5777_v59 = vadd.f32 %v5776_v54, %v5746_v47 }
 0x490   : > { %v5778_v32 = vadd.f32 %v5777_v59, %v5747_v6 }
 0x492   : > { %v5779_v2 = vadd.f32 %v5778_v32, %v5748_v33 }
 0x494   : > { %v5780_v22 = vadd.f32 %v5779_v2, %v5749_v7 }
 0x496   : > { %v5781_v50 = vadd.f32 %v5780_v22, %v5750_v13 }
 0x498   : > { %v5782_v62 = vadd.f32 %v5781_v50, %v5751_v36 }
 0x49a   : > { %v5783_v39 = vadd.f32 %v5782_v62, %v5752_v4 }
 0x49c   : > { %v5784_v35 = vadd.f32 %v5783_v39, %v5753_v43 }
 0x49e   : > { %v5785_v24 = vrot.slane %v5784_v35, 4 }
 0x4a0   : > { %v5786_v58 = vadd.f32 %v5785_v24, %v5784_v35 }
 0x4a2   : > { %v5787_v60 = vrot.slane %v5786_v58, 2 }
 0x4a4   : > { %v5788_v53 = vadd.f32 %v5787_v60, %v5786_v58 }
 0x4a6   : > { %v5789_v21 = vrot.slane %v5788_v53, 1 }
 0x4a8   : > { %v5790_v55 = vadd.f32 %v5789_v21, %v5788_v53 }
 0x4aa   : > { %v5792_v52 = vsel %vm5791_vm2, %v9746_v29, %v5790_v55 }
 0x4ab   : > { %5793 = vst [vmem:[%s529_s24] sm:$0x3] %v5792_v52 }
 0x4ac PF: > { %s21_s15 = sadd.s32 1, %s6499_s15   ;;  %s10574_s13 = smov %s6495_s14 }
 0x4ad   : > { %p18_p10 = scmp.ge.s32.totalorder %s21_s15, 4   ;;  %s10575_s14 = smov %s10577_s16 }
 0x4af   :  { %20 = sbr.rel (!%p18_p10) target bundleno = 2 (0x2), region = 104 }

</bundles_post_ra>
